<compile_context>
chip_gen: v5e
topology: v5e:2x2
jax: 0.10.0
libtpu: 0.0.40
codegen_flags: <defaults>
</compile_context>

<pallas_src>
import math

import jax
import jax.numpy as jnp
from jax.experimental import pallas as pl
from jax.experimental.pallas import tpu as pltpu


def _round_up(a, b):
    return (a + b - 1) // b * b


def _ffn_kernel_acc_in_out(x_ref, w1_ref, b1_ref, w2_ref, b2_ref, o_ref):
    """Grid = (m_tiles, ff_tiles).  f32 output block doubles as the accumulator:
       out += relu(x @ W1[:, j] + b1[j]) @ W2[j, :];  out += b2 at the last j."""
    j = pl.program_id(1)

    @pl.when(j == 0)
    def _():
        o_ref[...] = jnp.zeros_like(o_ref)

    xb = x_ref[...].astype(jnp.bfloat16)          # no-op when x was pre-cast
    h = jnp.dot(xb, w1_ref[...], preferred_element_type=jnp.float32)
    h = jnp.maximum(h + b1_ref[pl.ds(j, 1), :], 0.0)       # (tm, tf) f32
    # TODO(synk): dropout omitted (inference semantics; nn.Dropout is identity in eval).
    o_ref[...] += jnp.dot(h.astype(w2_ref.dtype), w2_ref[...],
                          preferred_element_type=jnp.float32)

    @pl.when(j == pl.num_programs(1) - 1)
    def _():
        o_ref[...] += b2_ref[...]


def _ffn_kernel_scratch_acc(x_ref, w1_ref, b1_ref, w2_ref, b2_ref, o_ref, acc_ref):
    """Same computation, with an f32 scratch accumulator for non-f32 outputs."""
    j = pl.program_id(1)

    @pl.when(j == 0)
    def _():
        acc_ref[...] = jnp.zeros_like(acc_ref)

    xb = x_ref[...].astype(jnp.bfloat16)
    h = jnp.dot(xb, w1_ref[...], preferred_element_type=jnp.float32)
    h = jnp.maximum(h + b1_ref[pl.ds(j, 1), :], 0.0)
    acc_ref[...] += jnp.dot(h.astype(w2_ref.dtype), w2_ref[...],
                            preferred_element_type=jnp.float32)

    @pl.when(j == pl.num_programs(1) - 1)
    def _():
        o_ref[...] = (acc_ref[...] + b2_ref[...]).astype(o_ref.dtype)


def _select_config():
    """Per-generation (tm, tf, cast_x_in_kernel, vmem_cap_bytes)."""
    kind = jax.devices()[0].device_kind.lower()
    if "v7" in kind or "7x" in kind:
        # 64 MiB VMEM; ~1.6 TB/s per-core HBM share => tm ~ 640 rows per core.
        # Keep x bf16 from the wrapper so the f32 output tile + weights fit.
        return 640, 512, False, 56 * 1024 * 1024
    if "v5 lite" in kind or "v5e" in kind or "v5lite" in kind:
        # Compute-bound already at ~240 rows; bigger tiles only cost VMEM.
        return 384, 512, True, 100 * 1024 * 1024
    # v6e and other 128 MiB-VMEM parts: need ~640 FLOPs/byte vs. streamed weights.
    return 896, 512, True, 104 * 1024 * 1024


def ffn_forward(x, w1, b1, w2, b2, *, tm=None, tf=None):
    """x: (B, S, H) -> (B, S, H).  Weights stored as [in, out] (y = x @ W + b).

    w1/w2 should already be bf16 (cast once at parameter-load time); the astype
    below is then a no-op.  Biases stay f32.
    """
    B, S, H = x.shape
    F = w1.shape[1]
    M = B * S

    tm_d, tf_d, cast_x_in_kernel, vmem_cap = _select_config()
    tm = tm_d if tm is None else tm
    tf = tf_d if tf is None else tf

    # Clamp tile sizes to the (padded) problem size; keep sublane/lane alignment.
    tm = min(tm, _round_up(M, 16))
    tf = min(tf, _round_up(F, 128))
    M_pad = _round_up(M, tm)
    F_pad = _round_up(F, tf)
    n_ft = F_pad // tf

    x2 = x.reshape(M, H)
    if not cast_x_in_kernel:
        x2 = x2.astype(jnp.bfloat16)      # v7x: halve x-tile VMEM to fit 64 MiB
    # Production note: do these casts / the F padding once at parameter-load time.
    w1b = w1.astype(jnp.bfloat16)
    w2b = w2.astype(jnp.bfloat16)
    b1f = b1.astype(jnp.float32).reshape(1, F)
    b2f = b2.astype(jnp.float32).reshape(1, H)

    if M_pad != M:
        x2 = jnp.pad(x2, ((0, M_pad - M), (0, 0)))
    if F_pad != F:
        w1b = jnp.pad(w1b, ((0, 0), (0, F_pad - F)))
        b1f = jnp.pad(b1f, ((0, 0), (0, F_pad - F)))
        w2b = jnp.pad(w2b, ((0, F_pad - F), (0, 0)))
    b1f = b1f.reshape(n_ft, tf)           # VMEM-resident; kernel slices row j

    grid = (M_pad // tm, n_ft)
    out_dtype = x.dtype
    out_itemsize = jnp.dtype(out_dtype).itemsize
    x_itemsize = jnp.dtype(x2.dtype).itemsize
    acc_in_out = out_dtype == jnp.float32

    # Accurate VMEM footprint: double-buffered x/W1/W2/out tiles, resident b1/b2,
    # the f32 ReLU intermediate plus its bf16 copy, optional scratch accumulator.
    est = (2 * tm * H * x_itemsize              # x tiles
           + 2 * H * tf * 2                     # W1 tiles (bf16)
           + 2 * tf * H * 2                     # W2 tiles (bf16)
           + 2 * F_pad * 4                      # b1 (resident)
           + 2 * H * 4                          # b2 (resident)
           + 2 * tm * H * out_itemsize          # output tiles
           + (0 if acc_in_out else tm * H * 4)  # accumulator scratch
           + tm * tf * (4 + 2))                 # relu intermediate f32 + bf16 copy
    vmem_limit = int(min(vmem_cap,
                         max(16 * 1024 * 1024, int(est * 1.2) + (2 << 20))))

    n_mt = M_pad // tm
    cost = pl.CostEstimate(
        flops=4 * M_pad * H * F_pad,            # two matmuls, 2*M*H*F each
        transcendentals=0,
        bytes_accessed=(M_pad * H * (x_itemsize + out_itemsize)
                        + n_mt * 2 * H * F_pad * 2      # W1+W2 streamed per row tile
                        + F_pad * 4 + H * 4))

    kernel = _ffn_kernel_acc_in_out if acc_in_out else _ffn_kernel_scratch_acc
    scratch = [] if acc_in_out else [pltpu.VMEM((tm, H), jnp.float32)]

    out2 = pl.pallas_call(
        kernel,
        out_shape=jax.ShapeDtypeStruct((M_pad, H), out_dtype),
        grid_spec=pltpu.PrefetchScalarGridSpec(
            num_scalar_prefetch=0,
            grid=grid,
            in_specs=[
                pl.BlockSpec((tm, H), lambda i, j: (i, 0)),      # x row tile
                pl.BlockSpec((H, tf), lambda i, j: (0, j)),      # W1 ff slice
                pl.BlockSpec((n_ft, tf), lambda i, j: (0, 0)),   # b1 (resident)
                pl.BlockSpec((tf, H), lambda i, j: (j, 0)),      # W2 ff slice
                pl.BlockSpec((1, H), lambda i, j: (0, 0)),       # b2 (resident)
            ],
            out_specs=pl.BlockSpec((tm, H), lambda i, j: (i, 0)),
            scratch_shapes=scratch,
        ),
        compiler_params=pltpu.CompilerParams(
            dimension_semantics=("parallel", "arbitrary"),
            vmem_limit_bytes=vmem_limit,
        ),
        cost_estimate=cost,
    )(x2, w1b, b1f, w2b, b2f)

    if M_pad != M:
        out2 = out2[:M]
    return out2.reshape(B, S, H)


def init_linear(key, in_size, out_size, dtype=jnp.float32):
    """Deterministic init mimicking nn.Linear defaults (uniform +/- 1/sqrt(in))."""
    kw, kb = jax.random.split(key)
    bound = 1.0 / math.sqrt(in_size)
    w = jax.random.uniform(kw, (in_size, out_size), dtype, -bound, bound)
    b = jax.random.uniform(kb, (1, out_size), dtype, -bound, bound)
    return w, b


if __name__ == "__main__":
    key = jax.random.PRNGKey(0)
    k_x, k_fc1, k_fc2 = jax.random.split(key, 3)

    # Small but lane-aligned shapes (multiples of 128) so MXU columns and the
    # output stores are fully utilized; ff axis gives a 2-step reduction grid.
    batch, seq = 4, 128
    hidden_dimension, ff_dimension = 128, 1024
    dropout_rate = 0.1  # inactive at inference (nn.Dropout is identity in eval)

    x = jax.random.normal(k_x, (batch, seq, hidden_dimension), jnp.float32)
    w1, b1 = init_linear(k_fc1, hidden_dimension, ff_dimension)
    w2, b2 = init_linear(k_fc2, ff_dimension, hidden_dimension)

    # "Parameter load": store matmul weights in bf16 once so the per-call cast
    # inside ffn_forward is a no-op (biases stay f32).
    w1 = w1.astype(jnp.bfloat16)
    w2 = w2.astype(jnp.bfloat16)

    out = ffn_forward(x, w1, b1, w2, b2)
    jax.block_until_ready(out)

    # Plain-JAX reference mirroring the kernel's bf16-matmul / f32-accumulate math.
    xb = x.reshape(-1, hidden_dimension).astype(jnp.bfloat16)
    h_ref = jnp.maximum(
        jnp.dot(xb, w1, preferred_element_type=jnp.float32)
        + b1.astype(jnp.float32), 0.0)
    ref = (jnp.dot(h_ref.astype(jnp.bfloat16), w2,
                   preferred_element_type=jnp.float32)
           + b2.astype(jnp.float32))
    ref = ref.reshape(batch, seq, hidden_dimension).astype(x.dtype)

    assert out.shape == (batch, seq, hidden_dimension)
    assert jnp.allclose(out, ref, atol=5e-3, rtol=5e-3), float(
        jnp.max(jnp.abs(out - ref)))

    print("KERNEL_OK")
</pallas_src>

<mosaic_0001>
module attributes {stable_mosaic.version = 11 : i64} {
  func.func @_ffn_kernel_acc_in_out(%arg0: i32, %arg1: i32, %arg2: memref<512x128xf32, #tpu.memory_space<vmem>>, %arg3: memref<128x512xbf16, #tpu.memory_space<vmem>>, %arg4: memref<2x512xf32, #tpu.memory_space<vmem>>, %arg5: memref<512x128xbf16, #tpu.memory_space<vmem>>, %arg6: memref<1x128xf32, #tpu.memory_space<vmem>>, %arg7: memref<512x128xf32, #tpu.memory_space<vmem>>) attributes {dimension_semantics = [#tpu.dimension_semantics<parallel>, #tpu.dimension_semantics<arbitrary>], iteration_bounds = array<i64: 1, 2>, scalar_prefetch = 0 : i64, scratch_operands = 0 : i64, tpu.core_type = #tpu.core_type<tc>, window_params = [{transform_indices = @transform_0, window_bounds = array<i64: 512, 128>}, {transform_indices = @transform_1, window_bounds = array<i64: 128, 512>}, {pipeline_mode = #tpu.pipeline_mode<synchronous>, transform_indices = @transform_2, window_bounds = array<i64: 2, 512>}, {transform_indices = @transform_3, window_bounds = array<i64: 512, 128>}, {pipeline_mode = #tpu.pipeline_mode<synchronous>, transform_indices = @transform_4, window_bounds = array<i64: 1, 128>}, {transform_indices = @transform_5, window_bounds = array<i64: 512, 128>}]} {
    %c0_i32 = arith.constant 0 : i32
    %0 = arith.cmpi eq, %arg1, %c0_i32 : i32
    %1 = arith.extui %0 : i1 to i32
    %c0_i32_0 = arith.constant 0 : i32
    %2 = arith.cmpi ne, %1, %c0_i32_0 : i32
    scf.if %2 {
      %cst_14 = arith.constant 0.000000e+00 : f32
      %22 = vector.broadcast %cst_14 : f32 to vector<512x128xf32>
      %c0_15 = arith.constant 0 : index
      %c0_16 = arith.constant 0 : index
      %23 = vector.load %arg7[%c0_15, %c0_16] : memref<512x128xf32, #tpu.memory_space<vmem>>, vector<512x128xf32>
      tpu.vector_store %arg7[%c0_15, %c0_16], %22 {strides = array<i32>} : memref<512x128xf32, #tpu.memory_space<vmem>>, vector<512x128xf32>,
    } else {
    }
    %c0 = arith.constant 0 : index
    %c0_1 = arith.constant 0 : index
    %3 = vector.load %arg2[%c0, %c0_1] : memref<512x128xf32, #tpu.memory_space<vmem>>, vector<512x128xf32>
    %4 = arith.truncf %3 : vector<512x128xf32> to vector<512x128xbf16>
    %c0_2 = arith.constant 0 : index
    %c0_3 = arith.constant 0 : index
    %5 = vector.load %arg3[%c0_2, %c0_3] : memref<128x512xbf16, #tpu.memory_space<vmem>>, vector<128x512xbf16>
    %cst = arith.constant dense<0.000000e+00> : vector<512x512xf32>
    %6 = tpu.matmul %4, %5, %cst {dimension_numbers = #tpu.dot_dimension_numbers<[1], [0], [0], [1], [0, 0, 1, 1], [], []>} : vector<512x128xbf16>, vector<128x512xbf16>, vector<512x512xf32> -> vector<512x512xf32>
    %7 = arith.index_cast %arg1 : i32 to index
    %c0_4 = arith.constant 0 : index
    %8 = vector.load %arg4[%7, %c0_4] : memref<2x512xf32, #tpu.memory_space<vmem>>, vector<1x512xf32>
    %9 = vector.broadcast %8 : vector<1x512xf32> to vector<512x512xf32>
    %10 = arith.addf %6, %9 : vector<512x512xf32>
    %cst_5 = arith.constant 0.000000e+00 : f32
    %11 = vector.broadcast %cst_5 : f32 to vector<512x512xf32>
    %12 = arith.maximumf %10, %11 : vector<512x512xf32>
    %c0_6 = arith.constant 0 : index
    %c0_7 = arith.constant 0 : index
    %13 = vector.load %arg7[%c0_6, %c0_7] : memref<512x128xf32, #tpu.memory_space<vmem>>, vector<512x128xf32>
    %14 = arith.truncf %12 : vector<512x512xf32> to vector<512x512xbf16>
    %c0_8 = arith.constant 0 : index
    %c0_9 = arith.constant 0 : index
    %15 = vector.load %arg5[%c0_8, %c0_9] : memref<512x128xbf16, #tpu.memory_space<vmem>>, vector<512x128xbf16>
    %cst_10 = arith.constant dense<0.000000e+00> : vector<512x128xf32>
    %16 = tpu.matmul %14, %15, %cst_10 {dimension_numbers = #tpu.dot_dimension_numbers<[1], [0], [0], [1], [0, 0, 1, 1], [], []>} : vector<512x512xbf16>, vector<512x128xbf16>, vector<512x128xf32> -> vector<512x128xf32>
    %17 = arith.addf %13, %16 : vector<512x128xf32>
    %c0_11 = arith.constant 0 : index
    %c0_12 = arith.constant 0 : index
    %18 = vector.load %arg7[%c0_11, %c0_12] : memref<512x128xf32, #tpu.memory_space<vmem>>, vector<512x128xf32>
    tpu.vector_store %arg7[%c0_11, %c0_12], %17 {strides = array<i32>} : memref<512x128xf32, #tpu.memory_space<vmem>>, vector<512x128xf32>,
    %c1_i32 = arith.constant 1 : i32
    %19 = arith.cmpi eq, %arg1, %c1_i32 : i32
    %20 = arith.extui %19 : i1 to i32
    %c0_i32_13 = arith.constant 0 : i32
    %21 = arith.cmpi ne, %20, %c0_i32_13 : i32
    scf.if %21 {
      %c0_14 = arith.constant 0 : index
      %c0_15 = arith.constant 0 : index
      %22 = vector.load %arg7[%c0_14, %c0_15] : memref<512x128xf32, #tpu.memory_space<vmem>>, vector<512x128xf32>
      %c0_16 = arith.constant 0 : index
      %c0_17 = arith.constant 0 : index
      %23 = vector.load %arg6[%c0_16, %c0_17] : memref<1x128xf32, #tpu.memory_space<vmem>>, vector<1x128xf32>
      %24 = vector.broadcast %23 : vector<1x128xf32> to vector<512x128xf32>
      %25 = arith.addf %22, %24 : vector<512x128xf32>
      %c0_18 = arith.constant 0 : index
      %c0_19 = arith.constant 0 : index
      %26 = vector.load %arg7[%c0_18, %c0_19] : memref<512x128xf32, #tpu.memory_space<vmem>>, vector<512x128xf32>
      tpu.vector_store %arg7[%c0_18, %c0_19], %25 {strides = array<i32>} : memref<512x128xf32, #tpu.memory_space<vmem>>, vector<512x128xf32>,
    } else {
    }
    return
  }
  func.func @transform_0(%arg0: i32, %arg1: i32) -> (i32, i32) {
    %c0_i32 = arith.constant 0 : i32
    %c0_i32_0 = arith.constant 0 : i32
    return %arg0, %c0_i32 : i32, i32
  }
  func.func @transform_1(%arg0: i32, %arg1: i32) -> (i32, i32) {
    %c0_i32 = arith.constant 0 : i32
    %c0_i32_0 = arith.constant 0 : i32
    return %c0_i32, %arg1 : i32, i32
  }
  func.func @transform_2(%arg0: i32, %arg1: i32) -> (i32, i32) {
    %c0_i32 = arith.constant 0 : i32
    %c0_i32_0 = arith.constant 0 : i32
    %c0_i32_1 = arith.constant 0 : i32
    return %c0_i32, %c0_i32_0 : i32, i32
  }
  func.func @transform_3(%arg0: i32, %arg1: i32) -> (i32, i32) {
    %c0_i32 = arith.constant 0 : i32
    %c0_i32_0 = arith.constant 0 : i32
    return %arg1, %c0_i32 : i32, i32
  }
  func.func @transform_4(%arg0: i32, %arg1: i32) -> (i32, i32) {
    %c0_i32 = arith.constant 0 : i32
    %c0_i32_0 = arith.constant 0 : i32
    %c0_i32_1 = arith.constant 0 : i32
    return %c0_i32, %c0_i32_0 : i32, i32
  }
  func.func @transform_5(%arg0: i32, %arg1: i32) -> (i32, i32) {
    %c0_i32 = arith.constant 0 : i32
    %c0_i32_0 = arith.constant 0 : i32
    return %arg0, %c0_i32 : i32, i32
  }
}

</mosaic_0001>

<bundles_post_ra>
// kernel: tpu_custom_call.1
= control target key start
LH: loop header
LB: loop body
LE: loop exit
PB: predicated region body
PF: predicated region fallthrough
CT: control target
= control target key end

     0   :  { %s4941_s0 = inlined_call_operand.hbm [shape: f32[512,128], index: 0, kind: input, shape index: {}]   ;;  %s4942_s1 = inlined_call_operand.hbm [shape: bf16[128,1024], index: 1, kind: input, shape index: {}]   ;;  %s4943_s2 = inlined_call_operand.hbm [shape: f32[2,512], index: 2, kind: input, shape index: {}]   ;;  %s4944_s3 = inlined_call_operand.hbm [shape: bf16[1024,128], index: 3, kind: input, shape index: {}]   ;;  %s4945_s4 = inlined_call_operand.vmem [shape: f32[1,128], index: 4, kind: input, shape index: {}]   ;;  %s4946_s5 = inlined_call_operand.hbm [shape: f32[512,128], index: 5, kind: output, shape index: {}]  }
   0x1   :  { %4949 = sst [smem:[#allocation71_spill]] %s4941_s0 }
   0x2   :  { %4950 = sst [smem:[#allocation72_spill]] %s4943_s2 }
   0x3   :  { %10 = vsyncpa [#allocation3], 0 }
   0x4   :  { %11 = vsyncpa [#allocation6], 0 }
   0x5   :  { %13 = vsyncpa [#allocation6 + $0x1], 0 }
   0x6   :  { %14 = vsyncpa [#allocation9], 0 }
   0x7   :  { %16 = vsyncpa [#allocation9 + $0x1], 0 }
   0x8   :  { %17 = vsyncpa [#allocation4], 0  ;;  %s3922_s18 = smov 0   ;;  %s3924_s19 = smov 0  }
   0x9   :  { %s3926_s20 = smov 0   ;;  %s3928_s21 = smov 0  }
   0xa   :  { %s3930_s22 = smov 0   ;;  %s3932_s23 = smov 0  }
   0xb LB: > { %4951 = sst [smem:[#allocation16_spill]] %s3865_s20  ;;  %s3951_s24 = sadd.s32 4294967295, %s3877_s23   ;;  %s3877_s23 = sphi %s3932_s23, %s23_s23   ;;  %s3873_s22 = sphi %s3930_s22, %s5070_s22   ;;  %s3869_s21 = sphi %s3928_s21, %s5069_s21   ;;  %s3865_s20 = sphi %s3926_s20, %s5065_s20   ;;  %s3861_s19 = sphi %s3924_s19, %s5068_s19   ;;  %s3857_s18 = sphi %s3922_s18, %s5067_s18  }
   0xc   : > { %s32_s25 = sadd.s32 1, %s3873_s22  ;;  %s68_s26 = sadd.s32 1, %s3865_s20 }
   0xd   : > { %p33_p0 = scmp.ge.s32.totalorder %s32_s25, 2  ;;  %p75_p1 = scmp.ne.s32.totalorder %s3865_s20, %s3861_s19 }
   0xe   : > { %p76_p2 = scmp.eq.s32.totalorder %s3877_s23, 0  ;;  %p81_p4 = scmp.ne.s32.totalorder %s3861_s19, %s3857_s18 }
   0xf   : > { %s5072_s25 = smov (%p33_p0, %s32_s25), 0  ;;  %p82_p5 = scmp.eq.s32.totalorder %s3951_s24, 0 }
  0x10   : > { %4952 = sst [smem:[#allocation17_spill]] %s5072_s25  ;;  %p3960_p3 = por %p76_p2, %p75_p1 }
  0x11   : > { %s65_s28 = ssub.s32 %s3873_s22, %s5072_s25  ;;  %p3218_p7 = scmp.ge.s32.totalorder %s3877_s23, 1 }
  0x12   : > { %p66_p6 = scmp.eq.s32.totalorder %s65_s28, 0  ;;  %p3971_p8 = por %p82_p5, %p81_p4 }
  0x13   : > { %p186_p9 = scmp.lt.s32.totalorder %s3877_s23, 3  ;;  %s4957_s2 = sld [smem:[#allocation72_spill]] }
  0x14   : > { %s3977_s30 = scalar_select %p66_p6, %s3865_s20, %s68_s26  }
  0x15   : > { %p3979_p10 = pnand %p3218_p7, %p186_p9  ;;  %s3879_s10 = smov [#allocation7]  }
  0x16   : > { %4955 = sst [smem:[#allocation18_spill]] %s3977_s30  ;;  %s217_s11 = sshll.u32 %s3879_s10, 4  ;;  %s218_s11 = int_to_ptr.vmem [resolvable:$true] %s217_s11 }
  0x17   : > { %p3580_p11 = pneg %p3979_p10  ;;  %p3596_p13 = scmp.lt.s32.totalorder %s3877_s23, 2 }
  0x18   : > { %s4959_s0 = sld [smem:[#allocation71_spill]]  ;;  %s3880_s16 = smov [#allocation2]  }
  0x19   : > { %s215_s9 = sshll.u32 %s4957_s2, 4  ;;  %p3581_p12 = pnand %p3580_p11, %p82_p5  ;;  %s216_s9 = int_to_ptr.hbm [resolvable:$true] %s215_s9 }
  0x1a   : > { %p3993_p0 = pnand %p3596_p13, %p3960_p3  ;;  %s202_s17 = sshll.u32 %s3880_s16, 4  ;;  %s203_s17 = int_to_ptr.vmem [resolvable:$true] %s202_s17 }
  0x1b   : > { %3586 = dma.hbm_to_vmem [thread:$0]  (!%p3581_p12), %s216_s9, 128, %s218_s11, [#allocation6]  }
  0x1c   : > { %s231_s18 = sand.u32 1, %s3877_s23   ;;  %s3881_s26 = smov 128  }
  0x1d   : > { %s3882_s28 = smov 8   ;;  %s233_s7 = sand.u32 1, %s3865_s20  }
  0x1e   : > { %s200_s15 = sshll.u32 %s4959_s0, 4  ;;  %s3222_s27 = sshll.u32 %s233_s7, 8  ;;  %s201_s15 = int_to_ptr.hbm [resolvable:$true] %s200_s15 }
  0x1f   : > { %3583 = dma.hbm_to_vmem [thread:$0]  (!%p3581_p12), %s201_s15, 8192, %s203_s17, [#allocation3], %s3881_s26, %s3881_s26, %s3882_s28  }
  0x20   : > { %s3497_s8 = sshll.u32 %s3873_s22, 4  ;;  %s235_s13 = scalar_lea.vmem [#allocation5], %s3222_s27 }
  0x21   : > { %s240_s11 = scalar_lea.hbm %s4942_s1, %s3497_s8  ;;  %s243_s14 = sshll.u32 %s235_s13, 4  ;;  %s244_s14 = int_to_ptr.vmem [resolvable:$true] %s243_s14 }
  0x22   : > { %s241_s2 = sshll.u32 %s240_s11, 4  ;;  %s232_s16 = scalar_lea.sflag [#allocation6], %s231_s18  ;;  %s242_s2 = int_to_ptr.hbm [resolvable:$true] %s241_s2 }
  0x23   : > { %s3883_s0 = smov 512   ;;  %s3884_s25 = smov 256  }
  0x24   : > { %s3885_s30 = smov 16   ;;  %s3498_s15 = sshll.u32 %s3873_s22, 8 }
  0x25   : > { %3590 = dma.hbm_to_vmem [thread:$0]  (!%p3993_p0), %s242_s2, 4096, %s244_s14, %s232_s16, %s3883_s0, %s3884_s25, %s3885_s30  }
  0x26   : > { %s262_s28 = scalar_lea.hbm %s4944_s3, %s3498_s15  ;;  %s257_s20 = scalar_lea.vmem [#allocation8], %s3222_s27 }
  0x27   : > { %s265_s9 = sshll.u32 %s257_s20, 4  ;;  %s263_s8 = sshll.u32 %s262_s28, 4  ;;  %s266_s9 = int_to_ptr.vmem [resolvable:$true] %s265_s9  ;;  %s264_s8 = int_to_ptr.hbm [resolvable:$true] %s263_s8 }
  0x28   : > { %s254_s10 = scalar_lea.sflag [#allocation9], %s233_s7  ;;  %s3886_s11 = smov 64  }
  0x29   : > { %s3887_s13 = smov 4   ;;  %277 = sbr.rel (%p3979_p10) target bundleno = 1390 (0x56e), region = 40 }
  0x2a   : > { %3593 = dma.hbm_to_vmem [thread:$0]  (!%p3993_p0), %s264_s8, 4096, %s266_s9, %s254_s10, %s3886_s11, %s3886_s11, %s3887_s13  }
  0x2e   : > { %3836 = dma.done.wait (%p82_p5), [#allocation3], 8192  }
  0x2f   : > { %3838 = vsyncadd (%p82_p5), [#allocation3], 4294959104  ;;  %s284_s0 = sand.u32 1, %s3951_s24   ;;  %s286_s2 = sand.u32 1, %s3861_s19  }
  0x30   : > { %s3230_s20 = sshll.u32 %s286_s2, 8  ;;  %s285_s25 = scalar_lea.sflag [#allocation6], %s284_s0 }
  0x31   : > { %s4022_s30 = scalar_lea.vmem [#allocation5], %s3230_s20 }
  0x32   : > { %3840 = dma.done.wait (%p3971_p8), %s285_s25, 4096  }
  0x33   : > { %3842 = vsyncadd (%p3971_p8), %s285_s25, 4294963200 }
  0x34   : > { %3844 = dma.done.wait (%p82_p5), [#allocation6], 128  }
  0x35   : > { %3846 = vsyncadd (%p82_p5), [#allocation6], 4294967168  ;;  %s300_s6 = scalar_lea.sflag [#allocation9], %s286_s2  ;;  %s4032_s12 = scalar_lea.vmem [#allocation8], %s3230_s20 }
  0x36   : > { %3848 = dma.done.wait (%p3971_p8), %s300_s6, 4096  }
  0x37   : > { %3850 = vsyncadd (%p3971_p8), %s300_s6, 4294963200  ;;  %p3233_p1 = scmp.ne.s32.totalorder %s3869_s21, 0 }
  0x39   : > { %338 = sbr.rel (%p3233_p1) target bundleno = 127 (0x7f), region = 60 }
  0x3e   : > { %v3888_v0 = vmov 0.0  }
  0x3f   : > { %339 = vst [vmem:[#allocation10] sm:$0xff] %v3888_v0 }
  0x40   : > { %340 = vst [vmem:[#allocation10 + $0x8] sm:$0xff] %v3888_v0 }
  0x41   : > { %341 = vst [vmem:[#allocation10 + $0x10] sm:$0xff] %v3888_v0 }
  0x42   : > { %342 = vst [vmem:[#allocation10 + $0x18] sm:$0xff] %v3888_v0 }
  0x43   : > { %343 = vst [vmem:[#allocation10 + $0x20] sm:$0xff] %v3888_v0 }
  0x44   : > { %344 = vst [vmem:[#allocation10 + $0x28] sm:$0xff] %v3888_v0 }
  0x45   : > { %345 = vst [vmem:[#allocation10 + $0x30] sm:$0xff] %v3888_v0 }
  0x46   : > { %346 = vst [vmem:[#allocation10 + $0x38] sm:$0xff] %v3888_v0 }
  0x47   : > { %347 = vst [vmem:[#allocation10 + $0x40] sm:$0xff] %v3888_v0 }
  0x48   : > { %348 = vst [vmem:[#allocation10 + $0x48] sm:$0xff] %v3888_v0 }
  0x49   : > { %349 = vst [vmem:[#allocation10 + $0x50] sm:$0xff] %v3888_v0 }
  0x4a   : > { %350 = vst [vmem:[#allocation10 + $0x58] sm:$0xff] %v3888_v0 }
  0x4b   : > { %351 = vst [vmem:[#allocation10 + $0x60] sm:$0xff] %v3888_v0 }
  0x4c   : > { %352 = vst [vmem:[#allocation10 + $0x68] sm:$0xff] %v3888_v0 }
  0x4d   : > { %353 = vst [vmem:[#allocation10 + $0x70] sm:$0xff] %v3888_v0 }
  0x4e   : > { %354 = vst [vmem:[#allocation10 + $0x78] sm:$0xff] %v3888_v0 }
  0x4f   : > { %355 = vst [vmem:[#allocation10 + $0x80] sm:$0xff] %v3888_v0 }
  0x50   : > { %356 = vst [vmem:[#allocation10 + $0x88] sm:$0xff] %v3888_v0 }
  0x51   : > { %357 = vst [vmem:[#allocation10 + $0x90] sm:$0xff] %v3888_v0 }
  0x52   : > { %358 = vst [vmem:[#allocation10 + $0x98] sm:$0xff] %v3888_v0 }
  0x53   : > { %359 = vst [vmem:[#allocation10 + $0xa0] sm:$0xff] %v3888_v0 }
  0x54   : > { %360 = vst [vmem:[#allocation10 + $0xa8] sm:$0xff] %v3888_v0 }
  0x55   : > { %361 = vst [vmem:[#allocation10 + $0xb0] sm:$0xff] %v3888_v0 }
  0x56   : > { %362 = vst [vmem:[#allocation10 + $0xb8] sm:$0xff] %v3888_v0 }
  0x57   : > { %363 = vst [vmem:[#allocation10 + $0xc0] sm:$0xff] %v3888_v0 }
  0x58   : > { %364 = vst [vmem:[#allocation10 + $0xc8] sm:$0xff] %v3888_v0 }
  0x59   : > { %365 = vst [vmem:[#allocation10 + $0xd0] sm:$0xff] %v3888_v0 }
  0x5a   : > { %366 = vst [vmem:[#allocation10 + $0xd8] sm:$0xff] %v3888_v0 }
  0x5b   : > { %367 = vst [vmem:[#allocation10 + $0xe0] sm:$0xff] %v3888_v0 }
  0x5c   : > { %368 = vst [vmem:[#allocation10 + $0xe8] sm:$0xff] %v3888_v0 }
  0x5d   : > { %369 = vst [vmem:[#allocation10 + $0xf0] sm:$0xff] %v3888_v0 }
  0x5e   : > { %370 = vst [vmem:[#allocation10 + $0xf8] sm:$0xff] %v3888_v0 }
  0x5f   : > { %371 = vst [vmem:[#allocation10 + $0x100] sm:$0xff] %v3888_v0 }
  0x60   : > { %372 = vst [vmem:[#allocation10 + $0x108] sm:$0xff] %v3888_v0 }
  0x61   : > { %373 = vst [vmem:[#allocation10 + $0x110] sm:$0xff] %v3888_v0 }
  0x62   : > { %374 = vst [vmem:[#allocation10 + $0x118] sm:$0xff] %v3888_v0 }
  0x63   : > { %375 = vst [vmem:[#allocation10 + $0x120] sm:$0xff] %v3888_v0 }
  0x64   : > { %376 = vst [vmem:[#allocation10 + $0x128] sm:$0xff] %v3888_v0 }
  0x65   : > { %377 = vst [vmem:[#allocation10 + $0x130] sm:$0xff] %v3888_v0 }
  0x66   : > { %378 = vst [vmem:[#allocation10 + $0x138] sm:$0xff] %v3888_v0 }
  0x67   : > { %379 = vst [vmem:[#allocation10 + $0x140] sm:$0xff] %v3888_v0 }
  0x68   : > { %380 = vst [vmem:[#allocation10 + $0x148] sm:$0xff] %v3888_v0 }
  0x69   : > { %381 = vst [vmem:[#allocation10 + $0x150] sm:$0xff] %v3888_v0 }
  0x6a   : > { %382 = vst [vmem:[#allocation10 + $0x158] sm:$0xff] %v3888_v0 }
  0x6b   : > { %383 = vst [vmem:[#allocation10 + $0x160] sm:$0xff] %v3888_v0 }
  0x6c   : > { %384 = vst [vmem:[#allocation10 + $0x168] sm:$0xff] %v3888_v0 }
  0x6d   : > { %385 = vst [vmem:[#allocation10 + $0x170] sm:$0xff] %v3888_v0 }
  0x6e   : > { %386 = vst [vmem:[#allocation10 + $0x178] sm:$0xff] %v3888_v0 }
  0x6f   : > { %387 = vst [vmem:[#allocation10 + $0x180] sm:$0xff] %v3888_v0 }
  0x70   : > { %388 = vst [vmem:[#allocation10 + $0x188] sm:$0xff] %v3888_v0 }
  0x71   : > { %389 = vst [vmem:[#allocation10 + $0x190] sm:$0xff] %v3888_v0 }
  0x72   : > { %390 = vst [vmem:[#allocation10 + $0x198] sm:$0xff] %v3888_v0 }
  0x73   : > { %391 = vst [vmem:[#allocation10 + $0x1a0] sm:$0xff] %v3888_v0 }
  0x74   : > { %392 = vst [vmem:[#allocation10 + $0x1a8] sm:$0xff] %v3888_v0 }
  0x75   : > { %393 = vst [vmem:[#allocation10 + $0x1b0] sm:$0xff] %v3888_v0 }
  0x76   : > { %394 = vst [vmem:[#allocation10 + $0x1b8] sm:$0xff] %v3888_v0 }
  0x77   : > { %395 = vst [vmem:[#allocation10 + $0x1c0] sm:$0xff] %v3888_v0 }
  0x78   : > { %396 = vst [vmem:[#allocation10 + $0x1c8] sm:$0xff] %v3888_v0 }
  0x79   : > { %397 = vst [vmem:[#allocation10 + $0x1d0] sm:$0xff] %v3888_v0 }
  0x7a   : > { %398 = vst [vmem:[#allocation10 + $0x1d8] sm:$0xff] %v3888_v0 }
  0x7b   : > { %399 = vst [vmem:[#allocation10 + $0x1e0] sm:$0xff] %v3888_v0 }
  0x7c   : > { %400 = vst [vmem:[#allocation10 + $0x1e8] sm:$0xff] %v3888_v0 }
  0x7d   : > { %401 = vst [vmem:[#allocation10 + $0x1f0] sm:$0xff] %v3888_v0 }
  0x7e   : > { %402 = vst [vmem:[#allocation10 + $0x1f8] sm:$0xff] %v3888_v0 }
  0x7f PF: > { %v3350_v1 = vld [vmem:[%s4022_s30 + $0xe0] sm:$0xf]  ;;  %v3529_v2 = vld [vmem:[%s4022_s30 + $0xec] sm:$0xf0]  ;;  %v3527_v3 = vld [vmem:[%s4022_s30 + $0xe4] sm:$0xf] }
  0x80   : > { %v3351_v4 = vor.u32 %v3529_v2, %v3350_v1  ;;  %v3352_v5 = vld [vmem:[%s4022_s30 + $0xf0] sm:$0xf0]  ;;  %v3358_v6 = vld [vmem:[%s4022_s30 + $0xe8] sm:$0xf]  ;;  %v3530_v7 = vld [vmem:[%s4022_s30 + $0xf4] sm:$0xf0] }
  0x81   : > { %v3355_v8 = vor.u32 %v3527_v3, %v3352_v5  ;;  %v3359_v9 = vor.u32 %v3530_v7, %v3358_v6  ;;  %v3528_v10 = vld [vmem:[%s4022_s30 + $0xec] sm:$0xf]  ;;  %v3360_v11 = vld [vmem:[%s4022_s30 + $0xf8] sm:$0xf0]  ;;  %v3334_v12 = vld [vmem:[%s4022_s30 + $0xc0] sm:$0xf] }
  0x82   : > { %709 = vmatpush.bf16.msra.mxu0 %v3351_v4  ;;  %v3363_v13 = vor.u32 %v3528_v10, %v3360_v11  ;;  %v3525_v14 = vld [vmem:[%s4022_s30 + $0xcc] sm:$0xf0]  ;;  %v3523_v15 = vld [vmem:[%s4022_s30 + $0xc4] sm:$0xf]  ;;  %v3336_v16 = vld [vmem:[%s4022_s30 + $0xd0] sm:$0xf0] }
  0x83   : > { %878 = vmatpush.bf16.msra.mxu1 %v3355_v8  ;;  %1047 = vmatpush.bf16.msra.mxu2 %v3359_v9  ;;  %v3335_v17 = vor.u32 %v3525_v14, %v3334_v12  ;;  %v3339_v18 = vor.u32 %v3523_v15, %v3336_v16  ;;  %v3342_v19 = vld [vmem:[%s4022_s30 + $0xc8] sm:$0xf]  ;;  %v3526_v20 = vld [vmem:[%s4022_s30 + $0xd4] sm:$0xf0]  ;;  %v3524_v21 = vld [vmem:[%s4022_s30 + $0xcc] sm:$0xf] }
  0x84   : > { %1216 = vmatpush.bf16.msra.mxu3 %v3363_v13  ;;  %v3343_v22 = vor.u32 %v3526_v20, %v3342_v19  ;;  %v3344_v23 = vld [vmem:[%s4022_s30 + $0xd8] sm:$0xf0]  ;;  %v3318_v24 = vld [vmem:[%s4022_s30 + $0xa0] sm:$0xf]  ;;  %v3521_v25 = vld [vmem:[%s4022_s30 + $0xac] sm:$0xf0] }
  0x85   : > { %v3347_v26 = vor.u32 %v3524_v21, %v3344_v23  ;;  %v3519_v27 = vld [vmem:[%s4022_s30 + $0xa4] sm:$0xf]  ;;  %v3320_v28 = vld [vmem:[%s4022_s30 + $0xb0] sm:$0xf0]  ;;  %v3326_v29 = vld [vmem:[%s4022_s30 + $0xa8] sm:$0xf]  ;;  %v3319_v30 = vor.u32 %v3521_v25, %v3318_v24 }
  0x86   : > { %710 = vmatpush.bf16.msra.mxu0 %v3335_v17  ;;  %v3522_v31 = vld [vmem:[%s4022_s30 + $0xb4] sm:$0xf0]  ;;  %v3520_v32 = vld [vmem:[%s4022_s30 + $0xac] sm:$0xf]  ;;  %v3328_v33 = vld [vmem:[%s4022_s30 + $0xb8] sm:$0xf0]  ;;  %v3323_v34 = vor.u32 %v3519_v27, %v3320_v28 }
  0x87   : > { %879 = vmatpush.bf16.msra.mxu1 %v3339_v18  ;;  %1048 = vmatpush.bf16.msra.mxu2 %v3343_v22  ;;  %v3327_v35 = vor.u32 %v3522_v31, %v3326_v29  ;;  %v3302_v36 = vld [vmem:[%s4022_s30 + $0x80] sm:$0xf]  ;;  %v3517_v37 = vld [vmem:[%s4022_s30 + $0x8c] sm:$0xf0]  ;;  %v3515_v38 = vld [vmem:[%s4022_s30 + $0x84] sm:$0xf]  ;;  %v3331_v39 = vor.u32 %v3520_v32, %v3328_v33 }
  0x88   : > { %1217 = vmatpush.bf16.msra.mxu3 %v3347_v26  ;;  %v3304_v40 = vld [vmem:[%s4022_s30 + $0x90] sm:$0xf0]  ;;  %v3310_v41 = vld [vmem:[%s4022_s30 + $0x88] sm:$0xf]  ;;  %v3518_v42 = vld [vmem:[%s4022_s30 + $0x94] sm:$0xf0]  ;;  %v3303_v45 = vor.u32 %v3517_v37, %v3302_v36 }
  0x89   : > { %v3516_v43 = vld [vmem:[%s4022_s30 + $0x8c] sm:$0xf]  ;;  %v3312_v44 = vld [vmem:[%s4022_s30 + $0x98] sm:$0xf0]  ;;  %v3307_v46 = vor.u32 %v3515_v38, %v3304_v40  ;;  %v3311_v47 = vor.u32 %v3518_v42, %v3310_v41  ;;  %v3286_v48 = vld [vmem:[%s4022_s30 + $0x60] sm:$0xf] }
  0x8a   : > { %711 = vmatpush.bf16.msra.mxu0 %v3319_v30  ;;  %v3513_v49 = vld [vmem:[%s4022_s30 + $0x6c] sm:$0xf0]  ;;  %v3511_v50 = vld [vmem:[%s4022_s30 + $0x64] sm:$0xf]  ;;  %v3315_v51 = vor.u32 %v3516_v43, %v3312_v44  ;;  %v3288_v52 = vld [vmem:[%s4022_s30 + $0x70] sm:$0xf0] }
  0x8b   : > { %880 = vmatpush.bf16.msra.mxu1 %v3323_v34  ;;  %1049 = vmatpush.bf16.msra.mxu2 %v3327_v35  ;;  %v3294_v53 = vld [vmem:[%s4022_s30 + $0x68] sm:$0xf]  ;;  %v3514_v54 = vld [vmem:[%s4022_s30 + $0x74] sm:$0xf0]  ;;  %v3512_v55 = vld [vmem:[%s4022_s30 + $0x6c] sm:$0xf]  ;;  %v3287_v57 = vor.u32 %v3513_v49, %v3286_v48  ;;  %v3291_v58 = vor.u32 %v3511_v50, %v3288_v52 }
  0x8c   : > { %1218 = vmatpush.bf16.msra.mxu3 %v3331_v39  ;;  %v3296_v56 = vld [vmem:[%s4022_s30 + $0x78] sm:$0xf0]  ;;  %v3295_v59 = vor.u32 %v3514_v54, %v3294_v53  ;;  %v3270_v60 = vld [vmem:[%s4022_s30 + $0x40] sm:$0xf]  ;;  %v3509_v61 = vld [vmem:[%s4022_s30 + $0x4c] sm:$0xf0] }
  0x8d   : > { %v3507_v62 = vld [vmem:[%s4022_s30 + $0x44] sm:$0xf]  ;;  %v3299_v63 = vor.u32 %v3512_v55, %v3296_v56  ;;  %v3272_v0 = vld [vmem:[%s4022_s30 + $0x50] sm:$0xf0]  ;;  %v3278_v1 = vld [vmem:[%s4022_s30 + $0x48] sm:$0xf]  ;;  %v3271_v5 = vor.u32 %v3509_v61, %v3270_v60 }
  0x8e   : > { %712 = vmatpush.bf16.msra.mxu0 %v3303_v45  ;;  %v3510_v2 = vld [vmem:[%s4022_s30 + $0x54] sm:$0xf0]  ;;  %v3508_v3 = vld [vmem:[%s4022_s30 + $0x4c] sm:$0xf]  ;;  %v3280_v4 = vld [vmem:[%s4022_s30 + $0x58] sm:$0xf0]  ;;  %v3275_v6 = vor.u32 %v3507_v62, %v3272_v0 }
  0x8f   : > { %881 = vmatpush.bf16.msra.mxu1 %v3307_v46  ;;  %1050 = vmatpush.bf16.msra.mxu2 %v3311_v47  ;;  %v3279_v7 = vor.u32 %v3510_v2, %v3278_v1  ;;  %v3254_v8 = vld [vmem:[%s4022_s30 + $0x20] sm:$0xf]  ;;  %v3505_v9 = vld [vmem:[%s4022_s30 + $0x2c] sm:$0xf0]  ;;  %v3503_v10 = vld [vmem:[%s4022_s30 + $0x24] sm:$0xf]  ;;  %v3283_v11 = vor.u32 %v3508_v3, %v3280_v4 }
  0x90   : > { %1219 = vmatpush.bf16.msra.mxu3 %v3315_v51  ;;  %v3256_v12 = vld [vmem:[%s4022_s30 + $0x30] sm:$0xf0]  ;;  %v3262_v13 = vld [vmem:[%s4022_s30 + $0x28] sm:$0xf]  ;;  %v3506_v14 = vld [vmem:[%s4022_s30 + $0x34] sm:$0xf0]  ;;  %v3255_v17 = vor.u32 %v3505_v9, %v3254_v8 }
  0x91   : > { %v3504_v15 = vld [vmem:[%s4022_s30 + $0x2c] sm:$0xf]  ;;  %v3264_v16 = vld [vmem:[%s4022_s30 + $0x38] sm:$0xf0]  ;;  %v3259_v18 = vor.u32 %v3503_v10, %v3256_v12  ;;  %v3263_v19 = vor.u32 %v3506_v14, %v3262_v13  ;;  %v3238_v20 = vld [vmem:[%s4022_s30] sm:$0xf] }
  0x92   : > { %713 = vmatpush.bf16.msra.mxu0 %v3287_v57  ;;  %v3501_v21 = vld [vmem:[%s4022_s30 + $0xc] sm:$0xf0]  ;;  %v3499_v22 = vld [vmem:[%s4022_s30 + $0x4] sm:$0xf]  ;;  %v3267_v23 = vor.u32 %v3504_v15, %v3264_v16  ;;  %v3240_v24 = vld [vmem:[%s4022_s30 + $0x10] sm:$0xf0] }
  0x93   : > { %882 = vmatpush.bf16.msra.mxu1 %v3291_v58  ;;  %1051 = vmatpush.bf16.msra.mxu2 %v3295_v59  ;;  %v3246_v25 = vld [vmem:[%s4022_s30 + $0x8] sm:$0xf]  ;;  %v3502_v26 = vld [vmem:[%s4022_s30 + $0x14] sm:$0xf0]  ;;  %v3500_v27 = vld [vmem:[%s4022_s30 + $0xc] sm:$0xf]  ;;  %v3239_v29 = vor.u32 %v3501_v21, %v3238_v20  ;;  %v3243_v32 = vor.u32 %v3499_v22, %v3240_v24 }
  0x94   : > { %1220 = vmatpush.bf16.msra.mxu3 %v3299_v63  ;;  %v3248_v28 = vld [vmem:[%s4022_s30 + $0x18] sm:$0xf0]  ;;  %v403_v30 = vld [vmem:[#allocation2] sm:$0xff]  ;;  %v404_v31 = vld [vmem:[#allocation2 + $0x8] sm:$0xff]  ;;  %v3247_v33 = vor.u32 %v3502_v26, %v3246_v25  ;;  %s531_s29 = sshra.s32 %s3869_s21, 1  ;;  %s534_s18 = sand.u32 1, %s3869_s21 }
  0x95   : > { %v3251_v34 = vor.u32 %v3500_v27, %v3248_v28  ;;  %v3555_v35 = vld [vmem:[%s4032_s12 + $0xb8] sm:$0xff]  ;;  %v467_v36 = vpack.c.bf16 %v404_v31, %v403_v30  ;;  %v405_v40 = vld [vmem:[#allocation2 + $0x10] sm:$0xff]  ;;  %v406_v41 = vld [vmem:[#allocation2 + $0x18] sm:$0xff]  ;;  %s3531_s7 = sshll.u32 %s531_s29, 3  ;;  %p3492_p2 = scmp.ne.s32.totalorder %s3869_s21, 1 }
  0x96   : > { %714 = vmatpush.bf16.msra.mxu0 %v3271_v5  ;;  %v3563_v37 = vld [vmem:[%s4032_s12 + $0xf8] sm:$0xff]  ;;  %v468_v42 = vpack.c.bf16 %v406_v41, %v405_v40  ;;  %v408_v44 = vld [vmem:[#allocation2 + $0x28] sm:$0xff]  ;;  %v3554_v46 = vld [vmem:[%s4032_s12 + $0xb0] sm:$0xff]  ;;  %s537_s27 = sadd.s32 %s3531_s7, %s534_s18 }
  0x97   : > { %883 = vmatpush.bf16.msra.mxu1 %v3275_v6  ;;  %1052 = vmatpush.bf16.msra.mxu2 %v3279_v7  ;;  %v3539_v38 = vld [vmem:[%s4032_s12 + $0x38] sm:$0xff]  ;;  %v3562_v47 = vld [vmem:[%s4032_s12 + $0xf0] sm:$0xff]  ;;  %v409_v50 = vld [vmem:[#allocation2 + $0x30] sm:$0xff]  ;;  %s538_s14 = scalar_lea.vmem [#allocation7], %s537_s27 }
  0x98   : > { %1221 = vmatpush.bf16.msra.mxu3 %v3283_v11  ;;  %v3547_v39 = vld [vmem:[%s4032_s12 + $0x78] sm:$0xff]  ;;  %v3538_v48 = vld [vmem:[%s4032_s12 + $0x30] sm:$0xff]  ;;  %v412_v54 = vld [vmem:[#allocation2 + $0x48] sm:$0xff] }
  0x99   : > { %v407_v43 = vld [vmem:[#allocation2 + $0x20] sm:$0xff]  ;;  %v3546_v49 = vld [vmem:[%s4032_s12 + $0x70] sm:$0xff]  ;;  %v413_v56 = vld [vmem:[#allocation2 + $0x50] sm:$0xff] }
  0x9a   : > { %715 = vmatpush.bf16.msra.mxu0 %v3255_v17  ;;  %v469_v45 = vpack.c.bf16 %v408_v44, %v407_v43  ;;  %v410_v51 = vld [vmem:[#allocation2 + $0x38] sm:$0xff]  ;;  %v411_v53 = vld [vmem:[#allocation2 + $0x40] sm:$0xff]  ;;  %v416_v60 = vld [vmem:[#allocation2 + $0x68] sm:$0xff] }
  0x9b   : > { %884 = vmatpush.bf16.msra.mxu1 %v3259_v18  ;;  %1053 = vmatpush.bf16.msra.mxu2 %v3263_v19  ;;  %v470_v52 = vpack.c.bf16 %v410_v51, %v409_v50  ;;  %v471_v55 = vpack.c.bf16 %v412_v54, %v411_v53  ;;  %v414_v57 = vld [vmem:[#allocation2 + $0x58] sm:$0xff]  ;;  %v415_v59 = vld [vmem:[#allocation2 + $0x60] sm:$0xff]  ;;  %v3553_v62 = vld [vmem:[%s4032_s12 + $0xa8] sm:$0xff] }
  0x9c   : > { %1222 = vmatpush.bf16.msra.mxu3 %v3267_v23  ;;  %v472_v58 = vpack.c.bf16 %v414_v57, %v413_v56  ;;  %v473_v61 = vpack.c.bf16 %v416_v60, %v415_v59  ;;  %v3561_v63 = vld [vmem:[%s4032_s12 + $0xe8] sm:$0xff]  ;;  %v418_v3 = vld [vmem:[#allocation2 + $0x78] sm:$0xff]  ;;  %v419_v5 = vld [vmem:[#allocation2 + $0x80] sm:$0xff] }
  0x9d   : > { %v3537_v0 = vld [vmem:[%s4032_s12 + $0x28] sm:$0xff]  ;;  %v420_v6 = vld [vmem:[#allocation2 + $0x88] sm:$0xff]  ;;  %v539_v8 = vld [vmem:[%s538_s14] ss:$2 sm:$0xf] }
  0x9e   : > { %716 = vmatpush.bf16.msra.mxu0 %v3239_v29  ;;  %v3545_v1 = vld [vmem:[%s4032_s12 + $0x68] sm:$0xff]  ;;  %v475_v7 = vpack.c.bf16 %v420_v6, %v419_v5  ;;  %v4181_v11 = vperm.slane %v539_v8, 0  ;;  %v4183_v12 = vperm.slane %v539_v8, 1  ;;  %v4188_v20 = vperm.slane %v539_v8, 2  ;;  %v422_v28 = vld [vmem:[#allocation2 + $0x98] sm:$0xff]  ;;  %v424_v59 = vld [vmem:[#allocation2 + $0xa8] sm:$0xff] }
  0x9f   : > { %885 = vmatpush.bf16.msra.mxu1 %v3243_v32  ;;  %1054 = vmatpush.bf16.msra.mxu2 %v3247_v33  ;;  %v417_v2 = vld [vmem:[#allocation2 + $0x70] sm:$0xff]  ;;  %v4191_v23 = vperm.slane %v539_v8, 3 }
  0xa0   : > { %1223 = vmatpush.bf16.msra.mxu3 %v3251_v34  ;;  %v474_v4 = vpack.c.bf16 %v418_v3, %v417_v2  ;;  %v421_v27 = vld [vmem:[#allocation2 + $0x90] sm:$0xff] }
  0xa1   : > { %717 = vmatmul.bf16.vlgmr.msra.gmra.mxu0 %v467_v36  ;;  %v476_v34 = vpack.c.bf16 %v422_v28, %v421_v27 }
  0xa2   : > { %886 = vmatmul.bf16.vlgmr.msra.gmra.mxu1 %v467_v36  ;;  %1055 = vmatmul.bf16.vlgmr.msra.gmra.mxu2 %v467_v36 }
  0xa3   : > { %2427 = vmatpush.bf16.msrb.mxu2 %v3555_v35  ;;  %1224 = vmatmul.bf16.vlgmr.msra.gmra.mxu3 %v467_v36 }
  0xa4   : > { %2596 = vmatpush.bf16.msrb.mxu3 %v3563_v37  ;;  %2089 = vmatpush.bf16.msrb.mxu0 %v3539_v38 }
  0xa5   : > { %2258 = vmatpush.bf16.msrb.mxu1 %v3547_v39 }
  0xa7   : > { %2428 = vmatpush.bf16.msrb.mxu2 %v3554_v46 }
  0xa8   : > { %2597 = vmatpush.bf16.msrb.mxu3 %v3562_v47  ;;  %2090 = vmatpush.bf16.msrb.mxu0 %v3538_v48 }
  0xa9   : > { %2259 = vmatpush.bf16.msrb.mxu1 %v3546_v49 }
  0xab   : > { %2429 = vmatpush.bf16.msrb.mxu2 %v3553_v62 }
  0xac   : > { %2598 = vmatpush.bf16.msrb.mxu3 %v3561_v63  ;;  %2091 = vmatpush.bf16.msrb.mxu0 %v3537_v0 }
  0xad   : > { %2260 = vmatpush.bf16.msrb.mxu1 %v3545_v1 }
  0xb1   : > { %722 = vmatmul.bf16.gmra.mxu0 %v468_v42 }
  0xb2   : > { %891 = vmatmul.bf16.gmra.mxu1 %v468_v42  ;;  %1060 = vmatmul.bf16.gmra.mxu2 %v468_v42 }
  0xb3   : > { %1229 = vmatmul.bf16.gmra.mxu3 %v468_v42 }
  0xc1   : > { %727 = vmatmul.bf16.gmra.mxu0 %v469_v45 }
  0xc2   : > { %896 = vmatmul.bf16.gmra.mxu1 %v469_v45  ;;  %1065 = vmatmul.bf16.gmra.mxu2 %v469_v45 }
  0xc3   : > { %1234 = vmatmul.bf16.gmra.mxu3 %v469_v45 }
  0xd1   : > { %732 = vmatmul.bf16.gmra.mxu0 %v470_v52 }
  0xd2   : > { %901 = vmatmul.bf16.gmra.mxu1 %v470_v52  ;;  %1070 = vmatmul.bf16.gmra.mxu2 %v470_v52 }
  0xd3   : > { %1239 = vmatmul.bf16.gmra.mxu3 %v470_v52 }
  0xe1   : > { %737 = vmatmul.bf16.gmra.mxu0 %v471_v55 }
  0xe2   : > { %906 = vmatmul.bf16.gmra.mxu1 %v471_v55  ;;  %1075 = vmatmul.bf16.gmra.mxu2 %v471_v55 }
  0xe3   : > { %1244 = vmatmul.bf16.gmra.mxu3 %v471_v55 }
  0xf1   : > { %742 = vmatmul.bf16.gmra.mxu0 %v472_v58 }
  0xf2   : > { %911 = vmatmul.bf16.gmra.mxu1 %v472_v58  ;;  %1080 = vmatmul.bf16.gmra.mxu2 %v472_v58 }
  0xf3   : > { %1249 = vmatmul.bf16.gmra.mxu3 %v472_v58  ;;  %v423_v58 = vld [vmem:[#allocation2 + $0xa0] sm:$0xff] }
  0xf4   : > { %v477_v1 = vpack.c.bf16 %v424_v59, %v423_v58 }
 0x101   : > { %747 = vmatmul.bf16.gmra.mxu0 %v473_v61 }
 0x102   : > { %916 = vmatmul.bf16.gmra.mxu1 %v473_v61  ;;  %1085 = vmatmul.bf16.gmra.mxu2 %v473_v61 }
 0x103   : > { %1254 = vmatmul.bf16.gmra.mxu3 %v473_v61 }
 0x111   : > { %752 = vmatmul.bf16.gmra.mxu0 %v474_v4 }
 0x112   : > { %921 = vmatmul.bf16.gmra.mxu1 %v474_v4  ;;  %1090 = vmatmul.bf16.gmra.mxu2 %v474_v4 }
 0x113   : > { %1259 = vmatmul.bf16.gmra.mxu3 %v474_v4 }
 0x11e   : > { %v718_v9 = vpop.f32.mrf.mxu0 }
 0x11f   : > { %v887_v10 = vpop.f32.mrf.mxu1  ;;  %v719_v13 = vadd.f32 %v718_v9, %v4181_v11 }
 0x120   : > { %v888_v15 = vadd.f32 %v887_v10, %v4183_v12 }
 0x121   : > { %757 = vmatmul.bf16.gmra.mxu0 %v475_v7  ;;  %v1385_v22 = vmax.f32 %v719_v13, 0.0 }
 0x122   : > { %926 = vmatmul.bf16.gmra.mxu1 %v475_v7  ;;  %1095 = vmatmul.bf16.gmra.mxu2 %v475_v7  ;;  %v1386_v25 = vmax.f32 %v888_v15, 0.0  ;;  %v3560_v15 = vld [vmem:[%s4032_s12 + $0xe0] sm:$0xff] }
 0x123   : > { %1264 = vmatmul.bf16.gmra.mxu3 %v475_v7 }
 0x124   : > { %2599 = vmatpush.bf16.msrb.mxu3 %v3560_v15 }
 0x125   : > { %v1056_v14 = vpop.f32.mrf.mxu2 }
 0x126   : > { %v1225_v16 = vpop.f32.mrf.mxu3  ;;  %v720_v17 = vpop.f32.mrf.mxu0  ;;  %v1057_v30 = vadd.f32 %v1056_v14, %v4188_v20  ;;  %v3552_v14 = vld [vmem:[%s4032_s12 + $0xa0] sm:$0xff] }
 0x127   : > { %v721_v18 = vadd.f32 %v720_v17, %v4181_v11  ;;  %v889_v19 = vpop.f32.mrf.mxu1  ;;  %v1226_v32 = vadd.f32 %v1225_v16, %v4191_v23  ;;  %2430 = vmatpush.bf16.msrb.mxu2 %v3552_v14 }
 0x128   : > { %v890_v21 = vadd.f32 %v889_v19, %v4183_v12  ;;  %v1387_v40 = vmax.f32 %v1057_v30, 0.0  ;;  %v3536_v30 = vld [vmem:[%s4032_s12 + $0x20] sm:$0xff] }
 0x129   : > { %v1389_v24 = vmax.f32 %v721_v18, 0.0  ;;  %v1388_v42 = vmax.f32 %v1226_v32, 0.0  ;;  %v3544_v32 = vld [vmem:[%s4032_s12 + $0x60] sm:$0xff]  ;;  %2092 = vmatpush.bf16.msrb.mxu0 %v3536_v30 }
 0x12a   : > { %v1390_v26 = vmax.f32 %v890_v21, 0.0  ;;  %2261 = vmatpush.bf16.msrb.mxu1 %v3544_v32 }
 0x12b   : > { %v4193_v29 = vpack.c.bf16 %v1389_v24, %v1385_v22 }
 0x12c   : > { %v4196_v31 = vpack.c.bf16 %v1390_v26, %v1386_v25 }
 0x12d   : > { %v1058_v33 = vpop.f32.mrf.mxu2 }
 0x12e   : > { %v1059_v35 = vadd.f32 %v1058_v33, %v4188_v20  ;;  %v1227_v36 = vpop.f32.mrf.mxu3  ;;  %v723_v37 = vpop.f32.mrf.mxu0 }
 0x12f   : > { %v1228_v38 = vadd.f32 %v1227_v36, %v4191_v23  ;;  %v892_v39 = vpop.f32.mrf.mxu1  ;;  %v724_v46 = vadd.f32 %v723_v37, %v4181_v11  ;;  %v426_v36 = vld [vmem:[#allocation2 + $0xb8] sm:$0xff] }
 0x130   : > { %v1391_v41 = vmax.f32 %v1059_v35, 0.0  ;;  %v893_v48 = vadd.f32 %v892_v39, %v4183_v12  ;;  %v425_v35 = vld [vmem:[#allocation2 + $0xb0] sm:$0xff] }
 0x131   : > { %v1392_v43 = vmax.f32 %v1228_v38, 0.0  ;;  %762 = vmatmul.bf16.gmra.mxu0 %v476_v34  ;;  %v1393_v54 = vmax.f32 %v724_v46, 0.0 }
 0x132   : > { %v4201_v44 = vpack.c.bf16 %v1391_v41, %v1387_v40  ;;  %931 = vmatmul.bf16.gmra.mxu1 %v476_v34  ;;  %1100 = vmatmul.bf16.gmra.mxu2 %v476_v34  ;;  %v1394_v56 = vmax.f32 %v893_v48, 0.0 }
 0x133   : > { %v4203_v45 = vpack.c.bf16 %v1392_v43, %v1388_v42  ;;  %1269 = vmatmul.bf16.gmra.mxu3 %v476_v34  ;;  %v478_v42 = vpack.c.bf16 %v426_v36, %v425_v35 }
 0x135   : > { %v1061_v47 = vpop.f32.mrf.mxu2 }
 0x136   : > { %v1230_v49 = vpop.f32.mrf.mxu3  ;;  %v725_v50 = vpop.f32.mrf.mxu0  ;;  %v1062_v61 = vadd.f32 %v1061_v47, %v4188_v20 }
 0x137   : > { %v726_v51 = vadd.f32 %v725_v50, %v4181_v11  ;;  %v894_v52 = vpop.f32.mrf.mxu1  ;;  %v1231_v63 = vadd.f32 %v1230_v49, %v4191_v23 }
 0x138   : > { %v895_v53 = vadd.f32 %v894_v52, %v4183_v12  ;;  %v1395_v7 = vmax.f32 %v1062_v61, 0.0 }
 0x139   : > { %v1397_v55 = vmax.f32 %v726_v51, 0.0  ;;  %v1396_v9 = vmax.f32 %v1231_v63, 0.0 }
 0x13a   : > { %v1398_v57 = vmax.f32 %v895_v53, 0.0 }
 0x13b   : > { %v4209_v60 = vpack.c.bf16 %v1397_v55, %v1393_v54 }
 0x13c   : > { %v4212_v62 = vpack.c.bf16 %v1398_v57, %v1394_v56 }
 0x13d   : > { %v1063_v0 = vpop.f32.mrf.mxu2 }
 0x13e   : > { %v1064_v2 = vadd.f32 %v1063_v0, %v4188_v20  ;;  %v1232_v3 = vpop.f32.mrf.mxu3  ;;  %v728_v4 = vpop.f32.mrf.mxu0 }
 0x13f   : > { %v1233_v5 = vadd.f32 %v1232_v3, %v4191_v23  ;;  %v897_v6 = vpop.f32.mrf.mxu1  ;;  %v729_v17 = vadd.f32 %v728_v4, %v4181_v11 }
 0x140   : > { %v1399_v8 = vmax.f32 %v1064_v2, 0.0  ;;  %v898_v19 = vadd.f32 %v897_v6, %v4183_v12  ;;  %v427_v6 = vld [vmem:[#allocation2 + $0xc0] sm:$0xff] }
 0x141   : > { %v1400_v10 = vmax.f32 %v1233_v5, 0.0  ;;  %767 = vmatmul.bf16.gmra.mxu0 %v477_v1  ;;  %v1401_v27 = vmax.f32 %v729_v17, 0.0 }
 0x142   : > { %936 = vmatmul.bf16.gmra.mxu1 %v477_v1  ;;  %1105 = vmatmul.bf16.gmra.mxu2 %v477_v1  ;;  %v4217_v13 = vpack.c.bf16 %v1399_v8, %v1395_v7  ;;  %v1402_v33 = vmax.f32 %v898_v19, 0.0  ;;  %v428_v7 = vld [vmem:[#allocation2 + $0xc8] sm:$0xff] }
 0x143   : > { %1274 = vmatmul.bf16.gmra.mxu3 %v477_v1  ;;  %v4221_v16 = vpack.c.bf16 %v1400_v10, %v1396_v9  ;;  %v479_v17 = vpack.c.bf16 %v428_v7, %v427_v6 }
 0x145   : > { %v1066_v18 = vpop.f32.mrf.mxu2 }
 0x146   : > { %v1235_v21 = vpop.f32.mrf.mxu3  ;;  %v730_v22 = vpop.f32.mrf.mxu0  ;;  %v1067_v38 = vadd.f32 %v1066_v18, %v4188_v20 }
 0x147   : > { %v731_v24 = vadd.f32 %v730_v22, %v4181_v11  ;;  %v899_v25 = vpop.f32.mrf.mxu1  ;;  %v1236_v40 = vadd.f32 %v1235_v21, %v4191_v23 }
 0x148   : > { %v900_v26 = vadd.f32 %v899_v25, %v4183_v12  ;;  %v1403_v50 = vmax.f32 %v1067_v38, 0.0 }
 0x149   : > { %v1405_v28 = vmax.f32 %v731_v24, 0.0  ;;  %v1404_v52 = vmax.f32 %v1236_v40, 0.0 }
 0x14a   : > { %v1406_v34 = vmax.f32 %v900_v26, 0.0 }
 0x14b   : > { %v4229_v37 = vpack.c.bf16 %v1405_v28, %v1401_v27 }
 0x14c   : > { %v4232_v39 = vpack.c.bf16 %v1406_v34, %v1402_v33 }
 0x14d   : > { %v1068_v41 = vpop.f32.mrf.mxu2 }
 0x14e   : > { %v1069_v43 = vadd.f32 %v1068_v41, %v4188_v20  ;;  %v1237_v46 = vpop.f32.mrf.mxu3  ;;  %v733_v47 = vpop.f32.mrf.mxu0 }
 0x14f   : > { %v1238_v48 = vadd.f32 %v1237_v46, %v4191_v23  ;;  %v902_v49 = vpop.f32.mrf.mxu1  ;;  %v734_v56 = vadd.f32 %v733_v47, %v4181_v11 }
 0x150   : > { %v1407_v51 = vmax.f32 %v1069_v43, 0.0  ;;  %v903_v58 = vadd.f32 %v902_v49, %v4183_v12  ;;  %v429_v49 = vld [vmem:[#allocation2 + $0xd0] sm:$0xff] }
 0x151   : > { %v1408_v53 = vmax.f32 %v1238_v48, 0.0  ;;  %772 = vmatmul.bf16.gmra.mxu0 %v478_v42  ;;  %v1409_v2 = vmax.f32 %v734_v56, 0.0 }
 0x152   : > { %941 = vmatmul.bf16.gmra.mxu1 %v478_v42  ;;  %1110 = vmatmul.bf16.gmra.mxu2 %v478_v42  ;;  %v4237_v54 = vpack.c.bf16 %v1407_v51, %v1403_v50  ;;  %v1410_v4 = vmax.f32 %v903_v58, 0.0  ;;  %v430_v50 = vld [vmem:[#allocation2 + $0xd8] sm:$0xff] }
 0x153   : > { %1279 = vmatmul.bf16.gmra.mxu3 %v478_v42  ;;  %v4239_v55 = vpack.c.bf16 %v1408_v53, %v1404_v52  ;;  %v480_v58 = vpack.c.bf16 %v430_v50, %v429_v49 }
 0x155   : > { %v1071_v57 = vpop.f32.mrf.mxu2 }
 0x156   : > { %v1240_v59 = vpop.f32.mrf.mxu3  ;;  %v735_v61 = vpop.f32.mrf.mxu0  ;;  %v1072_v9 = vadd.f32 %v1071_v57, %v4188_v20 }
 0x157   : > { %v736_v63 = vadd.f32 %v735_v61, %v4181_v11  ;;  %v904_v0 = vpop.f32.mrf.mxu1  ;;  %v1241_v14 = vadd.f32 %v1240_v59, %v4191_v23 }
 0x158   : > { %v905_v1 = vadd.f32 %v904_v0, %v4183_v12  ;;  %v1411_v25 = vmax.f32 %v1072_v9, 0.0 }
 0x159   : > { %v1413_v3 = vmax.f32 %v736_v63, 0.0  ;;  %v1412_v27 = vmax.f32 %v1241_v14, 0.0 }
 0x15a   : > { %v1414_v5 = vmax.f32 %v905_v1, 0.0 }
 0x15b   : > { %v4245_v8 = vpack.c.bf16 %v1413_v3, %v1409_v2 }
 0x15c   : > { %v4248_v10 = vpack.c.bf16 %v1414_v5, %v1410_v4 }
 0x15d   : > { %v1073_v15 = vpop.f32.mrf.mxu2 }
 0x15e   : > { %v1074_v18 = vadd.f32 %v1073_v15, %v4188_v20  ;;  %v1242_v19 = vpop.f32.mrf.mxu3  ;;  %v738_v21 = vpop.f32.mrf.mxu0 }
 0x15f   : > { %v1243_v22 = vadd.f32 %v1242_v19, %v4191_v23  ;;  %v907_v24 = vpop.f32.mrf.mxu1  ;;  %v739_v33 = vadd.f32 %v738_v21, %v4181_v11 }
 0x160   : > { %v1415_v26 = vmax.f32 %v1074_v18, 0.0  ;;  %v908_v35 = vadd.f32 %v907_v24, %v4183_v12 }
 0x161   : > { %v1416_v28 = vmax.f32 %v1243_v22, 0.0  ;;  %777 = vmatmul.bf16.gmra.mxu0 %v479_v17  ;;  %v1417_v43 = vmax.f32 %v739_v33, 0.0  ;;  %v432_v33 = vld [vmem:[#allocation2 + $0xe8] sm:$0xff] }
 0x162   : > { %946 = vmatmul.bf16.gmra.mxu1 %v479_v17  ;;  %1115 = vmatmul.bf16.gmra.mxu2 %v479_v17  ;;  %v4253_v30 = vpack.c.bf16 %v1415_v26, %v1411_v25  ;;  %v1418_v47 = vmax.f32 %v908_v35, 0.0 }
 0x163   : > { %1284 = vmatmul.bf16.gmra.mxu3 %v479_v17  ;;  %v4255_v32 = vpack.c.bf16 %v1416_v28, %v1412_v27  ;;  %v431_v28 = vld [vmem:[#allocation2 + $0xe0] sm:$0xff] }
 0x165   : > { %v1076_v34 = vpop.f32.mrf.mxu2 }
 0x166   : > { %v1245_v36 = vpop.f32.mrf.mxu3  ;;  %v740_v38 = vpop.f32.mrf.mxu0  ;;  %v1077_v52 = vadd.f32 %v1076_v34, %v4188_v20 }
 0x167   : > { %v741_v40 = vadd.f32 %v740_v38, %v4181_v11  ;;  %v909_v41 = vpop.f32.mrf.mxu1  ;;  %v1246_v56 = vadd.f32 %v1245_v36, %v4191_v23 }
 0x168   : > { %v910_v42 = vadd.f32 %v909_v41, %v4183_v12  ;;  %v1419_v2 = vmax.f32 %v1077_v52, 0.0  ;;  %v481_v41 = vpack.c.bf16 %v432_v33, %v431_v28 }
 0x169   : > { %v1421_v46 = vmax.f32 %v741_v40, 0.0  ;;  %v1420_v4 = vmax.f32 %v1246_v56, 0.0 }
 0x16a   : > { %v1422_v48 = vmax.f32 %v910_v42, 0.0 }
 0x16b   : > { %v4261_v51 = vpack.c.bf16 %v1421_v46, %v1417_v43 }
 0x16c   : > { %v4264_v53 = vpack.c.bf16 %v1422_v48, %v1418_v47 }
 0x16d   : > { %v1078_v57 = vpop.f32.mrf.mxu2 }
 0x16e   : > { %v1079_v59 = vadd.f32 %v1078_v57, %v4188_v20  ;;  %v1247_v61 = vpop.f32.mrf.mxu3  ;;  %v743_v63 = vpop.f32.mrf.mxu0 }
 0x16f   : > { %v1248_v0 = vadd.f32 %v1247_v61, %v4191_v23  ;;  %v912_v1 = vpop.f32.mrf.mxu1  ;;  %v744_v9 = vadd.f32 %v743_v63, %v4181_v11 }
 0x170   : > { %v1423_v3 = vmax.f32 %v1079_v59, 0.0  ;;  %v913_v15 = vadd.f32 %v912_v1, %v4183_v12  ;;  %v3559_v59 = vld [vmem:[%s4032_s12 + $0xd8] sm:$0xff] }
 0x171   : > { %v1424_v5 = vmax.f32 %v1248_v0, 0.0  ;;  %782 = vmatmul.bf16.gmra.mxu0 %v480_v58  ;;  %v1425_v24 = vmax.f32 %v744_v9, 0.0  ;;  %2600 = vmatpush.bf16.msrb.mxu3 %v3559_v59 }
 0x172   : > { %951 = vmatmul.bf16.gmra.mxu1 %v480_v58  ;;  %1120 = vmatmul.bf16.gmra.mxu2 %v480_v58  ;;  %v4269_v6 = vpack.c.bf16 %v1423_v3, %v1419_v2  ;;  %v1426_v26 = vmax.f32 %v913_v15, 0.0 }
 0x173   : > { %1289 = vmatmul.bf16.gmra.mxu3 %v480_v58  ;;  %v4271_v7 = vpack.c.bf16 %v1424_v5, %v1420_v4  ;;  %v3551_v58 = vld [vmem:[%s4032_s12 + $0x98] sm:$0xff] }
 0x174   : > { %2431 = vmatpush.bf16.msrb.mxu2 %v3551_v58 }
 0x175   : > { %v1081_v14 = vpop.f32.mrf.mxu2 }
 0x176   : > { %v1250_v17 = vpop.f32.mrf.mxu3  ;;  %v745_v18 = vpop.f32.mrf.mxu0  ;;  %v1082_v35 = vadd.f32 %v1081_v14, %v4188_v20 }
 0x177   : > { %v746_v19 = vadd.f32 %v745_v18, %v4181_v11  ;;  %v914_v21 = vpop.f32.mrf.mxu1  ;;  %v1251_v38 = vadd.f32 %v1250_v17, %v4191_v23  ;;  %v3535_v17 = vld [vmem:[%s4032_s12 + $0x18] sm:$0xff] }
 0x178   : > { %v915_v22 = vadd.f32 %v914_v21, %v4183_v12  ;;  %v1427_v49 = vmax.f32 %v1082_v35, 0.0  ;;  %v3543_v18 = vld [vmem:[%s4032_s12 + $0x58] sm:$0xff]  ;;  %2093 = vmatpush.bf16.msrb.mxu0 %v3535_v17  ;;  %v436_v17 = vld [vmem:[#allocation2 + $0x108] sm:$0xff] }
 0x179   : > { %v1429_v25 = vmax.f32 %v746_v19, 0.0  ;;  %v1428_v52 = vmax.f32 %v1251_v38, 0.0  ;;  %2262 = vmatpush.bf16.msrb.mxu1 %v3543_v18 }
 0x17a   : > { %v1430_v27 = vmax.f32 %v915_v22, 0.0  ;;  %v433_v22 = vld [vmem:[#allocation2 + $0xf0] sm:$0xff] }
 0x17b   : > { %v4277_v34 = vpack.c.bf16 %v1429_v25, %v1425_v24  ;;  %v434_v24 = vld [vmem:[#allocation2 + $0xf8] sm:$0xff] }
 0x17c   : > { %v4280_v36 = vpack.c.bf16 %v1430_v27, %v1426_v26  ;;  %v482_v35 = vpack.c.bf16 %v434_v24, %v433_v22 }
 0x17d   : > { %v1083_v40 = vpop.f32.mrf.mxu2 }
 0x17e   : > { %v1084_v42 = vadd.f32 %v1083_v40, %v4188_v20  ;;  %v1252_v43 = vpop.f32.mrf.mxu3  ;;  %v748_v46 = vpop.f32.mrf.mxu0 }
 0x17f   : > { %v1253_v47 = vadd.f32 %v1252_v43, %v4191_v23  ;;  %v917_v48 = vpop.f32.mrf.mxu1  ;;  %v749_v63 = vadd.f32 %v748_v46, %v4181_v11 }
 0x180   : > { %v1431_v50 = vmax.f32 %v1084_v42, 0.0  ;;  %v918_v1 = vadd.f32 %v917_v48, %v4183_v12 }
 0x181   : > { %v1432_v56 = vmax.f32 %v1253_v47, 0.0  ;;  %787 = vmatmul.bf16.gmra.mxu0 %v481_v41  ;;  %v1433_v14 = vmax.f32 %v749_v63, 0.0 }
 0x182   : > { %956 = vmatmul.bf16.gmra.mxu1 %v481_v41  ;;  %1125 = vmatmul.bf16.gmra.mxu2 %v481_v41  ;;  %v4285_v57 = vpack.c.bf16 %v1431_v50, %v1427_v49  ;;  %v1434_v19 = vmax.f32 %v918_v1, 0.0 }
 0x183   : > { %1294 = vmatmul.bf16.gmra.mxu3 %v481_v41  ;;  %v4289_v61 = vpack.c.bf16 %v1432_v56, %v1428_v52 }
 0x185   : > { %v1086_v0 = vpop.f32.mrf.mxu2 }
 0x186   : > { %v1255_v2 = vpop.f32.mrf.mxu3  ;;  %v750_v3 = vpop.f32.mrf.mxu0  ;;  %v1087_v26 = vadd.f32 %v1086_v0, %v4188_v20 }
 0x187   : > { %v751_v4 = vadd.f32 %v750_v3, %v4181_v11  ;;  %v919_v5 = vpop.f32.mrf.mxu1  ;;  %v1256_v28 = vadd.f32 %v1255_v2, %v4191_v23 }
 0x188   : > { %v920_v9 = vadd.f32 %v919_v5, %v4183_v12  ;;  %v1435_v46 = vmax.f32 %v1087_v26, 0.0 }
 0x189   : > { %v1437_v15 = vmax.f32 %v751_v4, 0.0  ;;  %v1436_v48 = vmax.f32 %v1256_v28, 0.0 }
 0x18a   : > { %v1438_v21 = vmax.f32 %v920_v9, 0.0 }
 0x18b   : > { %v4297_v25 = vpack.c.bf16 %v1437_v15, %v1433_v14  ;;  %v435_v15 = vld [vmem:[#allocation2 + $0x100] sm:$0xff] }
 0x18c   : > { %v4300_v27 = vpack.c.bf16 %v1438_v21, %v1434_v19  ;;  %v483_v26 = vpack.c.bf16 %v436_v17, %v435_v15  ;;  %v438_v15 = vld [vmem:[#allocation2 + $0x118] sm:$0xff] }
 0x18d   : > { %v1088_v33 = vpop.f32.mrf.mxu2 }
 0x18e   : > { %v1089_v38 = vadd.f32 %v1088_v33, %v4188_v20  ;;  %v1257_v40 = vpop.f32.mrf.mxu3  ;;  %v753_v41 = vpop.f32.mrf.mxu0 }
 0x18f   : > { %v1258_v42 = vadd.f32 %v1257_v40, %v4191_v23  ;;  %v922_v43 = vpop.f32.mrf.mxu1  ;;  %v754_v56 = vadd.f32 %v753_v41, %v4181_v11 }
 0x190   : > { %v1439_v47 = vmax.f32 %v1089_v38, 0.0  ;;  %v923_v59 = vadd.f32 %v922_v43, %v4183_v12 }
 0x191   : > { %v1440_v49 = vmax.f32 %v1258_v42, 0.0  ;;  %792 = vmatmul.bf16.gmra.mxu0 %v482_v35  ;;  %v1441_v4 = vmax.f32 %v754_v56, 0.0 }
 0x192   : > { %961 = vmatmul.bf16.gmra.mxu1 %v482_v35  ;;  %1130 = vmatmul.bf16.gmra.mxu2 %v482_v35  ;;  %v4305_v50 = vpack.c.bf16 %v1439_v47, %v1435_v46  ;;  %v1442_v9 = vmax.f32 %v923_v59, 0.0 }
 0x193   : > { %1299 = vmatmul.bf16.gmra.mxu3 %v482_v35  ;;  %v4307_v52 = vpack.c.bf16 %v1440_v49, %v1436_v48 }
 0x195   : > { %v1091_v58 = vpop.f32.mrf.mxu2 }
 0x196   : > { %v1260_v63 = vpop.f32.mrf.mxu3  ;;  %v755_v0 = vpop.f32.mrf.mxu0  ;;  %v1092_v19 = vadd.f32 %v1091_v58, %v4188_v20 }
 0x197   : > { %v756_v1 = vadd.f32 %v755_v0, %v4181_v11  ;;  %v924_v2 = vpop.f32.mrf.mxu1  ;;  %v1261_v22 = vadd.f32 %v1260_v63, %v4191_v23 }
 0x198   : > { %v925_v3 = vadd.f32 %v924_v2, %v4183_v12  ;;  %v1443_v41 = vmax.f32 %v1092_v19, 0.0 }
 0x199   : > { %v1445_v5 = vmax.f32 %v756_v1, 0.0  ;;  %v1444_v43 = vmax.f32 %v1261_v22, 0.0 }
 0x19a   : > { %v1446_v14 = vmax.f32 %v925_v3, 0.0 }
 0x19b   : > { %v4313_v18 = vpack.c.bf16 %v1445_v5, %v1441_v4 }
 0x19c   : > { %v4316_v21 = vpack.c.bf16 %v1446_v14, %v1442_v9  ;;  %v437_v14 = vld [vmem:[#allocation2 + $0x110] sm:$0xff] }
 0x19d   : > { %v1093_v24 = vpop.f32.mrf.mxu2 }
 0x19e   : > { %v1094_v28 = vadd.f32 %v1093_v24, %v4188_v20  ;;  %v1262_v33 = vpop.f32.mrf.mxu3  ;;  %v758_v35 = vpop.f32.mrf.mxu0 }
 0x19f   : > { %v1263_v38 = vadd.f32 %v1262_v33, %v4191_v23  ;;  %v927_v40 = vpop.f32.mrf.mxu1  ;;  %v759_v49 = vadd.f32 %v758_v35, %v4181_v11 }
 0x1a0   : > { %v1447_v42 = vmax.f32 %v1094_v28, 0.0  ;;  %v928_v58 = vadd.f32 %v927_v40, %v4183_v12  ;;  %v484_v28 = vpack.c.bf16 %v438_v15, %v437_v14 }
 0x1a1   : > { %v1448_v46 = vmax.f32 %v1263_v38, 0.0  ;;  %797 = vmatmul.bf16.gmra.mxu0 %v483_v26  ;;  %v1449_v3 = vmax.f32 %v759_v49, 0.0 }
 0x1a2   : > { %966 = vmatmul.bf16.gmra.mxu1 %v483_v26  ;;  %1135 = vmatmul.bf16.gmra.mxu2 %v483_v26  ;;  %v4321_v47 = vpack.c.bf16 %v1447_v42, %v1443_v41  ;;  %v1450_v5 = vmax.f32 %v928_v58, 0.0 }
 0x1a3   : > { %1304 = vmatmul.bf16.gmra.mxu3 %v483_v26  ;;  %v4323_v48 = vpack.c.bf16 %v1448_v46, %v1444_v43 }
 0x1a5   : > { %v1096_v56 = vpop.f32.mrf.mxu2 }
 0x1a6   : > { %v1265_v59 = vpop.f32.mrf.mxu3  ;;  %v760_v63 = vpop.f32.mrf.mxu0  ;;  %v1097_v19 = vadd.f32 %v1096_v56, %v4188_v20 }
 0x1a7   : > { %v761_v0 = vadd.f32 %v760_v63, %v4181_v11  ;;  %v929_v1 = vpop.f32.mrf.mxu1  ;;  %v1266_v24 = vadd.f32 %v1265_v59, %v4191_v23 }
 0x1a8   : > { %v930_v2 = vadd.f32 %v929_v1, %v4183_v12  ;;  %v1451_v42 = vmax.f32 %v1097_v19, 0.0 }
 0x1a9   : > { %v1453_v4 = vmax.f32 %v761_v0, 0.0  ;;  %v1452_v46 = vmax.f32 %v1266_v24, 0.0  ;;  %v439_v24 = vld [vmem:[#allocation2 + $0x120] sm:$0xff] }
 0x1aa   : > { %v1454_v9 = vmax.f32 %v930_v2, 0.0 }
 0x1ab   : > { %v4329_v17 = vpack.c.bf16 %v1453_v4, %v1449_v3 }
 0x1ac   : > { %v4332_v22 = vpack.c.bf16 %v1454_v9, %v1450_v5 }
 0x1ad   : > { %v1098_v26 = vpop.f32.mrf.mxu2 }
 0x1ae   : > { %v1099_v33 = vadd.f32 %v1098_v26, %v4188_v20  ;;  %v1267_v35 = vpop.f32.mrf.mxu3  ;;  %v763_v38 = vpop.f32.mrf.mxu0  ;;  %v440_v26 = vld [vmem:[#allocation2 + $0x128] sm:$0xff] }
 0x1af   : > { %v1268_v40 = vadd.f32 %v1267_v35, %v4191_v23  ;;  %v932_v41 = vpop.f32.mrf.mxu1  ;;  %v764_v59 = vadd.f32 %v763_v38, %v4181_v11 }
 0x1b0   : > { %v1455_v43 = vmax.f32 %v1099_v33, 0.0  ;;  %v933_v0 = vadd.f32 %v932_v41, %v4183_v12  ;;  %v485_v41 = vpack.c.bf16 %v440_v26, %v439_v24 }
 0x1b1   : > { %v1456_v49 = vmax.f32 %v1268_v40, 0.0  ;;  %802 = vmatmul.bf16.gmra.mxu0 %v484_v28  ;;  %v1457_v9 = vmax.f32 %v764_v59, 0.0 }
 0x1b2   : > { %971 = vmatmul.bf16.gmra.mxu1 %v484_v28  ;;  %1140 = vmatmul.bf16.gmra.mxu2 %v484_v28  ;;  %v4337_v56 = vpack.c.bf16 %v1455_v43, %v1451_v42  ;;  %v1458_v15 = vmax.f32 %v933_v0, 0.0 }
 0x1b3   : > { %1309 = vmatmul.bf16.gmra.mxu3 %v484_v28  ;;  %v4339_v58 = vpack.c.bf16 %v1456_v49, %v1452_v46 }
 0x1b5   : > { %v1101_v63 = vpop.f32.mrf.mxu2 }
 0x1b6   : > { %v1270_v1 = vpop.f32.mrf.mxu3  ;;  %v765_v2 = vpop.f32.mrf.mxu0  ;;  %v1102_v33 = vadd.f32 %v1101_v63, %v4188_v20 }
 0x1b7   : > { %v766_v3 = vadd.f32 %v765_v2, %v4181_v11  ;;  %v934_v4 = vpop.f32.mrf.mxu1  ;;  %v1271_v38 = vadd.f32 %v1270_v1, %v4191_v23  ;;  %v3550_v1 = vld [vmem:[%s4032_s12 + $0x90] sm:$0xff] }
 0x1b8   : > { %v935_v5 = vadd.f32 %v934_v4, %v4183_v12  ;;  %v1459_v0 = vmax.f32 %v1102_v33, 0.0  ;;  %2432 = vmatpush.bf16.msrb.mxu2 %v3550_v1 }
 0x1b9   : > { %v1461_v14 = vmax.f32 %v766_v3, 0.0  ;;  %v1460_v3 = vmax.f32 %v1271_v38, 0.0 }
 0x1ba   : > { %v1462_v19 = vmax.f32 %v935_v5, 0.0  ;;  %v3558_v5 = vld [vmem:[%s4032_s12 + $0xd0] sm:$0xff] }
 0x1bb   : > { %v4345_v28 = vpack.c.bf16 %v1461_v14, %v1457_v9  ;;  %2601 = vmatpush.bf16.msrb.mxu3 %v3558_v5 }
 0x1bc   : > { %v4348_v35 = vpack.c.bf16 %v1462_v19, %v1458_v15 }
 0x1bd   : > { %v1103_v40 = vpop.f32.mrf.mxu2 }
 0x1be   : > { %v1104_v42 = vadd.f32 %v1103_v40, %v4188_v20  ;;  %v1272_v43 = vpop.f32.mrf.mxu3  ;;  %v768_v46 = vpop.f32.mrf.mxu0 }
 0x1bf   : > { %v1273_v49 = vadd.f32 %v1272_v43, %v4191_v23  ;;  %v937_v59 = vpop.f32.mrf.mxu1  ;;  %v769_v14 = vadd.f32 %v768_v46, %v4181_v11  ;;  %v3534_v43 = vld [vmem:[%s4032_s12 + $0x10] sm:$0xff] }
 0x1c0   : > { %v1463_v2 = vmax.f32 %v1104_v42, 0.0  ;;  %v938_v19 = vadd.f32 %v937_v59, %v4183_v12  ;;  %v442_v46 = vld [vmem:[#allocation2 + $0x138] sm:$0xff]  ;;  %2094 = vmatpush.bf16.msrb.mxu0 %v3534_v43 }
 0x1c1   : > { %v1464_v4 = vmax.f32 %v1273_v49, 0.0  ;;  %807 = vmatmul.bf16.gmra.mxu0 %v485_v41  ;;  %v3542_v49 = vld [vmem:[%s4032_s12 + $0x50] sm:$0xff] }
 0x1c2   : > { %976 = vmatmul.bf16.gmra.mxu1 %v485_v41  ;;  %1145 = vmatmul.bf16.gmra.mxu2 %v485_v41  ;;  %v4353_v63 = vpack.c.bf16 %v1463_v2, %v1459_v0  ;;  %v1466_v0 = vmax.f32 %v938_v19, 0.0 }
 0x1c3   : > { %1314 = vmatmul.bf16.gmra.mxu3 %v485_v41  ;;  %v4357_v9 = vpack.c.bf16 %v1464_v4, %v1460_v3  ;;  %v1465_v41 = vmax.f32 %v769_v14, 0.0  ;;  %v441_v3 = vld [vmem:[#allocation2 + $0x130] sm:$0xff]  ;;  %2263 = vmatpush.bf16.msrb.mxu1 %v3542_v49 }
 0x1c4   : > { %4960 = vst [vmem:[#allocation19_spill] sm:$0xff] %v4353_v63 }
 0x1c5   : > { %4961 = vst [vmem:[#allocation20_spill] sm:$0xff] %v4357_v9  ;;  %v1106_v15 = vpop.f32.mrf.mxu2 }
 0x1c6   : > { %v1275_v24 = vpop.f32.mrf.mxu3  ;;  %v770_v26 = vpop.f32.mrf.mxu0  ;;  %v1107_v59 = vadd.f32 %v1106_v15, %v4188_v20 }
 0x1c7   : > { %v771_v33 = vadd.f32 %v770_v26, %v4181_v11  ;;  %v939_v38 = vpop.f32.mrf.mxu1  ;;  %v1276_v5 = vadd.f32 %v1275_v24, %v4191_v23 }
 0x1c8   : > { %v940_v40 = vadd.f32 %v939_v38, %v4183_v12  ;;  %v486_v38 = vpack.c.bf16 %v442_v46, %v441_v3  ;;  %v1467_v63 = vmax.f32 %v1107_v59, 0.0 }
 0x1c9   : > { %v1469_v42 = vmax.f32 %v771_v33, 0.0  ;;  %v1468_v49 = vmax.f32 %v1276_v5, 0.0 }
 0x1ca   : > { %v1470_v2 = vmax.f32 %v940_v40, 0.0 }
 0x1cb   : > { %v4365_v4 = vpack.c.bf16 %v1469_v42, %v1465_v41 }
 0x1cc   : > { %v4368_v1 = vpack.c.bf16 %v1470_v2, %v1466_v0 }
 0x1cd   : > { %4962 = vst [vmem:[#allocation21_spill] sm:$0xff] %v4365_v4  ;;  %v1108_v26 = vpop.f32.mrf.mxu2 }
 0x1ce   : > { %4963 = vst [vmem:[#allocation22_spill] sm:$0xff] %v4368_v1  ;;  %v1109_v14 = vadd.f32 %v1108_v26, %v4188_v20  ;;  %v1277_v33 = vpop.f32.mrf.mxu3  ;;  %v773_v9 = vpop.f32.mrf.mxu0 }
 0x1cf   : > { %v1278_v19 = vadd.f32 %v1277_v33, %v4191_v23  ;;  %v942_v40 = vpop.f32.mrf.mxu1  ;;  %v774_v42 = vadd.f32 %v773_v9, %v4181_v11 }
 0x1d0   : > { %v1471_v43 = vmax.f32 %v1109_v14, 0.0  ;;  %v943_v2 = vadd.f32 %v942_v40, %v4183_v12 }
 0x1d1   : > { %v1472_v41 = vmax.f32 %v1278_v19, 0.0  ;;  %812 = vmatmul.bf16.gmra.mxu0 %v486_v38  ;;  %v1473_v14 = vmax.f32 %v774_v42, 0.0 }
 0x1d2   : > { %981 = vmatmul.bf16.gmra.mxu1 %v486_v38  ;;  %1150 = vmatmul.bf16.gmra.mxu2 %v486_v38  ;;  %v4373_v15 = vpack.c.bf16 %v1471_v43, %v1467_v63  ;;  %v1474_v19 = vmax.f32 %v943_v2, 0.0  ;;  %v443_v43 = vld [vmem:[#allocation2 + $0x140] sm:$0xff] }
 0x1d3   : > { %1319 = vmatmul.bf16.gmra.mxu3 %v486_v38  ;;  %v4375_v24 = vpack.c.bf16 %v1472_v41, %v1468_v49  ;;  %v444_v38 = vld [vmem:[#allocation2 + $0x148] sm:$0xff] }
 0x1d4   : > { %4964 = vst [vmem:[#allocation23_spill] sm:$0xff] %v4373_v15  ;;  %v487_v15 = vpack.c.bf16 %v444_v38, %v443_v43 }
 0x1d5   : > { %4965 = vst [vmem:[#allocation24_spill] sm:$0xff] %v4375_v24  ;;  %v1111_v0 = vpop.f32.mrf.mxu2 }
 0x1d6   : > { %v1280_v3 = vpop.f32.mrf.mxu3  ;;  %v775_v46 = vpop.f32.mrf.mxu0  ;;  %v1112_v9 = vadd.f32 %v1111_v0, %v4188_v20 }
 0x1d7   : > { %v776_v59 = vadd.f32 %v775_v46, %v4181_v11  ;;  %v944_v26 = vpop.f32.mrf.mxu1  ;;  %v1281_v40 = vadd.f32 %v1280_v3, %v4191_v23 }
 0x1d8   : > { %v945_v5 = vadd.f32 %v944_v26, %v4183_v12 }
 0x1d9   : > { %v1477_v33 = vmax.f32 %v776_v59, 0.0  ;;  %v1475_v59 = vmax.f32 %v1112_v9, 0.0  ;;  %v1476_v4 = vmax.f32 %v1281_v40, 0.0 }
 0x1da   : > { %v1478_v63 = vmax.f32 %v945_v5, 0.0 }
 0x1db   : > { %v4381_v49 = vpack.c.bf16 %v1477_v33, %v1473_v14 }
 0x1dc   : > { %v4384_v41 = vpack.c.bf16 %v1478_v63, %v1474_v19 }
 0x1dd   : > { %4966 = vst [vmem:[#allocation25_spill] sm:$0xff] %v4381_v49  ;;  %v1113_v24 = vpop.f32.mrf.mxu2 }
 0x1de   : > { %4967 = vst [vmem:[#allocation26_spill] sm:$0xff] %v4384_v41  ;;  %v1114_v46 = vadd.f32 %v1113_v24, %v4188_v20  ;;  %v1282_v1 = vpop.f32.mrf.mxu3  ;;  %v778_v26 = vpop.f32.mrf.mxu0 }
 0x1df   : > { %v1283_v42 = vadd.f32 %v1282_v1, %v4191_v23  ;;  %v947_v2 = vpop.f32.mrf.mxu1  ;;  %v779_v33 = vadd.f32 %v778_v26, %v4181_v11 }
 0x1e0   : > { %v1479_v5 = vmax.f32 %v1114_v46, 0.0  ;;  %v948_v19 = vadd.f32 %v947_v2, %v4183_v12 }
 0x1e1   : > { %v1480_v14 = vmax.f32 %v1283_v42, 0.0  ;;  %817 = vmatmul.bf16.gmra.mxu0 %v487_v15  ;;  %v1481_v40 = vmax.f32 %v779_v33, 0.0 }
 0x1e2   : > { %986 = vmatmul.bf16.gmra.mxu1 %v487_v15  ;;  %1155 = vmatmul.bf16.gmra.mxu2 %v487_v15  ;;  %v4389_v0 = vpack.c.bf16 %v1479_v5, %v1475_v59  ;;  %v1482_v42 = vmax.f32 %v948_v19, 0.0  ;;  %v445_v5 = vld [vmem:[#allocation2 + $0x150] sm:$0xff] }
 0x1e3   : > { %1324 = vmatmul.bf16.gmra.mxu3 %v487_v15  ;;  %v4391_v3 = vpack.c.bf16 %v1480_v14, %v1476_v4  ;;  %v446_v15 = vld [vmem:[#allocation2 + $0x158] sm:$0xff] }
 0x1e4   : > { %4968 = vst [vmem:[#allocation27_spill] sm:$0xff] %v4389_v0  ;;  %v488_v0 = vpack.c.bf16 %v446_v15, %v445_v5 }
 0x1e5   : > { %4969 = vst [vmem:[#allocation28_spill] sm:$0xff] %v4391_v3  ;;  %v1116_v24 = vpop.f32.mrf.mxu2 }
 0x1e6   : > { %v1285_v63 = vpop.f32.mrf.mxu3  ;;  %v780_v1 = vpop.f32.mrf.mxu0  ;;  %v1117_v26 = vadd.f32 %v1116_v24, %v4188_v20 }
 0x1e7   : > { %v781_v43 = vadd.f32 %v780_v1, %v4181_v11  ;;  %v949_v38 = vpop.f32.mrf.mxu1  ;;  %v1286_v2 = vadd.f32 %v1285_v63, %v4191_v23 }
 0x1e8   : > { %v950_v9 = vadd.f32 %v949_v38, %v4183_v12 }
 0x1e9   : > { %v1485_v46 = vmax.f32 %v781_v43, 0.0  ;;  %v1483_v43 = vmax.f32 %v1117_v26, 0.0  ;;  %v1484_v49 = vmax.f32 %v1286_v2, 0.0 }
 0x1ea   : > { %v1486_v59 = vmax.f32 %v950_v9, 0.0 }
 0x1eb   : > { %v4397_v4 = vpack.c.bf16 %v1485_v46, %v1481_v40 }
 0x1ec   : > { %v4400_v14 = vpack.c.bf16 %v1486_v59, %v1482_v42 }
 0x1ed   : > { %4970 = vst [vmem:[#allocation29_spill] sm:$0xff] %v4397_v4  ;;  %v1118_v3 = vpop.f32.mrf.mxu2 }
 0x1ee   : > { %4971 = vst [vmem:[#allocation30_spill] sm:$0xff] %v4400_v14  ;;  %v1119_v1 = vadd.f32 %v1118_v3, %v4188_v20  ;;  %v1287_v41 = vpop.f32.mrf.mxu3  ;;  %v783_v38 = vpop.f32.mrf.mxu0 }
 0x1ef   : > { %v1288_v33 = vadd.f32 %v1287_v41, %v4191_v23  ;;  %v952_v19 = vpop.f32.mrf.mxu1  ;;  %v784_v46 = vadd.f32 %v783_v38, %v4181_v11 }
 0x1f0   : > { %v1487_v9 = vmax.f32 %v1119_v1, 0.0  ;;  %v953_v42 = vadd.f32 %v952_v19, %v4183_v12 }
 0x1f1   : > { %v1488_v40 = vmax.f32 %v1288_v33, 0.0  ;;  %822 = vmatmul.bf16.gmra.mxu0 %v488_v0  ;;  %v1489_v2 = vmax.f32 %v784_v46, 0.0 }
 0x1f2   : > { %991 = vmatmul.bf16.gmra.mxu1 %v488_v0  ;;  %1160 = vmatmul.bf16.gmra.mxu2 %v488_v0  ;;  %v4405_v24 = vpack.c.bf16 %v1487_v9, %v1483_v43  ;;  %v1490_v33 = vmax.f32 %v953_v42, 0.0  ;;  %v447_v9 = vld [vmem:[#allocation2 + $0x160] sm:$0xff] }
 0x1f3   : > { %1329 = vmatmul.bf16.gmra.mxu3 %v488_v0  ;;  %v4407_v63 = vpack.c.bf16 %v1488_v40, %v1484_v49  ;;  %v448_v0 = vld [vmem:[#allocation2 + $0x168] sm:$0xff] }
 0x1f4   : > { %4972 = vst [vmem:[#allocation31_spill] sm:$0xff] %v4405_v24 }
 0x1f5   : > { %4973 = vst [vmem:[#allocation32_spill] sm:$0xff] %v4407_v63  ;;  %v1121_v3 = vpop.f32.mrf.mxu2 }
 0x1f6   : > { %v1290_v59 = vpop.f32.mrf.mxu3  ;;  %v785_v41 = vpop.f32.mrf.mxu0  ;;  %v1122_v38 = vadd.f32 %v1121_v3, %v4188_v20 }
 0x1f7   : > { %v786_v5 = vadd.f32 %v785_v41, %v4181_v11  ;;  %v954_v15 = vpop.f32.mrf.mxu1  ;;  %v1291_v19 = vadd.f32 %v1290_v59, %v4191_v23  ;;  %v489_v41 = vpack.c.bf16 %v448_v0, %v447_v9  ;;  %v3549_v59 = vld [vmem:[%s4032_s12 + $0x88] sm:$0xff] }
 0x1f8   : > { %v955_v26 = vadd.f32 %v954_v15, %v4183_v12  ;;  %v1491_v24 = vmax.f32 %v1122_v38, 0.0  ;;  %2433 = vmatpush.bf16.msrb.mxu2 %v3549_v59 }
 0x1f9   : > { %v1493_v1 = vmax.f32 %v786_v5, 0.0 }
 0x1fa   : > { %v1494_v43 = vmax.f32 %v955_v26, 0.0 }
 0x1fb   : > { %v4413_v49 = vpack.c.bf16 %v1493_v1, %v1489_v2  ;;  %v1492_v1 = vmax.f32 %v1291_v19, 0.0 }
 0x1fc   : > { %v4416_v40 = vpack.c.bf16 %v1494_v43, %v1490_v33  ;;  %v3557_v33 = vld [vmem:[%s4032_s12 + $0xc8] sm:$0xff] }
 0x1fd   : > { %4974 = vst [vmem:[#allocation33_spill] sm:$0xff] %v4413_v49  ;;  %v1123_v63 = vpop.f32.mrf.mxu2  ;;  %2602 = vmatpush.bf16.msrb.mxu3 %v3557_v33 }
 0x1fe   : > { %4975 = vst [vmem:[#allocation34_spill] sm:$0xff] %v4416_v40  ;;  %v1124_v15 = vadd.f32 %v1123_v63, %v4188_v20  ;;  %v1292_v46 = vpop.f32.mrf.mxu3  ;;  %v788_v5 = vpop.f32.mrf.mxu0 }
 0x1ff   : > { %v1293_v42 = vadd.f32 %v1292_v46, %v4191_v23  ;;  %v957_v26 = vpop.f32.mrf.mxu1  ;;  %v789_v43 = vadd.f32 %v788_v5, %v4181_v11  ;;  %v450_v5 = vld [vmem:[#allocation2 + $0x178] sm:$0xff] }
 0x200   : > { %v1495_v2 = vmax.f32 %v1124_v15, 0.0  ;;  %v958_v0 = vadd.f32 %v957_v26, %v4183_v12 }
 0x201   : > { %v1496_v49 = vmax.f32 %v1293_v42, 0.0  ;;  %827 = vmatmul.bf16.gmra.mxu0 %v489_v41  ;;  %v1497_v46 = vmax.f32 %v789_v43, 0.0 }
 0x202   : > { %996 = vmatmul.bf16.gmra.mxu1 %v489_v41  ;;  %1165 = vmatmul.bf16.gmra.mxu2 %v489_v41  ;;  %v4421_v3 = vpack.c.bf16 %v1495_v2, %v1491_v24  ;;  %v3533_v2 = vld [vmem:[%s4032_s12 + $0x8] sm:$0xff] }
 0x203   : > { %1334 = vmatmul.bf16.gmra.mxu3 %v489_v41  ;;  %v4425_v63 = vpack.c.bf16 %v1496_v49, %v1492_v1  ;;  %v1498_v49 = vmax.f32 %v958_v0, 0.0  ;;  %2095 = vmatpush.bf16.msrb.mxu0 %v3533_v2 }
 0x204   : > { %4976 = vst [vmem:[#allocation35_spill] sm:$0xff] %v4421_v3  ;;  %v3541_v3 = vld [vmem:[%s4032_s12 + $0x48] sm:$0xff] }
 0x205   : > { %4977 = vst [vmem:[#allocation36_spill] sm:$0xff] %v4425_v63  ;;  %v1126_v9 = vpop.f32.mrf.mxu2  ;;  %v449_v63 = vld [vmem:[#allocation2 + $0x170] sm:$0xff]  ;;  %2264 = vmatpush.bf16.msrb.mxu1 %v3541_v3 }
 0x206   : > { %v1295_v38 = vpop.f32.mrf.mxu3  ;;  %v790_v19 = vpop.f32.mrf.mxu0  ;;  %v1127_v26 = vadd.f32 %v1126_v9, %v4188_v20 }
 0x207   : > { %v791_v15 = vadd.f32 %v790_v19, %v4181_v11  ;;  %v959_v24 = vpop.f32.mrf.mxu1  ;;  %v1296_v19 = vadd.f32 %v1295_v38, %v4191_v23 }
 0x208   : > { %v960_v41 = vadd.f32 %v959_v24, %v4183_v12  ;;  %v490_v24 = vpack.c.bf16 %v450_v5, %v449_v63  ;;  %v1499_v4 = vmax.f32 %v1127_v26, 0.0 }
 0x209   : > { %v1501_v42 = vmax.f32 %v791_v15, 0.0  ;;  %v1500_v3 = vmax.f32 %v1296_v19, 0.0 }
 0x20a   : > { %v1502_v1 = vmax.f32 %v960_v41, 0.0 }
 0x20b   : > { %v4433_v59 = vpack.c.bf16 %v1501_v42, %v1497_v46 }
 0x20c   : > { %v4436_v33 = vpack.c.bf16 %v1502_v1, %v1498_v49 }
 0x20d   : > { %4978 = vst [vmem:[#allocation37_spill] sm:$0xff] %v4433_v59  ;;  %v1128_v40 = vpop.f32.mrf.mxu2 }
 0x20e   : > { %4979 = vst [vmem:[#allocation38_spill] sm:$0xff] %v4436_v33  ;;  %v1129_v43 = vadd.f32 %v1128_v40, %v4188_v20  ;;  %v1297_v15 = vpop.f32.mrf.mxu3  ;;  %v793_v14 = vpop.f32.mrf.mxu0 }
 0x20f   : > { %v1298_v0 = vadd.f32 %v1297_v15, %v4191_v23  ;;  %v962_v41 = vpop.f32.mrf.mxu1  ;;  %v794_v63 = vadd.f32 %v793_v14, %v4181_v11 }
 0x210   : > { %v1503_v2 = vmax.f32 %v1129_v43, 0.0  ;;  %v963_v42 = vadd.f32 %v962_v41, %v4183_v12 }
 0x211   : > { %v1504_v46 = vmax.f32 %v1298_v0, 0.0  ;;  %832 = vmatmul.bf16.gmra.mxu0 %v490_v24  ;;  %v1505_v43 = vmax.f32 %v794_v63, 0.0 }
 0x212   : > { %1001 = vmatmul.bf16.gmra.mxu1 %v490_v24  ;;  %1170 = vmatmul.bf16.gmra.mxu2 %v490_v24  ;;  %v4441_v9 = vpack.c.bf16 %v1503_v2, %v1499_v4  ;;  %v1506_v0 = vmax.f32 %v963_v42, 0.0  ;;  %v451_v2 = vld [vmem:[#allocation2 + $0x180] sm:$0xff] }
 0x213   : > { %1339 = vmatmul.bf16.gmra.mxu3 %v490_v24  ;;  %v4443_v38 = vpack.c.bf16 %v1504_v46, %v1500_v3  ;;  %v452_v24 = vld [vmem:[#allocation2 + $0x188] sm:$0xff] }
 0x214   : > { %4980 = vst [vmem:[#allocation39_spill] sm:$0xff] %v4441_v9  ;;  %v491_v9 = vpack.c.bf16 %v452_v24, %v451_v2 }
 0x215   : > { %4981 = vst [vmem:[#allocation40_spill] sm:$0xff] %v4443_v38  ;;  %v1131_v40 = vpop.f32.mrf.mxu2 }
 0x216   : > { %v1300_v49 = vpop.f32.mrf.mxu3  ;;  %v795_v1 = vpop.f32.mrf.mxu0  ;;  %v1132_v14 = vadd.f32 %v1131_v40, %v4188_v20 }
 0x217   : > { %v796_v5 = vadd.f32 %v795_v1, %v4181_v11  ;;  %v964_v26 = vpop.f32.mrf.mxu1  ;;  %v1301_v41 = vadd.f32 %v1300_v49, %v4191_v23 }
 0x218   : > { %v965_v19 = vadd.f32 %v964_v26, %v4183_v12 }
 0x219   : > { %v1509_v15 = vmax.f32 %v796_v5, 0.0  ;;  %v1507_v5 = vmax.f32 %v1132_v14, 0.0  ;;  %v1508_v59 = vmax.f32 %v1301_v41, 0.0 }
 0x21a   : > { %v1510_v4 = vmax.f32 %v965_v19, 0.0 }
 0x21b   : > { %v4449_v3 = vpack.c.bf16 %v1509_v15, %v1505_v43 }
 0x21c   : > { %v4452_v46 = vpack.c.bf16 %v1510_v4, %v1506_v0 }
 0x21d   : > { %4982 = vst [vmem:[#allocation41_spill] sm:$0xff] %v4449_v3  ;;  %v1133_v38 = vpop.f32.mrf.mxu2 }
 0x21e   : > { %4983 = vst [vmem:[#allocation42_spill] sm:$0xff] %v4452_v46  ;;  %v1134_v1 = vadd.f32 %v1133_v38, %v4188_v20  ;;  %v1302_v33 = vpop.f32.mrf.mxu3  ;;  %v798_v26 = vpop.f32.mrf.mxu0 }
 0x21f   : > { %v1303_v63 = vadd.f32 %v1302_v33, %v4191_v23  ;;  %v967_v42 = vpop.f32.mrf.mxu1  ;;  %v799_v15 = vadd.f32 %v798_v26, %v4181_v11 }
 0x220   : > { %v1511_v19 = vmax.f32 %v1134_v1, 0.0  ;;  %v968_v0 = vadd.f32 %v967_v42, %v4183_v12 }
 0x221   : > { %v1512_v43 = vmax.f32 %v1303_v63, 0.0  ;;  %837 = vmatmul.bf16.gmra.mxu0 %v491_v9  ;;  %v1513_v41 = vmax.f32 %v799_v15, 0.0 }
 0x222   : > { %1006 = vmatmul.bf16.gmra.mxu1 %v491_v9  ;;  %1175 = vmatmul.bf16.gmra.mxu2 %v491_v9  ;;  %v4457_v40 = vpack.c.bf16 %v1511_v19, %v1507_v5  ;;  %v1514_v63 = vmax.f32 %v968_v0, 0.0  ;;  %v453_v19 = vld [vmem:[#allocation2 + $0x190] sm:$0xff] }
 0x223   : > { %1344 = vmatmul.bf16.gmra.mxu3 %v491_v9  ;;  %v4459_v49 = vpack.c.bf16 %v1512_v43, %v1508_v59  ;;  %v454_v9 = vld [vmem:[#allocation2 + $0x198] sm:$0xff] }
 0x224   : > { %4984 = vst [vmem:[#allocation43_spill] sm:$0xff] %v4457_v40  ;;  %v492_v40 = vpack.c.bf16 %v454_v9, %v453_v19 }
 0x225   : > { %4985 = vst [vmem:[#allocation44_spill] sm:$0xff] %v4459_v49  ;;  %v1136_v38 = vpop.f32.mrf.mxu2 }
 0x226   : > { %v1305_v4 = vpop.f32.mrf.mxu3  ;;  %v800_v33 = vpop.f32.mrf.mxu0  ;;  %v1137_v26 = vadd.f32 %v1136_v38, %v4188_v20 }
 0x227   : > { %v801_v2 = vadd.f32 %v800_v33, %v4181_v11  ;;  %v969_v24 = vpop.f32.mrf.mxu1  ;;  %v1306_v42 = vadd.f32 %v1305_v4, %v4191_v23 }
 0x228   : > { %v970_v14 = vadd.f32 %v969_v24, %v4183_v12 }
 0x229   : > { %v1517_v1 = vmax.f32 %v801_v2, 0.0  ;;  %v1515_v2 = vmax.f32 %v1137_v26, 0.0  ;;  %v1516_v3 = vmax.f32 %v1306_v42, 0.0 }
 0x22a   : > { %v1518_v5 = vmax.f32 %v970_v14, 0.0 }
 0x22b   : > { %v4465_v59 = vpack.c.bf16 %v1517_v1, %v1513_v41 }
 0x22c   : > { %v4468_v43 = vpack.c.bf16 %v1518_v5, %v1514_v63 }
 0x22d   : > { %4986 = vst [vmem:[#allocation45_spill] sm:$0xff] %v4465_v59  ;;  %v1138_v49 = vpop.f32.mrf.mxu2 }
 0x22e   : > { %4987 = vst [vmem:[#allocation46_spill] sm:$0xff] %v4468_v43  ;;  %v1139_v33 = vadd.f32 %v1138_v49, %v4188_v20  ;;  %v1307_v46 = vpop.f32.mrf.mxu3  ;;  %v803_v24 = vpop.f32.mrf.mxu0 }
 0x22f   : > { %v1308_v15 = vadd.f32 %v1307_v46, %v4191_v23  ;;  %v972_v0 = vpop.f32.mrf.mxu1  ;;  %v804_v1 = vadd.f32 %v803_v24, %v4181_v11 }
 0x230   : > { %v1519_v14 = vmax.f32 %v1139_v33, 0.0  ;;  %v973_v63 = vadd.f32 %v972_v0, %v4183_v12 }
 0x231   : > { %v1520_v41 = vmax.f32 %v1308_v15, 0.0  ;;  %842 = vmatmul.bf16.gmra.mxu0 %v492_v40  ;;  %v1521_v42 = vmax.f32 %v804_v1, 0.0 }
 0x232   : > { %1011 = vmatmul.bf16.gmra.mxu1 %v492_v40  ;;  %1180 = vmatmul.bf16.gmra.mxu2 %v492_v40  ;;  %v4473_v38 = vpack.c.bf16 %v1519_v14, %v1515_v2  ;;  %v1522_v15 = vmax.f32 %v973_v63, 0.0  ;;  %v455_v14 = vld [vmem:[#allocation2 + $0x1a0] sm:$0xff] }
 0x233   : > { %1349 = vmatmul.bf16.gmra.mxu3 %v492_v40  ;;  %v4475_v4 = vpack.c.bf16 %v1520_v41, %v1516_v3  ;;  %v456_v40 = vld [vmem:[#allocation2 + $0x1a8] sm:$0xff] }
 0x234   : > { %4988 = vst [vmem:[#allocation47_spill] sm:$0xff] %v4473_v38 }
 0x235   : > { %4989 = vst [vmem:[#allocation48_spill] sm:$0xff] %v4475_v4  ;;  %v1141_v49 = vpop.f32.mrf.mxu2 }
 0x236   : > { %v1310_v5 = vpop.f32.mrf.mxu3  ;;  %v805_v46 = vpop.f32.mrf.mxu0  ;;  %v1142_v24 = vadd.f32 %v1141_v49, %v4188_v20 }
 0x237   : > { %v806_v19 = vadd.f32 %v805_v46, %v4181_v11  ;;  %v974_v9 = vpop.f32.mrf.mxu1  ;;  %v1311_v0 = vadd.f32 %v1310_v5, %v4191_v23  ;;  %v493_v46 = vpack.c.bf16 %v456_v40, %v455_v14  ;;  %v3548_v5 = vld [vmem:[%s4032_s12 + $0x80] sm:$0xff] }
 0x238   : > { %v975_v26 = vadd.f32 %v974_v9, %v4183_v12  ;;  %v1523_v38 = vmax.f32 %v1142_v24, 0.0  ;;  %2434 = vmatpush.bf16.msrb.mxu2 %v3548_v5 }
 0x239   : > { %v1525_v33 = vmax.f32 %v806_v19, 0.0 }
 0x23a   : > { %v1526_v2 = vmax.f32 %v975_v26, 0.0 }
 0x23b   : > { %v4481_v3 = vpack.c.bf16 %v1525_v33, %v1521_v42  ;;  %v1524_v33 = vmax.f32 %v1311_v0, 0.0 }
 0x23c   : > { %v4484_v41 = vpack.c.bf16 %v1526_v2, %v1522_v15  ;;  %v3556_v15 = vld [vmem:[%s4032_s12 + $0xc0] sm:$0xff] }
 0x23d   : > { %4990 = vst [vmem:[#allocation49_spill] sm:$0xff] %v4481_v3  ;;  %v1143_v4 = vpop.f32.mrf.mxu2  ;;  %2603 = vmatpush.bf16.msrb.mxu3 %v3556_v15 }
 0x23e   : > { %4991 = vst [vmem:[#allocation50_spill] sm:$0xff] %v4484_v41  ;;  %v1144_v9 = vadd.f32 %v1143_v4, %v4188_v20  ;;  %v1312_v1 = vpop.f32.mrf.mxu3  ;;  %v808_v19 = vpop.f32.mrf.mxu0 }
 0x23f   : > { %v1313_v63 = vadd.f32 %v1312_v1, %v4191_v23  ;;  %v977_v26 = vpop.f32.mrf.mxu1  ;;  %v809_v2 = vadd.f32 %v808_v19, %v4181_v11  ;;  %v458_v19 = vld [vmem:[#allocation2 + $0x1b8] sm:$0xff] }
 0x240   : > { %v1527_v42 = vmax.f32 %v1144_v9, 0.0  ;;  %v978_v40 = vadd.f32 %v977_v26, %v4183_v12 }
 0x241   : > { %v1528_v3 = vmax.f32 %v1313_v63, 0.0  ;;  %847 = vmatmul.bf16.gmra.mxu0 %v493_v46  ;;  %v1529_v1 = vmax.f32 %v809_v2, 0.0 }
 0x242   : > { %1016 = vmatmul.bf16.gmra.mxu1 %v493_v46  ;;  %1185 = vmatmul.bf16.gmra.mxu2 %v493_v46  ;;  %v4489_v49 = vpack.c.bf16 %v1527_v42, %v1523_v38  ;;  %v3532_v42 = vld [vmem:[%s4032_s12] sm:$0xff] }
 0x243   : > { %1354 = vmatmul.bf16.gmra.mxu3 %v493_v46  ;;  %v4493_v4 = vpack.c.bf16 %v1528_v3, %v1524_v33  ;;  %v1530_v3 = vmax.f32 %v978_v40, 0.0  ;;  %2096 = vmatpush.bf16.msrb.mxu0 %v3532_v42 }
 0x244   : > { %4992 = vst [vmem:[#allocation51_spill] sm:$0xff] %v4489_v49  ;;  %v3540_v49 = vld [vmem:[%s4032_s12 + $0x40] sm:$0xff] }
 0x245   : > { %4993 = vst [vmem:[#allocation52_spill] sm:$0xff] %v4493_v4  ;;  %v1146_v14 = vpop.f32.mrf.mxu2  ;;  %v457_v4 = vld [vmem:[#allocation2 + $0x1b0] sm:$0xff]  ;;  %2265 = vmatpush.bf16.msrb.mxu1 %v3540_v49 }
 0x246   : > { %v1315_v24 = vpop.f32.mrf.mxu3  ;;  %v810_v0 = vpop.f32.mrf.mxu0  ;;  %v1147_v26 = vadd.f32 %v1146_v14, %v4188_v20 }
 0x247   : > { %v811_v9 = vadd.f32 %v810_v0, %v4181_v11  ;;  %v979_v38 = vpop.f32.mrf.mxu1  ;;  %v1316_v0 = vadd.f32 %v1315_v24, %v4191_v23 }
 0x248   : > { %v980_v46 = vadd.f32 %v979_v38, %v4183_v12  ;;  %v494_v38 = vpack.c.bf16 %v458_v19, %v457_v4  ;;  %v1531_v59 = vmax.f32 %v1147_v26, 0.0 }
 0x249   : > { %v1533_v63 = vmax.f32 %v811_v9, 0.0  ;;  %v1532_v49 = vmax.f32 %v1316_v0, 0.0 }
 0x24a   : > { %v1534_v33 = vmax.f32 %v980_v46, 0.0 }
 0x24b   : > { %v4501_v5 = vpack.c.bf16 %v1533_v63, %v1529_v1 }
 0x24c   : > { %v4504_v15 = vpack.c.bf16 %v1534_v33, %v1530_v3 }
 0x24d   : > { %4994 = vst [vmem:[#allocation53_spill] sm:$0xff] %v4501_v5  ;;  %v1148_v41 = vpop.f32.mrf.mxu2 }
 0x24e   : > { %4995 = vst [vmem:[#allocation54_spill] sm:$0xff] %v4504_v15  ;;  %v1149_v2 = vadd.f32 %v1148_v41, %v4188_v20  ;;  %v1317_v9 = vpop.f32.mrf.mxu3  ;;  %v813_v43 = vpop.f32.mrf.mxu0 }
 0x24f   : > { %v1318_v40 = vadd.f32 %v1317_v9, %v4191_v23  ;;  %v982_v46 = vpop.f32.mrf.mxu1  ;;  %v814_v4 = vadd.f32 %v813_v43, %v4181_v11 }
 0x250   : > { %v1535_v42 = vmax.f32 %v1149_v2, 0.0  ;;  %v983_v63 = vadd.f32 %v982_v46, %v4183_v12 }
 0x251   : > { %v1536_v1 = vmax.f32 %v1318_v40, 0.0  ;;  %852 = vmatmul.bf16.gmra.mxu0 %v494_v38  ;;  %v1537_v2 = vmax.f32 %v814_v4, 0.0 }
 0x252   : > { %1021 = vmatmul.bf16.gmra.mxu1 %v494_v38  ;;  %1190 = vmatmul.bf16.gmra.mxu2 %v494_v38  ;;  %v4509_v14 = vpack.c.bf16 %v1535_v42, %v1531_v59  ;;  %v1538_v40 = vmax.f32 %v983_v63, 0.0  ;;  %v459_v42 = vld [vmem:[#allocation2 + $0x1c0] sm:$0xff] }
 0x253   : > { %1359 = vmatmul.bf16.gmra.mxu3 %v494_v38  ;;  %v4511_v24 = vpack.c.bf16 %v1536_v1, %v1532_v49  ;;  %v460_v38 = vld [vmem:[#allocation2 + $0x1c8] sm:$0xff] }
 0x254   : > { %4996 = vst [vmem:[#allocation55_spill] sm:$0xff] %v4509_v14  ;;  %v495_v14 = vpack.c.bf16 %v460_v38, %v459_v42 }
 0x255   : > { %4997 = vst [vmem:[#allocation56_spill] sm:$0xff] %v4511_v24  ;;  %v1151_v41 = vpop.f32.mrf.mxu2 }
 0x256   : > { %v1320_v3 = vpop.f32.mrf.mxu3  ;;  %v815_v33 = vpop.f32.mrf.mxu0  ;;  %v1152_v43 = vadd.f32 %v1151_v41, %v4188_v20 }
 0x257   : > { %v816_v19 = vadd.f32 %v815_v33, %v4181_v11  ;;  %v984_v26 = vpop.f32.mrf.mxu1  ;;  %v1321_v46 = vadd.f32 %v1320_v3, %v4191_v23 }
 0x258   : > { %v985_v0 = vadd.f32 %v984_v26, %v4183_v12 }
 0x259   : > { %v1541_v9 = vmax.f32 %v816_v19, 0.0  ;;  %v1539_v19 = vmax.f32 %v1152_v43, 0.0  ;;  %v1540_v5 = vmax.f32 %v1321_v46, 0.0 }
 0x25a   : > { %v1542_v59 = vmax.f32 %v985_v0, 0.0 }
 0x25b   : > { %v4517_v49 = vpack.c.bf16 %v1541_v9, %v1537_v2 }
 0x25c   : > { %v4520_v1 = vpack.c.bf16 %v1542_v59, %v1538_v40 }
 0x25d   : > { %4998 = vst [vmem:[#allocation57_spill] sm:$0xff] %v4517_v49  ;;  %v1153_v24 = vpop.f32.mrf.mxu2 }
 0x25e   : > { %4999 = vst [vmem:[#allocation58_spill] sm:$0xff] %v4520_v1  ;;  %v1154_v33 = vadd.f32 %v1153_v24, %v4188_v20  ;;  %v1322_v15 = vpop.f32.mrf.mxu3  ;;  %v818_v26 = vpop.f32.mrf.mxu0 }
 0x25f   : > { %v1323_v4 = vadd.f32 %v1322_v15, %v4191_v23  ;;  %v987_v63 = vpop.f32.mrf.mxu1  ;;  %v819_v9 = vadd.f32 %v818_v26, %v4181_v11 }
 0x260   : > { %v1543_v0 = vmax.f32 %v1154_v33, 0.0  ;;  %v988_v40 = vadd.f32 %v987_v63, %v4183_v12 }
 0x261   : > { %v1544_v2 = vmax.f32 %v1323_v4, 0.0  ;;  %857 = vmatmul.bf16.gmra.mxu0 %v495_v14  ;;  %v1545_v46 = vmax.f32 %v819_v9, 0.0 }
 0x262   : > { %1026 = vmatmul.bf16.gmra.mxu1 %v495_v14  ;;  %1195 = vmatmul.bf16.gmra.mxu2 %v495_v14  ;;  %v4525_v41 = vpack.c.bf16 %v1543_v0, %v1539_v19  ;;  %v1546_v4 = vmax.f32 %v988_v40, 0.0  ;;  %v461_v0 = vld [vmem:[#allocation2 + $0x1d0] sm:$0xff] }
 0x263   : > { %1364 = vmatmul.bf16.gmra.mxu3 %v495_v14  ;;  %v4527_v3 = vpack.c.bf16 %v1544_v2, %v1540_v5  ;;  %v462_v14 = vld [vmem:[#allocation2 + $0x1d8] sm:$0xff] }
 0x264   : > { %5000 = vst [vmem:[#allocation59_spill] sm:$0xff] %v4525_v41  ;;  %v496_v41 = vpack.c.bf16 %v462_v14, %v461_v0 }
 0x265   : > { %5001 = vst [vmem:[#allocation60_spill] sm:$0xff] %v4527_v3  ;;  %v1156_v24 = vpop.f32.mrf.mxu2 }
 0x266   : > { %v1325_v59 = vpop.f32.mrf.mxu3  ;;  %v820_v15 = vpop.f32.mrf.mxu0  ;;  %v1157_v26 = vadd.f32 %v1156_v24, %v4188_v20 }
 0x267   : > { %v821_v42 = vadd.f32 %v820_v15, %v4181_v11  ;;  %v989_v38 = vpop.f32.mrf.mxu1  ;;  %v1326_v63 = vadd.f32 %v1325_v59, %v4191_v23 }
 0x268   : > { %v990_v43 = vadd.f32 %v989_v38, %v4183_v12 }
 0x269   : > { %v1549_v33 = vmax.f32 %v821_v42, 0.0  ;;  %v1547_v42 = vmax.f32 %v1157_v26, 0.0  ;;  %v1548_v49 = vmax.f32 %v1326_v63, 0.0 }
 0x26a   : > { %v1550_v19 = vmax.f32 %v990_v43, 0.0 }
 0x26b   : > { %v4533_v5 = vpack.c.bf16 %v1549_v33, %v1545_v46 }
 0x26c   : > { %v4536_v2 = vpack.c.bf16 %v1550_v19, %v1546_v4 }
 0x26d   : > { %5002 = vst [vmem:[#allocation61_spill] sm:$0xff] %v4533_v5  ;;  %v1158_v3 = vpop.f32.mrf.mxu2 }
 0x26e   : > { %5003 = vst [vmem:[#allocation62_spill] sm:$0xff] %v4536_v2  ;;  %v1159_v15 = vadd.f32 %v1158_v3, %v4188_v20  ;;  %v1327_v1 = vpop.f32.mrf.mxu3  ;;  %v823_v38 = vpop.f32.mrf.mxu0 }
 0x26f   : > { %v1328_v9 = vadd.f32 %v1327_v1, %v4191_v23  ;;  %v992_v40 = vpop.f32.mrf.mxu1  ;;  %v824_v33 = vadd.f32 %v823_v38, %v4181_v11 }
 0x270   : > { %v1551_v43 = vmax.f32 %v1159_v15, 0.0  ;;  %v993_v4 = vadd.f32 %v992_v40, %v4183_v12 }
 0x271   : > { %v1552_v46 = vmax.f32 %v1328_v9, 0.0  ;;  %862 = vmatmul.bf16.gmra.mxu0 %v496_v41  ;;  %v1553_v63 = vmax.f32 %v824_v33, 0.0 }
 0x272   : > { %1031 = vmatmul.bf16.gmra.mxu1 %v496_v41  ;;  %1200 = vmatmul.bf16.gmra.mxu2 %v496_v41  ;;  %v4541_v24 = vpack.c.bf16 %v1551_v43, %v1547_v42  ;;  %v1554_v9 = vmax.f32 %v993_v4, 0.0  ;;  %v463_v43 = vld [vmem:[#allocation2 + $0x1e0] sm:$0xff] }
 0x273   : > { %1369 = vmatmul.bf16.gmra.mxu3 %v496_v41  ;;  %v4543_v59 = vpack.c.bf16 %v1552_v46, %v1548_v49  ;;  %v464_v41 = vld [vmem:[#allocation2 + $0x1e8] sm:$0xff] }
 0x274   : > { %5004 = vst [vmem:[#allocation63_spill] sm:$0xff] %v4541_v24  ;;  %v497_v24 = vpack.c.bf16 %v464_v41, %v463_v43 }
 0x275   : > { %5005 = vst [vmem:[#allocation64_spill] sm:$0xff] %v4543_v59  ;;  %v1161_v3 = vpop.f32.mrf.mxu2 }
 0x276   : > { %v1330_v19 = vpop.f32.mrf.mxu3  ;;  %v825_v1 = vpop.f32.mrf.mxu0  ;;  %v1162_v38 = vadd.f32 %v1161_v3, %v4188_v20 }
 0x277   : > { %v826_v0 = vadd.f32 %v825_v1, %v4181_v11  ;;  %v994_v14 = vpop.f32.mrf.mxu1  ;;  %v1331_v40 = vadd.f32 %v1330_v19, %v4191_v23 }
 0x278   : > { %v995_v26 = vadd.f32 %v994_v14, %v4183_v12 }
 0x279   : > { %v1557_v15 = vmax.f32 %v826_v0, 0.0  ;;  %v1555_v0 = vmax.f32 %v1162_v38, 0.0  ;;  %v1556_v5 = vmax.f32 %v1331_v40, 0.0 }
 0x27a   : > { %v1558_v42 = vmax.f32 %v995_v26, 0.0 }
 0x27b   : > { %v4549_v49 = vpack.c.bf16 %v1557_v15, %v1553_v63 }
 0x27c   : > { %v4552_v46 = vpack.c.bf16 %v1558_v42, %v1554_v9 }
 0x27d   : > { %5006 = vst [vmem:[#allocation65_spill] sm:$0xff] %v4549_v49  ;;  %v1163_v59 = vpop.f32.mrf.mxu2 }
 0x27e   : > { %5007 = vst [vmem:[#allocation66_spill] sm:$0xff] %v4552_v46  ;;  %v1164_v1 = vadd.f32 %v1163_v59, %v4188_v20  ;;  %v1332_v2 = vpop.f32.mrf.mxu3  ;;  %v828_v14 = vpop.f32.mrf.mxu0 }
 0x27f   : > { %v1333_v33 = vadd.f32 %v1332_v2, %v4191_v23  ;;  %v997_v4 = vpop.f32.mrf.mxu1  ;;  %v829_v15 = vadd.f32 %v828_v14, %v4181_v11 }
 0x280   : > { %v1559_v26 = vmax.f32 %v1164_v1, 0.0  ;;  %v998_v9 = vadd.f32 %v997_v4, %v4183_v12 }
 0x281   : > { %v1560_v63 = vmax.f32 %v1333_v33, 0.0  ;;  %867 = vmatmul.bf16.gmra.mxu0 %v497_v24  ;;  %v1561_v40 = vmax.f32 %v829_v15, 0.0 }
 0x282   : > { %1036 = vmatmul.bf16.gmra.mxu1 %v497_v24  ;;  %1205 = vmatmul.bf16.gmra.mxu2 %v497_v24  ;;  %v4557_v3 = vpack.c.bf16 %v1559_v26, %v1555_v0  ;;  %v1562_v33 = vmax.f32 %v998_v9, 0.0  ;;  %v465_v26 = vld [vmem:[#allocation2 + $0x1f0] sm:$0xff] }
 0x283   : > { %1374 = vmatmul.bf16.gmra.mxu3 %v497_v24  ;;  %v4559_v19 = vpack.c.bf16 %v1560_v63, %v1556_v5  ;;  %v466_v24 = vld [vmem:[#allocation2 + $0x1f8] sm:$0xff] }
 0x284   : > { %5008 = vst [vmem:[#allocation67_spill] sm:$0xff] %v4557_v3  ;;  %v498_v3 = vpack.c.bf16 %v466_v24, %v465_v26 }
 0x285   : > { %5009 = vst [vmem:[#allocation68_spill] sm:$0xff] %v4559_v19  ;;  %v1166_v59 = vpop.f32.mrf.mxu2 }
 0x286   : > { %v1335_v42 = vpop.f32.mrf.mxu3  ;;  %v830_v2 = vpop.f32.mrf.mxu0  ;;  %v1167_v14 = vadd.f32 %v1166_v59, %v4188_v20 }
 0x287   : > { %v831_v43 = vadd.f32 %v830_v2, %v4181_v11  ;;  %v999_v41 = vpop.f32.mrf.mxu1  ;;  %v1336_v4 = vadd.f32 %v1335_v42, %v4191_v23 }
 0x288   : > { %v1000_v38 = vadd.f32 %v999_v41, %v4183_v12 }
 0x289   : > { %v1565_v1 = vmax.f32 %v831_v43, 0.0  ;;  %v1563_v43 = vmax.f32 %v1167_v14, 0.0  ;;  %v1564_v49 = vmax.f32 %v1336_v4, 0.0 }
 0x28a   : > { %v1566_v0 = vmax.f32 %v1000_v38, 0.0 }
 0x28b   : > { %v4565_v5 = vpack.c.bf16 %v1565_v1, %v1561_v40 }
 0x28c   : > { %v4568_v63 = vpack.c.bf16 %v1566_v0, %v1562_v33 }
 0x28d   : > { %v1168_v19 = vpop.f32.mrf.mxu2 }
 0x28e   : > { %v1169_v2 = vadd.f32 %v1168_v19, %v4188_v20  ;;  %v1337_v46 = vpop.f32.mrf.mxu3  ;;  %v833_v41 = vpop.f32.mrf.mxu0 }
 0x28f   : > { %v1338_v15 = vadd.f32 %v1337_v46, %v4191_v23  ;;  %v1002_v9 = vpop.f32.mrf.mxu1  ;;  %v834_v1 = vadd.f32 %v833_v41, %v4181_v11 }
 0x290   : > { %v1567_v38 = vmax.f32 %v1169_v2, 0.0  ;;  %v1003_v33 = vadd.f32 %v1002_v9, %v4183_v12 }
 0x291   : > { %v1568_v40 = vmax.f32 %v1338_v15, 0.0  ;;  %872 = vmatmul.bf16.gmra.mxu0 %v498_v3  ;;  %v1569_v4 = vmax.f32 %v834_v1, 0.0 }
 0x292   : > { %1041 = vmatmul.bf16.gmra.mxu1 %v498_v3  ;;  %1210 = vmatmul.bf16.gmra.mxu2 %v498_v3  ;;  %v4573_v59 = vpack.c.bf16 %v1567_v38, %v1563_v43  ;;  %v1570_v15 = vmax.f32 %v1003_v33, 0.0 }
 0x293   : > { %1379 = vmatmul.bf16.gmra.mxu3 %v498_v3  ;;  %v4575_v42 = vpack.c.bf16 %v1568_v40, %v1564_v49 }
 0x294   : > { %5010 = vst [vmem:[#allocation69_spill] sm:$0xff] %v4573_v59 }
 0x295   : > { %5011 = vst [vmem:[#allocation70_spill] sm:$0xff] %v4575_v42  ;;  %v1171_v19 = vpop.f32.mrf.mxu2 }
 0x296   : > { %v1340_v0 = vpop.f32.mrf.mxu3  ;;  %v835_v46 = vpop.f32.mrf.mxu0  ;;  %v1172_v49 = vadd.f32 %v1171_v19, %v4188_v20 }
 0x297   : > { %v836_v26 = vadd.f32 %v835_v46, %v4181_v11  ;;  %v1004_v24 = vpop.f32.mrf.mxu1  ;;  %v1341_v41 = vadd.f32 %v1340_v0, %v4191_v23 }
 0x298   : > { %v1005_v14 = vadd.f32 %v1004_v24, %v4183_v12  ;;  %v1571_v1 = vmax.f32 %v1172_v49, 0.0 }
 0x299   : > { %v1573_v2 = vmax.f32 %v836_v26, 0.0  ;;  %v1572_v33 = vmax.f32 %v1341_v41, 0.0 }
 0x29a   : > { %v1574_v43 = vmax.f32 %v1005_v14, 0.0 }
 0x29b   : > { %v4581_v38 = vpack.c.bf16 %v1573_v2, %v1569_v4 }
 0x29c   : > { %v4584_v3 = vpack.c.bf16 %v1574_v43, %v1570_v15 }
 0x29d   : > { %v1173_v9 = vpop.f32.mrf.mxu2 }
 0x29e   : > { %v1174_v40 = vadd.f32 %v1173_v9, %v4188_v20  ;;  %v1342_v42 = vpop.f32.mrf.mxu3  ;;  %v838_v46 = vpop.f32.mrf.mxu0 }
 0x29f   : > { %v1343_v59 = vadd.f32 %v1342_v42, %v4191_v23  ;;  %v1007_v24 = vpop.f32.mrf.mxu1  ;;  %v839_v4 = vadd.f32 %v838_v46, %v4181_v11 }
 0x2a0   : > { %v1575_v26 = vmax.f32 %v1174_v40, 0.0  ;;  %v1008_v2 = vadd.f32 %v1007_v24, %v4183_v12 }
 0x2a1   : > { %v1576_v14 = vmax.f32 %v1343_v59, 0.0  ;;  %2097 = vmatmul.bf16.vlgmr.msrb.gmra.mxu0 %v4193_v29  ;;  %v1577_v49 = vmax.f32 %v839_v4, 0.0 }
 0x2a2   : > { %2266 = vmatmul.bf16.vlgmr.msrb.gmra.mxu1 %v4196_v31  ;;  %2435 = vmatmul.bf16.vlgmr.msrb.gmra.mxu2 %v4201_v44  ;;  %v4592_v19 = vpack.c.bf16 %v1575_v26, %v1571_v1  ;;  %v1578_v41 = vmax.f32 %v1008_v2, 0.0 }
 0x2a3   : > { %2604 = vmatmul.bf16.vlgmr.msrb.gmra.mxu3 %v4203_v45  ;;  %v4595_v0 = vpack.c.bf16 %v1576_v14, %v1572_v33 }
 0x2a5   : > { %v1176_v42 = vpop.f32.mrf.mxu2 }
 0x2a6   : > { %v1345_v15 = vpop.f32.mrf.mxu3  ;;  %v840_v43 = vpop.f32.mrf.mxu0  ;;  %v1177_v45 = vadd.f32 %v1176_v42, %v4188_v20 }
 0x2a7   : > { %v841_v59 = vadd.f32 %v840_v43, %v4181_v11  ;;  %v1009_v29 = vpop.f32.mrf.mxu1  ;;  %v1346_v46 = vadd.f32 %v1345_v15, %v4191_v23 }
 0x2a8   : > { %v1010_v31 = vadd.f32 %v1009_v29, %v4183_v12  ;;  %v1579_v4 = vmax.f32 %v1177_v45, 0.0 }
 0x2a9   : > { %v1581_v44 = vmax.f32 %v841_v59, 0.0  ;;  %v1580_v2 = vmax.f32 %v1346_v46, 0.0 }
 0x2aa   : > { %v1582_v9 = vmax.f32 %v1010_v31, 0.0 }
 0x2ab   : > { %v4601_v40 = vpack.c.bf16 %v1581_v44, %v1577_v49 }
 0x2ac   : > { %v4604_v1 = vpack.c.bf16 %v1582_v9, %v1578_v41 }
 0x2ad   : > { %v1178_v24 = vpop.f32.mrf.mxu2 }
 0x2ae   : > { %v1179_v26 = vadd.f32 %v1178_v24, %v4188_v20  ;;  %v1347_v33 = vpop.f32.mrf.mxu3  ;;  %v843_v14 = vpop.f32.mrf.mxu0 }
 0x2af   : > { %v1348_v43 = vadd.f32 %v1347_v33, %v4191_v23  ;;  %v1012_v29 = vpop.f32.mrf.mxu1  ;;  %v844_v49 = vadd.f32 %v843_v14, %v4181_v11 }
 0x2b0   : > { %v1583_v59 = vmax.f32 %v1179_v26, 0.0  ;;  %v1013_v41 = vadd.f32 %v1012_v29, %v4183_v12 }
 0x2b1   : > { %v1584_v31 = vmax.f32 %v1348_v43, 0.0  ;;  %2102 = vmatmul.bf16.gmra.mxu0 %v4209_v60  ;;  %v1585_v24 = vmax.f32 %v844_v49, 0.0 }
 0x2b2   : > { %2271 = vmatmul.bf16.gmra.mxu1 %v4212_v62  ;;  %2440 = vmatmul.bf16.gmra.mxu2 %v4217_v13  ;;  %v4612_v42 = vpack.c.bf16 %v1583_v59, %v1579_v4  ;;  %v1586_v26 = vmax.f32 %v1013_v41, 0.0 }
 0x2b3   : > { %2609 = vmatmul.bf16.gmra.mxu3 %v4221_v16  ;;  %v4615_v15 = vpack.c.bf16 %v1584_v31, %v1580_v2 }
 0x2b5   : > { %v1181_v44 = vpop.f32.mrf.mxu2 }
 0x2b6   : > { %v1350_v9 = vpop.f32.mrf.mxu3  ;;  %v845_v45 = vpop.f32.mrf.mxu0  ;;  %v1182_v16 = vadd.f32 %v1181_v44, %v4188_v20 }
 0x2b7   : > { %v846_v46 = vadd.f32 %v845_v45, %v4181_v11  ;;  %v1014_v60 = vpop.f32.mrf.mxu1  ;;  %v1351_v14 = vadd.f32 %v1350_v9, %v4191_v23 }
 0x2b8   : > { %v1015_v62 = vadd.f32 %v1014_v60, %v4183_v12  ;;  %v1587_v49 = vmax.f32 %v1182_v16, 0.0 }
 0x2b9   : > { %v1589_v13 = vmax.f32 %v846_v46, 0.0  ;;  %v1588_v41 = vmax.f32 %v1351_v14, 0.0 }
 0x2ba   : > { %v1590_v33 = vmax.f32 %v1015_v62, 0.0 }
 0x2bb   : > { %v4621_v43 = vpack.c.bf16 %v1589_v13, %v1585_v24 }
 0x2bc   : > { %v4624_v4 = vpack.c.bf16 %v1590_v33, %v1586_v26 }
 0x2bd   : > { %v1183_v29 = vpop.f32.mrf.mxu2 }
 0x2be   : > { %v1184_v59 = vadd.f32 %v1183_v29, %v4188_v20  ;;  %v1352_v2 = vpop.f32.mrf.mxu3  ;;  %v848_v31 = vpop.f32.mrf.mxu0 }
 0x2bf   : > { %v1353_v45 = vadd.f32 %v1352_v2, %v4191_v23  ;;  %v1017_v60 = vpop.f32.mrf.mxu1  ;;  %v849_v24 = vadd.f32 %v848_v31, %v4181_v11 }
 0x2c0   : > { %v1591_v46 = vmax.f32 %v1184_v59, 0.0  ;;  %v1018_v26 = vadd.f32 %v1017_v60, %v4183_v12 }
 0x2c1   : > { %v1592_v62 = vmax.f32 %v1353_v45, 0.0  ;;  %2107 = vmatmul.bf16.gmra.mxu0 %v4229_v37  ;;  %v1593_v29 = vmax.f32 %v849_v24, 0.0 }
 0x2c2   : > { %2276 = vmatmul.bf16.gmra.mxu1 %v4232_v39  ;;  %2445 = vmatmul.bf16.gmra.mxu2 %v4237_v54  ;;  %v4632_v44 = vpack.c.bf16 %v1591_v46, %v1587_v49  ;;  %v1594_v59 = vmax.f32 %v1018_v26, 0.0 }
 0x2c3   : > { %2614 = vmatmul.bf16.gmra.mxu3 %v4239_v55  ;;  %v4635_v9 = vpack.c.bf16 %v1592_v62, %v1588_v41 }
 0x2c5   : > { %v1186_v13 = vpop.f32.mrf.mxu2 }
 0x2c6   : > { %v1355_v33 = vpop.f32.mrf.mxu3  ;;  %v850_v16 = vpop.f32.mrf.mxu0  ;;  %v1187_v55 = vadd.f32 %v1186_v13, %v4188_v20 }
 0x2c7   : > { %v851_v14 = vadd.f32 %v850_v16, %v4181_v11  ;;  %v1019_v37 = vpop.f32.mrf.mxu1  ;;  %v1356_v31 = vadd.f32 %v1355_v33, %v4191_v23 }
 0x2c8   : > { %v1020_v39 = vadd.f32 %v1019_v37, %v4183_v12  ;;  %v1595_v24 = vmax.f32 %v1187_v55, 0.0 }
 0x2c9   : > { %v1597_v54 = vmax.f32 %v851_v14, 0.0  ;;  %v1596_v26 = vmax.f32 %v1356_v31, 0.0 }
 0x2ca   : > { %v1598_v2 = vmax.f32 %v1020_v39, 0.0 }
 0x2cb   : > { %v4641_v45 = vpack.c.bf16 %v1597_v54, %v1593_v29 }
 0x2cc   : > { %v4644_v49 = vpack.c.bf16 %v1598_v2, %v1594_v59 }
 0x2cd   : > { %v1188_v60 = vpop.f32.mrf.mxu2 }
 0x2ce   : > { %v1189_v46 = vadd.f32 %v1188_v60, %v4188_v20  ;;  %v1357_v41 = vpop.f32.mrf.mxu3  ;;  %v853_v62 = vpop.f32.mrf.mxu0 }
 0x2cf   : > { %v1358_v16 = vadd.f32 %v1357_v41, %v4191_v23  ;;  %v1022_v37 = vpop.f32.mrf.mxu1  ;;  %v854_v29 = vadd.f32 %v853_v62, %v4181_v11 }
 0x2d0   : > { %v1599_v14 = vmax.f32 %v1189_v46, 0.0  ;;  %v1023_v59 = vadd.f32 %v1022_v37, %v4183_v12 }
 0x2d1   : > { %v1600_v39 = vmax.f32 %v1358_v16, 0.0  ;;  %2112 = vmatmul.bf16.gmra.mxu0 %v4245_v8  ;;  %v1601_v60 = vmax.f32 %v854_v29, 0.0 }
 0x2d2   : > { %2281 = vmatmul.bf16.gmra.mxu1 %v4248_v10  ;;  %2450 = vmatmul.bf16.gmra.mxu2 %v4253_v30  ;;  %v4652_v13 = vpack.c.bf16 %v1599_v14, %v1595_v24  ;;  %v1602_v46 = vmax.f32 %v1023_v59, 0.0 }
 0x2d3   : > { %2619 = vmatmul.bf16.gmra.mxu3 %v4255_v32  ;;  %v4655_v33 = vpack.c.bf16 %v1600_v39, %v1596_v26 }
 0x2d5   : > { %v1191_v54 = vpop.f32.mrf.mxu2 }
 0x2d6   : > { %v1360_v2 = vpop.f32.mrf.mxu3  ;;  %v855_v55 = vpop.f32.mrf.mxu0  ;;  %v1192_v32 = vadd.f32 %v1191_v54, %v4188_v20 }
 0x2d7   : > { %v856_v31 = vadd.f32 %v855_v55, %v4181_v11  ;;  %v1024_v8 = vpop.f32.mrf.mxu1  ;;  %v1361_v62 = vadd.f32 %v1360_v2, %v4191_v23 }
 0x2d8   : > { %v1025_v10 = vadd.f32 %v1024_v8, %v4183_v12  ;;  %v1603_v29 = vmax.f32 %v1192_v32, 0.0 }
 0x2d9   : > { %v1605_v30 = vmax.f32 %v856_v31, 0.0  ;;  %v1604_v59 = vmax.f32 %v1361_v62, 0.0 }
 0x2da   : > { %v1606_v41 = vmax.f32 %v1025_v10, 0.0 }
 0x2db   : > { %v4661_v16 = vpack.c.bf16 %v1605_v30, %v1601_v60 }
 0x2dc   : > { %v4664_v24 = vpack.c.bf16 %v1606_v41, %v1602_v46 }
 0x2dd   : > { %v1193_v37 = vpop.f32.mrf.mxu2 }
 0x2de   : > { %v1194_v14 = vadd.f32 %v1193_v37, %v4188_v20  ;;  %v1362_v26 = vpop.f32.mrf.mxu3  ;;  %v858_v39 = vpop.f32.mrf.mxu0 }
 0x2df   : > { %v1363_v55 = vadd.f32 %v1362_v26, %v4191_v23  ;;  %v1027_v8 = vpop.f32.mrf.mxu1  ;;  %v859_v60 = vadd.f32 %v858_v39, %v4181_v11 }
 0x2e0   : > { %v1607_v31 = vmax.f32 %v1194_v14, 0.0  ;;  %v1028_v46 = vadd.f32 %v1027_v8, %v4183_v12 }
 0x2e1   : > { %v1608_v10 = vmax.f32 %v1363_v55, 0.0  ;;  %2117 = vmatmul.bf16.gmra.mxu0 %v4261_v51  ;;  %v1609_v37 = vmax.f32 %v859_v60, 0.0 }
 0x2e2   : > { %2286 = vmatmul.bf16.gmra.mxu1 %v4264_v53  ;;  %2455 = vmatmul.bf16.gmra.mxu2 %v4269_v6  ;;  %v4672_v54 = vpack.c.bf16 %v1607_v31, %v1603_v29  ;;  %v1610_v14 = vmax.f32 %v1028_v46, 0.0 }
 0x2e3   : > { %2624 = vmatmul.bf16.gmra.mxu3 %v4271_v7  ;;  %v4675_v2 = vpack.c.bf16 %v1608_v10, %v1604_v59 }
 0x2e5   : > { %v1196_v30 = vpop.f32.mrf.mxu2 }
 0x2e6   : > { %v1365_v41 = vpop.f32.mrf.mxu3  ;;  %v860_v32 = vpop.f32.mrf.mxu0  ;;  %v1197_v7 = vadd.f32 %v1196_v30, %v4188_v20 }
 0x2e7   : > { %v861_v62 = vadd.f32 %v860_v32, %v4181_v11  ;;  %v1029_v51 = vpop.f32.mrf.mxu1  ;;  %v1366_v39 = vadd.f32 %v1365_v41, %v4191_v23 }
 0x2e8   : > { %v1030_v53 = vadd.f32 %v1029_v51, %v4183_v12  ;;  %v1611_v60 = vmax.f32 %v1197_v7, 0.0 }
 0x2e9   : > { %v1613_v6 = vmax.f32 %v861_v62, 0.0  ;;  %v1612_v46 = vmax.f32 %v1366_v39, 0.0 }
 0x2ea   : > { %v1614_v26 = vmax.f32 %v1030_v53, 0.0 }
 0x2eb   : > { %v4681_v55 = vpack.c.bf16 %v1613_v6, %v1609_v37 }
 0x2ec   : > { %v4684_v29 = vpack.c.bf16 %v1614_v26, %v1610_v14 }
 0x2ed   : > { %v1198_v8 = vpop.f32.mrf.mxu2 }
 0x2ee   : > { %v1199_v31 = vadd.f32 %v1198_v8, %v4188_v20  ;;  %v1367_v59 = vpop.f32.mrf.mxu3  ;;  %v863_v10 = vpop.f32.mrf.mxu0 }
 0x2ef   : > { %v1368_v32 = vadd.f32 %v1367_v59, %v4191_v23  ;;  %v1032_v51 = vpop.f32.mrf.mxu1  ;;  %v864_v37 = vadd.f32 %v863_v10, %v4181_v11 }
 0x2f0   : > { %v1615_v62 = vmax.f32 %v1199_v31, 0.0  ;;  %v1033_v14 = vadd.f32 %v1032_v51, %v4183_v12 }
 0x2f1   : > { %v1616_v53 = vmax.f32 %v1368_v32, 0.0  ;;  %2122 = vmatmul.bf16.gmra.mxu0 %v4277_v34  ;;  %v1617_v8 = vmax.f32 %v864_v37, 0.0 }
 0x2f2   : > { %2291 = vmatmul.bf16.gmra.mxu1 %v4280_v36  ;;  %2460 = vmatmul.bf16.gmra.mxu2 %v4285_v57  ;;  %v4692_v30 = vpack.c.bf16 %v1615_v62, %v1611_v60  ;;  %v1618_v31 = vmax.f32 %v1033_v14, 0.0 }
 0x2f3   : > { %2629 = vmatmul.bf16.gmra.mxu3 %v4289_v61  ;;  %v4695_v41 = vpack.c.bf16 %v1616_v53, %v1612_v46 }
 0x2f5   : > { %v1201_v6 = vpop.f32.mrf.mxu2 }
 0x2f6   : > { %v1370_v26 = vpop.f32.mrf.mxu3  ;;  %v865_v7 = vpop.f32.mrf.mxu0  ;;  %v1202_v61 = vadd.f32 %v1201_v6, %v4188_v20 }
 0x2f7   : > { %v866_v39 = vadd.f32 %v865_v7, %v4181_v11  ;;  %v1034_v34 = vpop.f32.mrf.mxu1  ;;  %v1371_v10 = vadd.f32 %v1370_v26, %v4191_v23 }
 0x2f8   : > { %v1035_v36 = vadd.f32 %v1034_v34, %v4183_v12  ;;  %v1619_v37 = vmax.f32 %v1202_v61, 0.0 }
 0x2f9   : > { %v1621_v57 = vmax.f32 %v866_v39, 0.0  ;;  %v1620_v14 = vmax.f32 %v1371_v10, 0.0 }
 0x2fa   : > { %v1622_v59 = vmax.f32 %v1035_v36, 0.0 }
 0x2fb   : > { %v4701_v32 = vpack.c.bf16 %v1621_v57, %v1617_v8 }
 0x2fc   : > { %v4704_v60 = vpack.c.bf16 %v1622_v59, %v1618_v31 }
 0x2fd   : > { %v1203_v51 = vpop.f32.mrf.mxu2 }
 0x2fe   : > { %v1204_v62 = vadd.f32 %v1203_v51, %v4188_v20  ;;  %v1372_v46 = vpop.f32.mrf.mxu3  ;;  %v868_v53 = vpop.f32.mrf.mxu0 }
 0x2ff   : > { %v1373_v7 = vadd.f32 %v1372_v46, %v4191_v23  ;;  %v1037_v34 = vpop.f32.mrf.mxu1  ;;  %v869_v8 = vadd.f32 %v868_v53, %v4181_v11 }
 0x300   : > { %v1623_v39 = vmax.f32 %v1204_v62, 0.0  ;;  %v1038_v31 = vadd.f32 %v1037_v34, %v4183_v12 }
 0x301   : > { %v1624_v36 = vmax.f32 %v1373_v7, 0.0  ;;  %2127 = vmatmul.bf16.gmra.mxu0 %v4297_v25  ;;  %v1625_v51 = vmax.f32 %v869_v8, 0.0 }
 0x302   : > { %2296 = vmatmul.bf16.gmra.mxu1 %v4300_v27  ;;  %2465 = vmatmul.bf16.gmra.mxu2 %v4305_v50  ;;  %v4712_v6 = vpack.c.bf16 %v1623_v39, %v1619_v37  ;;  %v1626_v62 = vmax.f32 %v1038_v31, 0.0 }
 0x303   : > { %2634 = vmatmul.bf16.gmra.mxu3 %v4307_v52  ;;  %v4715_v26 = vpack.c.bf16 %v1624_v36, %v1620_v14 }
 0x305   : > { %v1206_v57 = vpop.f32.mrf.mxu2 }
 0x306   : > { %v1375_v59 = vpop.f32.mrf.mxu3  ;;  %v870_v61 = vpop.f32.mrf.mxu0  ;;  %v1207_v52 = vadd.f32 %v1206_v57, %v4188_v20 }
 0x307   : > { %v871_v10 = vadd.f32 %v870_v61, %v4181_v11  ;;  %v1039_v25 = vpop.f32.mrf.mxu1  ;;  %v1376_v53 = vadd.f32 %v1375_v59, %v4191_v23 }
 0x308   : > { %v1040_v27 = vadd.f32 %v1039_v25, %v4183_v12  ;;  %v1627_v8 = vmax.f32 %v1207_v52, 0.0 }
 0x309   : > { %v1629_v50 = vmax.f32 %v871_v10, 0.0  ;;  %v1628_v31 = vmax.f32 %v1376_v53, 0.0 }
 0x30a   : > { %v1630_v46 = vmax.f32 %v1040_v27, 0.0 }
 0x30b   : > { %v4721_v7 = vpack.c.bf16 %v1629_v50, %v1625_v51 }
 0x30c   : > { %v4724_v37 = vpack.c.bf16 %v1630_v46, %v1626_v62 }
 0x30d   : > { %v1208_v34 = vpop.f32.mrf.mxu2 }
 0x30e   : > { %v1209_v39 = vadd.f32 %v1208_v34, %v4188_v20  ;;  %v1377_v14 = vpop.f32.mrf.mxu3  ;;  %v873_v36 = vpop.f32.mrf.mxu0 }
 0x30f   : > { %v1378_v61 = vadd.f32 %v1377_v14, %v4191_v23  ;;  %v1042_v25 = vpop.f32.mrf.mxu1  ;;  %v874_v51 = vadd.f32 %v873_v36, %v4181_v11 }
 0x310   : > { %v1631_v10 = vmax.f32 %v1209_v39, 0.0  ;;  %v1043_v62 = vadd.f32 %v1042_v25, %v4183_v12 }
 0x311   : > { %v1632_v27 = vmax.f32 %v1378_v61, 0.0  ;;  %2132 = vmatmul.bf16.gmra.mxu0 %v4313_v18  ;;  %v1633_v34 = vmax.f32 %v874_v51, 0.0 }
 0x312   : > { %2301 = vmatmul.bf16.gmra.mxu1 %v4316_v21  ;;  %2470 = vmatmul.bf16.gmra.mxu2 %v4321_v47  ;;  %v4732_v57 = vpack.c.bf16 %v1631_v10, %v1627_v8  ;;  %v1634_v39 = vmax.f32 %v1043_v62, 0.0 }
 0x313   : > { %2639 = vmatmul.bf16.gmra.mxu3 %v4323_v48  ;;  %v4735_v59 = vpack.c.bf16 %v1632_v27, %v1628_v31 }
 0x315   : > { %v1211_v50 = vpop.f32.mrf.mxu2 }
 0x316   : > { %v1380_v46 = vpop.f32.mrf.mxu3  ;;  %v875_v52 = vpop.f32.mrf.mxu0  ;;  %v1212_v48 = vadd.f32 %v1211_v50, %v4188_v20 }
 0x317   : > { %v876_v53 = vadd.f32 %v875_v52, %v4181_v11  ;;  %v1044_v18 = vpop.f32.mrf.mxu1  ;;  %v1381_v36 = vadd.f32 %v1380_v46, %v4191_v23 }
 0x318   : > { %v1045_v21 = vadd.f32 %v1044_v18, %v4183_v12  ;;  %v1635_v51 = vmax.f32 %v1212_v48, 0.0 }
 0x319   : > { %v1637_v47 = vmax.f32 %v876_v53, 0.0  ;;  %v1636_v62 = vmax.f32 %v1381_v36, 0.0 }
 0x31a   : > { %v1638_v14 = vmax.f32 %v1045_v21, 0.0 }
 0x31b   : > { %v4741_v61 = vpack.c.bf16 %v1637_v47, %v1633_v34  ;;  %v1641_v47 = vld [vmem:[#allocation10] sm:$0xff] }
 0x31c   : > { %v4744_v8 = vpack.c.bf16 %v1638_v14, %v1634_v39 }
 0x31d   : > { %v1213_v25 = vpop.f32.mrf.mxu2 }
 0x31e   : > { %v1214_v10 = vadd.f32 %v1213_v25, %v4188_v20  ;;  %v1382_v31 = vpop.f32.mrf.mxu3  ;;  %v2098_v11 = vpop.f32.mrf.mxu0 }
 0x31f   : > { %v1383_v27 = vadd.f32 %v1382_v31, %v4191_v23  ;;  %v2267_v12 = vpop.f32.mrf.mxu1 }
 0x320   : > { %v1639_v52 = vmax.f32 %v1214_v10, 0.0  ;;  %v2268_v46 = vadd.f32 %v2267_v12, %v2098_v11  ;;  %v1642_v10 = vld [vmem:[#allocation10 + $0x8] sm:$0xff] }
 0x321   : > { %v1640_v53 = vmax.f32 %v1383_v27, 0.0  ;;  %2137 = vmatmul.bf16.gmra.mxu0 %v4329_v17  ;;  %v5012_v27 = vld [vmem:[#allocation19_spill] sm:$0xff]  ;;  %v5013_v12 = vld [vmem:[#allocation20_spill] sm:$0xff] }
 0x322   : > { %2306 = vmatmul.bf16.gmra.mxu1 %v4332_v22  ;;  %2475 = vmatmul.bf16.gmra.mxu2 %v4337_v56  ;;  %v4752_v50 = vpack.c.bf16 %v1639_v52, %v1635_v51 }
 0x323   : > { %2644 = vmatmul.bf16.gmra.mxu3 %v4339_v58  ;;  %v4755_v20 = vpack.c.bf16 %v1640_v53, %v1636_v62 }
 0x325   : > { %v2436_v18 = vpop.f32.mrf.mxu2 }
 0x326   : > { %v2437_v23 = vadd.f32 %v2436_v18, %v2268_v46  ;;  %v2605_v21 = vpop.f32.mrf.mxu3  ;;  %v2100_v34 = vpop.f32.mrf.mxu0  ;;  %v1643_v18 = vld [vmem:[#allocation10 + $0x10] sm:$0xff] }
 0x327   : > { %v2269_v39 = vpop.f32.mrf.mxu1 }
 0x328   : > { %v2606_v14 = vadd.f32 %v2605_v21, %v2437_v23  ;;  %v2270_v17 = vadd.f32 %v2269_v39, %v2100_v34 }
 0x32a   : > { %v2765_v48 = vadd.f32 %v2606_v14, %v1641_v47 }
 0x32c   : > { %2829 = vst [vmem:[#allocation10] sm:$0xff] %v2765_v48  ;;  %v1644_v48 = vld [vmem:[#allocation10 + $0x18] sm:$0xff] }
 0x32d   : > { %v2438_v22 = vpop.f32.mrf.mxu2 }
 0x32e   : > { %v2439_v36 = vadd.f32 %v2438_v22, %v2270_v17  ;;  %v2607_v56 = vpop.f32.mrf.mxu3  ;;  %v2103_v25 = vpop.f32.mrf.mxu0 }
 0x32f   : > { %v2272_v31 = vpop.f32.mrf.mxu1 }
 0x330   : > { %v2608_v58 = vadd.f32 %v2607_v56, %v2439_v36  ;;  %v2273_v51 = vadd.f32 %v2272_v31, %v2103_v25  ;;  %v5014_v36 = vld [vmem:[#allocation21_spill] sm:$0xff]  ;;  %v5015_v25 = vld [vmem:[#allocation22_spill] sm:$0xff]  ;;  %v5017_v31 = vld [vmem:[#allocation24_spill] sm:$0xff] }
 0x331   : > { %2142 = vmatmul.bf16.gmra.mxu0 %v4345_v28 }
 0x332   : > { %v2766_v11 = vadd.f32 %v2608_v58, %v1642_v10  ;;  %2311 = vmatmul.bf16.gmra.mxu1 %v4348_v35  ;;  %2480 = vmatmul.bf16.gmra.mxu2 %v5012_v27  ;;  %v5016_v10 = vld [vmem:[#allocation23_spill] sm:$0xff] }
 0x333   : > { %2649 = vmatmul.bf16.gmra.mxu3 %v5013_v12 }
 0x334   : > { %2830 = vst [vmem:[#allocation10 + $0x8] sm:$0xff] %v2766_v11 }
 0x335   : > { %v2441_v52 = vpop.f32.mrf.mxu2 }
 0x336   : > { %v2442_v62 = vadd.f32 %v2441_v52, %v2273_v51  ;;  %v2610_v53 = vpop.f32.mrf.mxu3  ;;  %v2105_v46 = vpop.f32.mrf.mxu0  ;;  %v1645_v52 = vld [vmem:[#allocation10 + $0x20] sm:$0xff] }
 0x337   : > { %v2274_v23 = vpop.f32.mrf.mxu1 }
 0x338   : > { %v2611_v21 = vadd.f32 %v2610_v53, %v2442_v62  ;;  %v2275_v47 = vadd.f32 %v2274_v23, %v2105_v46 }
 0x33a   : > { %v2767_v34 = vadd.f32 %v2611_v21, %v1643_v18 }
 0x33c   : > { %2831 = vst [vmem:[#allocation10 + $0x10] sm:$0xff] %v2767_v34 }
 0x33d   : > { %v2443_v28 = vpop.f32.mrf.mxu2 }
 0x33e   : > { %v2444_v39 = vadd.f32 %v2443_v28, %v2275_v47  ;;  %v2612_v14 = vpop.f32.mrf.mxu3  ;;  %v2108_v35 = vpop.f32.mrf.mxu0  ;;  %v1646_v28 = vld [vmem:[#allocation10 + $0x28] sm:$0xff] }
 0x33f   : > { %v2277_v17 = vpop.f32.mrf.mxu1 }
 0x340   : > { %v2613_v22 = vadd.f32 %v2612_v14, %v2444_v39  ;;  %v2278_v58 = vadd.f32 %v2277_v17, %v2108_v35  ;;  %v5019_v17 = vld [vmem:[#allocation26_spill] sm:$0xff] }
 0x341   : > { %2147 = vmatmul.bf16.gmra.mxu0 %v5014_v36  ;;  %v5021_v36 = vld [vmem:[#allocation28_spill] sm:$0xff] }
 0x342   : > { %v2768_v56 = vadd.f32 %v2613_v22, %v1644_v48  ;;  %2316 = vmatmul.bf16.gmra.mxu1 %v5015_v25  ;;  %2485 = vmatmul.bf16.gmra.mxu2 %v5016_v10  ;;  %v5018_v48 = vld [vmem:[#allocation25_spill] sm:$0xff]  ;;  %v5020_v22 = vld [vmem:[#allocation27_spill] sm:$0xff] }
 0x343   : > { %2654 = vmatmul.bf16.gmra.mxu3 %v5017_v31 }
 0x344   : > { %2832 = vst [vmem:[#allocation10 + $0x18] sm:$0xff] %v2768_v56 }
 0x345   : > { %v2446_v11 = vpop.f32.mrf.mxu2 }
 0x346   : > { %v2447_v27 = vadd.f32 %v2446_v11, %v2278_v58  ;;  %v2615_v12 = vpop.f32.mrf.mxu3  ;;  %v2110_v51 = vpop.f32.mrf.mxu0  ;;  %v1647_v11 = vld [vmem:[#allocation10 + $0x30] sm:$0xff] }
 0x347   : > { %v2279_v62 = vpop.f32.mrf.mxu1 }
 0x348   : > { %v2616_v53 = vadd.f32 %v2615_v12, %v2447_v27  ;;  %v2280_v18 = vadd.f32 %v2279_v62, %v2110_v51 }
 0x34a   : > { %v2769_v46 = vadd.f32 %v2616_v53, %v1645_v52 }
 0x34c   : > { %2833 = vst [vmem:[#allocation10 + $0x20] sm:$0xff] %v2769_v46 }
 0x34d   : > { %v2448_v23 = vpop.f32.mrf.mxu2 }
 0x34e   : > { %v2449_v21 = vadd.f32 %v2448_v23, %v2280_v18  ;;  %v2617_v34 = vpop.f32.mrf.mxu3  ;;  %v2113_v47 = vpop.f32.mrf.mxu0  ;;  %v1648_v23 = vld [vmem:[#allocation10 + $0x38] sm:$0xff] }
 0x34f   : > { %v2282_v39 = vpop.f32.mrf.mxu1 }
 0x350   : > { %v2618_v14 = vadd.f32 %v2617_v34, %v2449_v21  ;;  %v2283_v56 = vadd.f32 %v2282_v39, %v2113_v47  ;;  %v5023_v39 = vld [vmem:[#allocation30_spill] sm:$0xff] }
 0x351   : > { %2152 = vmatmul.bf16.gmra.mxu0 %v5018_v48  ;;  %v5025_v48 = vld [vmem:[#allocation32_spill] sm:$0xff] }
 0x352   : > { %v2770_v35 = vadd.f32 %v2618_v14, %v1646_v28  ;;  %2321 = vmatmul.bf16.gmra.mxu1 %v5019_v17  ;;  %2490 = vmatmul.bf16.gmra.mxu2 %v5020_v22  ;;  %v5022_v28 = vld [vmem:[#allocation29_spill] sm:$0xff]  ;;  %v5024_v14 = vld [vmem:[#allocation31_spill] sm:$0xff] }
 0x353   : > { %2659 = vmatmul.bf16.gmra.mxu3 %v5021_v36 }
 0x354   : > { %2834 = vst [vmem:[#allocation10 + $0x28] sm:$0xff] %v2770_v35 }
 0x355   : > { %v2451_v25 = vpop.f32.mrf.mxu2 }
 0x356   : > { %v2452_v10 = vadd.f32 %v2451_v25, %v2283_v56  ;;  %v2620_v31 = vpop.f32.mrf.mxu3  ;;  %v2115_v58 = vpop.f32.mrf.mxu0  ;;  %v1649_v25 = vld [vmem:[#allocation10 + $0x40] sm:$0xff] }
 0x357   : > { %v2284_v27 = vpop.f32.mrf.mxu1 }
 0x358   : > { %v2621_v12 = vadd.f32 %v2620_v31, %v2452_v10  ;;  %v2285_v52 = vadd.f32 %v2284_v27, %v2115_v58 }
 0x35a   : > { %v2771_v51 = vadd.f32 %v2621_v12, %v1647_v11 }
 0x35c   : > { %2835 = vst [vmem:[#allocation10 + $0x30] sm:$0xff] %v2771_v51 }
 0x35d   : > { %v2453_v62 = vpop.f32.mrf.mxu2 }
 0x35e   : > { %v2454_v53 = vadd.f32 %v2453_v62, %v2285_v52  ;;  %v2622_v46 = vpop.f32.mrf.mxu3  ;;  %v2118_v18 = vpop.f32.mrf.mxu0  ;;  %v1650_v62 = vld [vmem:[#allocation10 + $0x48] sm:$0xff] }
 0x35f   : > { %v2287_v21 = vpop.f32.mrf.mxu1 }
 0x360   : > { %v2623_v34 = vadd.f32 %v2622_v46, %v2454_v53  ;;  %v2288_v35 = vadd.f32 %v2287_v21, %v2118_v18  ;;  %v5027_v21 = vld [vmem:[#allocation34_spill] sm:$0xff] }
 0x361   : > { %2157 = vmatmul.bf16.gmra.mxu0 %v5022_v28  ;;  %v5029_v28 = vld [vmem:[#allocation36_spill] sm:$0xff] }
 0x362   : > { %v2772_v47 = vadd.f32 %v2623_v34, %v1648_v23  ;;  %2326 = vmatmul.bf16.gmra.mxu1 %v5023_v39  ;;  %2495 = vmatmul.bf16.gmra.mxu2 %v5024_v14  ;;  %v5026_v23 = vld [vmem:[#allocation33_spill] sm:$0xff]  ;;  %v5028_v34 = vld [vmem:[#allocation35_spill] sm:$0xff] }
 0x363   : > { %2664 = vmatmul.bf16.gmra.mxu3 %v5025_v48 }
 0x364   : > { %2836 = vst [vmem:[#allocation10 + $0x38] sm:$0xff] %v2772_v47 }
 0x365   : > { %v2456_v17 = vpop.f32.mrf.mxu2 }
 0x366   : > { %v2457_v22 = vadd.f32 %v2456_v17, %v2288_v35  ;;  %v2625_v36 = vpop.f32.mrf.mxu3  ;;  %v2120_v56 = vpop.f32.mrf.mxu0  ;;  %v1651_v17 = vld [vmem:[#allocation10 + $0x50] sm:$0xff] }
 0x367   : > { %v2289_v10 = vpop.f32.mrf.mxu1 }
 0x368   : > { %v2626_v31 = vadd.f32 %v2625_v36, %v2457_v22  ;;  %v2290_v11 = vadd.f32 %v2289_v10, %v2120_v56 }
 0x36a   : > { %v2773_v58 = vadd.f32 %v2626_v31, %v1649_v25 }
 0x36c   : > { %2837 = vst [vmem:[#allocation10 + $0x40] sm:$0xff] %v2773_v58 }
 0x36d   : > { %v2458_v27 = vpop.f32.mrf.mxu2 }
 0x36e   : > { %v2459_v12 = vadd.f32 %v2458_v27, %v2290_v11  ;;  %v2627_v51 = vpop.f32.mrf.mxu3  ;;  %v2123_v52 = vpop.f32.mrf.mxu0  ;;  %v1652_v27 = vld [vmem:[#allocation10 + $0x58] sm:$0xff] }
 0x36f   : > { %v2292_v53 = vpop.f32.mrf.mxu1 }
 0x370   : > { %v2628_v46 = vadd.f32 %v2627_v51, %v2459_v12  ;;  %v2293_v47 = vadd.f32 %v2292_v53, %v2123_v52  ;;  %v5031_v53 = vld [vmem:[#allocation38_spill] sm:$0xff] }
 0x371   : > { %2162 = vmatmul.bf16.gmra.mxu0 %v5026_v23  ;;  %v5033_v23 = vld [vmem:[#allocation40_spill] sm:$0xff] }
 0x372   : > { %v2774_v18 = vadd.f32 %v2628_v46, %v1650_v62  ;;  %2331 = vmatmul.bf16.gmra.mxu1 %v5027_v21  ;;  %2500 = vmatmul.bf16.gmra.mxu2 %v5028_v34  ;;  %v5030_v62 = vld [vmem:[#allocation37_spill] sm:$0xff]  ;;  %v5032_v46 = vld [vmem:[#allocation39_spill] sm:$0xff] }
 0x373   : > { %2669 = vmatmul.bf16.gmra.mxu3 %v5029_v28 }
 0x374   : > { %2838 = vst [vmem:[#allocation10 + $0x48] sm:$0xff] %v2774_v18 }
 0x375   : > { %v2461_v39 = vpop.f32.mrf.mxu2 }
 0x376   : > { %v2462_v14 = vadd.f32 %v2461_v39, %v2293_v47  ;;  %v2630_v48 = vpop.f32.mrf.mxu3  ;;  %v2125_v35 = vpop.f32.mrf.mxu0  ;;  %v1653_v39 = vld [vmem:[#allocation10 + $0x60] sm:$0xff] }
 0x377   : > { %v2294_v22 = vpop.f32.mrf.mxu1 }
 0x378   : > { %v2631_v36 = vadd.f32 %v2630_v48, %v2462_v14  ;;  %v2295_v25 = vadd.f32 %v2294_v22, %v2125_v35 }
 0x37a   : > { %v2775_v56 = vadd.f32 %v2631_v36, %v1651_v17 }
 0x37c   : > { %2839 = vst [vmem:[#allocation10 + $0x50] sm:$0xff] %v2775_v56 }
 0x37d   : > { %v2463_v10 = vpop.f32.mrf.mxu2 }
 0x37e   : > { %v2464_v31 = vadd.f32 %v2463_v10, %v2295_v25  ;;  %v2632_v58 = vpop.f32.mrf.mxu3  ;;  %v2128_v11 = vpop.f32.mrf.mxu0  ;;  %v1654_v10 = vld [vmem:[#allocation10 + $0x68] sm:$0xff] }
 0x37f   : > { %v2297_v12 = vpop.f32.mrf.mxu1 }
 0x380   : > { %v2633_v51 = vadd.f32 %v2632_v58, %v2464_v31  ;;  %v2298_v18 = vadd.f32 %v2297_v12, %v2128_v11  ;;  %v5035_v12 = vld [vmem:[#allocation42_spill] sm:$0xff] }
 0x381   : > { %2167 = vmatmul.bf16.gmra.mxu0 %v5030_v62  ;;  %v5037_v62 = vld [vmem:[#allocation44_spill] sm:$0xff] }
 0x382   : > { %v2776_v52 = vadd.f32 %v2633_v51, %v1652_v27  ;;  %2336 = vmatmul.bf16.gmra.mxu1 %v5031_v53  ;;  %2505 = vmatmul.bf16.gmra.mxu2 %v5032_v46  ;;  %v5034_v27 = vld [vmem:[#allocation41_spill] sm:$0xff]  ;;  %v5036_v51 = vld [vmem:[#allocation43_spill] sm:$0xff] }
 0x383   : > { %2674 = vmatmul.bf16.gmra.mxu3 %v5033_v23 }
 0x384   : > { %2840 = vst [vmem:[#allocation10 + $0x58] sm:$0xff] %v2776_v52 }
 0x385   : > { %v2466_v21 = vpop.f32.mrf.mxu2 }
 0x386   : > { %v2467_v34 = vadd.f32 %v2466_v21, %v2298_v18  ;;  %v2635_v28 = vpop.f32.mrf.mxu3  ;;  %v2130_v47 = vpop.f32.mrf.mxu0  ;;  %v1655_v21 = vld [vmem:[#allocation10 + $0x70] sm:$0xff] }
 0x387   : > { %v2299_v14 = vpop.f32.mrf.mxu1 }
 0x388   : > { %v2636_v48 = vadd.f32 %v2635_v28, %v2467_v34  ;;  %v2300_v17 = vadd.f32 %v2299_v14, %v2130_v47 }
 0x38a   : > { %v2777_v35 = vadd.f32 %v2636_v48, %v1653_v39 }
 0x38c   : > { %2841 = vst [vmem:[#allocation10 + $0x60] sm:$0xff] %v2777_v35 }
 0x38d   : > { %v2468_v22 = vpop.f32.mrf.mxu2 }
 0x38e   : > { %v2469_v36 = vadd.f32 %v2468_v22, %v2300_v17  ;;  %v2637_v56 = vpop.f32.mrf.mxu3  ;;  %v2133_v25 = vpop.f32.mrf.mxu0  ;;  %v1656_v22 = vld [vmem:[#allocation10 + $0x78] sm:$0xff] }
 0x38f   : > { %v2302_v31 = vpop.f32.mrf.mxu1 }
 0x390   : > { %v2638_v58 = vadd.f32 %v2637_v56, %v2469_v36  ;;  %v2303_v52 = vadd.f32 %v2302_v31, %v2133_v25  ;;  %v5039_v31 = vld [vmem:[#allocation46_spill] sm:$0xff] }
 0x391   : > { %2172 = vmatmul.bf16.gmra.mxu0 %v5034_v27  ;;  %v5041_v27 = vld [vmem:[#allocation48_spill] sm:$0xff] }
 0x392   : > { %v2778_v11 = vadd.f32 %v2638_v58, %v1654_v10  ;;  %2341 = vmatmul.bf16.gmra.mxu1 %v5035_v12  ;;  %2510 = vmatmul.bf16.gmra.mxu2 %v5036_v51  ;;  %v5038_v10 = vld [vmem:[#allocation45_spill] sm:$0xff]  ;;  %v5040_v58 = vld [vmem:[#allocation47_spill] sm:$0xff] }
 0x393   : > { %2679 = vmatmul.bf16.gmra.mxu3 %v5037_v62 }
 0x394   : > { %2842 = vst [vmem:[#allocation10 + $0x68] sm:$0xff] %v2778_v11 }
 0x395   : > { %v2471_v53 = vpop.f32.mrf.mxu2 }
 0x396   : > { %v2472_v46 = vadd.f32 %v2471_v53, %v2303_v52  ;;  %v2640_v23 = vpop.f32.mrf.mxu3  ;;  %v2135_v18 = vpop.f32.mrf.mxu0  ;;  %v1657_v53 = vld [vmem:[#allocation10 + $0x80] sm:$0xff] }
 0x397   : > { %v2304_v34 = vpop.f32.mrf.mxu1 }
 0x398   : > { %v2641_v28 = vadd.f32 %v2640_v23, %v2472_v46  ;;  %v2305_v39 = vadd.f32 %v2304_v34, %v2135_v18 }
 0x39a   : > { %v2779_v47 = vadd.f32 %v2641_v28, %v1655_v21 }
 0x39c   : > { %2843 = vst [vmem:[#allocation10 + $0x70] sm:$0xff] %v2779_v47 }
 0x39d   : > { %v2473_v14 = vpop.f32.mrf.mxu2 }
 0x39e   : > { %v2474_v48 = vadd.f32 %v2473_v14, %v2305_v39  ;;  %v2642_v35 = vpop.f32.mrf.mxu3  ;;  %v2138_v17 = vpop.f32.mrf.mxu0  ;;  %v1658_v14 = vld [vmem:[#allocation10 + $0x88] sm:$0xff] }
 0x39f   : > { %v2307_v36 = vpop.f32.mrf.mxu1 }
 0x3a0   : > { %v2643_v56 = vadd.f32 %v2642_v35, %v2474_v48  ;;  %v2308_v11 = vadd.f32 %v2307_v36, %v2138_v17  ;;  %v5043_v36 = vld [vmem:[#allocation50_spill] sm:$0xff] }
 0x3a1   : > { %2177 = vmatmul.bf16.gmra.mxu0 %v5038_v10  ;;  %v5045_v10 = vld [vmem:[#allocation52_spill] sm:$0xff] }
 0x3a2   : > { %v2780_v25 = vadd.f32 %v2643_v56, %v1656_v22  ;;  %2346 = vmatmul.bf16.gmra.mxu1 %v5039_v31  ;;  %2515 = vmatmul.bf16.gmra.mxu2 %v5040_v58  ;;  %v5042_v22 = vld [vmem:[#allocation49_spill] sm:$0xff]  ;;  %v5044_v56 = vld [vmem:[#allocation51_spill] sm:$0xff] }
 0x3a3   : > { %2684 = vmatmul.bf16.gmra.mxu3 %v5041_v27 }
 0x3a4   : > { %2844 = vst [vmem:[#allocation10 + $0x78] sm:$0xff] %v2780_v25 }
 0x3a5   : > { %v2476_v12 = vpop.f32.mrf.mxu2 }
 0x3a6   : > { %v2477_v51 = vadd.f32 %v2476_v12, %v2308_v11  ;;  %v2645_v62 = vpop.f32.mrf.mxu3  ;;  %v2140_v52 = vpop.f32.mrf.mxu0  ;;  %v1659_v12 = vld [vmem:[#allocation10 + $0x90] sm:$0xff] }
 0x3a7   : > { %v2309_v46 = vpop.f32.mrf.mxu1 }
 0x3a8   : > { %v2646_v23 = vadd.f32 %v2645_v62, %v2477_v51  ;;  %v2310_v21 = vadd.f32 %v2309_v46, %v2140_v52 }
 0x3aa   : > { %v2781_v18 = vadd.f32 %v2646_v23, %v1657_v53 }
 0x3ac   : > { %2845 = vst [vmem:[#allocation10 + $0x80] sm:$0xff] %v2781_v18 }
 0x3ad   : > { %v2478_v34 = vpop.f32.mrf.mxu2 }
 0x3ae   : > { %v2479_v28 = vadd.f32 %v2478_v34, %v2310_v21  ;;  %v2647_v47 = vpop.f32.mrf.mxu3  ;;  %v2143_v39 = vpop.f32.mrf.mxu0  ;;  %v1660_v34 = vld [vmem:[#allocation10 + $0x98] sm:$0xff] }
 0x3af   : > { %v2312_v48 = vpop.f32.mrf.mxu1 }
 0x3b0   : > { %v2648_v35 = vadd.f32 %v2647_v47, %v2479_v28  ;;  %v2313_v25 = vadd.f32 %v2312_v48, %v2143_v39  ;;  %v5047_v48 = vld [vmem:[#allocation54_spill] sm:$0xff] }
 0x3b1   : > { %2182 = vmatmul.bf16.gmra.mxu0 %v5042_v22  ;;  %v5049_v22 = vld [vmem:[#allocation56_spill] sm:$0xff] }
 0x3b2   : > { %v2782_v17 = vadd.f32 %v2648_v35, %v1658_v14  ;;  %2351 = vmatmul.bf16.gmra.mxu1 %v5043_v36  ;;  %2520 = vmatmul.bf16.gmra.mxu2 %v5044_v56  ;;  %v5046_v14 = vld [vmem:[#allocation53_spill] sm:$0xff]  ;;  %v5048_v35 = vld [vmem:[#allocation55_spill] sm:$0xff] }
 0x3b3   : > { %2689 = vmatmul.bf16.gmra.mxu3 %v5045_v10 }
 0x3b4   : > { %2846 = vst [vmem:[#allocation10 + $0x88] sm:$0xff] %v2782_v17 }
 0x3b5   : > { %v2481_v31 = vpop.f32.mrf.mxu2 }
 0x3b6   : > { %v2482_v58 = vadd.f32 %v2481_v31, %v2313_v25  ;;  %v2650_v27 = vpop.f32.mrf.mxu3  ;;  %v2145_v11 = vpop.f32.mrf.mxu0  ;;  %v1661_v31 = vld [vmem:[#allocation10 + $0xa0] sm:$0xff] }
 0x3b7   : > { %v2314_v51 = vpop.f32.mrf.mxu1 }
 0x3b8   : > { %v2651_v62 = vadd.f32 %v2650_v27, %v2482_v58  ;;  %v2315_v53 = vadd.f32 %v2314_v51, %v2145_v11 }
 0x3ba   : > { %v2783_v52 = vadd.f32 %v2651_v62, %v1659_v12 }
 0x3bc   : > { %2847 = vst [vmem:[#allocation10 + $0x90] sm:$0xff] %v2783_v52 }
 0x3bd   : > { %v2483_v46 = vpop.f32.mrf.mxu2 }
 0x3be   : > { %v2484_v23 = vadd.f32 %v2483_v46, %v2315_v53  ;;  %v2652_v18 = vpop.f32.mrf.mxu3  ;;  %v2148_v21 = vpop.f32.mrf.mxu0  ;;  %v1662_v46 = vld [vmem:[#allocation10 + $0xa8] sm:$0xff] }
 0x3bf   : > { %v2317_v28 = vpop.f32.mrf.mxu1 }
 0x3c0   : > { %v2653_v47 = vadd.f32 %v2652_v18, %v2484_v23  ;;  %v2318_v17 = vadd.f32 %v2317_v28, %v2148_v21  ;;  %v5051_v28 = vld [vmem:[#allocation58_spill] sm:$0xff] }
 0x3c1   : > { %2187 = vmatmul.bf16.gmra.mxu0 %v5046_v14  ;;  %v5053_v14 = vld [vmem:[#allocation60_spill] sm:$0xff] }
 0x3c2   : > { %v2784_v39 = vadd.f32 %v2653_v47, %v1660_v34  ;;  %2356 = vmatmul.bf16.gmra.mxu1 %v5047_v48  ;;  %2525 = vmatmul.bf16.gmra.mxu2 %v5048_v35  ;;  %v5050_v34 = vld [vmem:[#allocation57_spill] sm:$0xff]  ;;  %v5052_v47 = vld [vmem:[#allocation59_spill] sm:$0xff] }
 0x3c3   : > { %2694 = vmatmul.bf16.gmra.mxu3 %v5049_v22 }
 0x3c4   : > { %2848 = vst [vmem:[#allocation10 + $0x98] sm:$0xff] %v2784_v39 }
 0x3c5   : > { %v2486_v36 = vpop.f32.mrf.mxu2 }
 0x3c6   : > { %v2487_v56 = vadd.f32 %v2486_v36, %v2318_v17  ;;  %v2655_v10 = vpop.f32.mrf.mxu3  ;;  %v2150_v25 = vpop.f32.mrf.mxu0  ;;  %v1663_v36 = vld [vmem:[#allocation10 + $0xb0] sm:$0xff] }
 0x3c7   : > { %v2319_v58 = vpop.f32.mrf.mxu1 }
 0x3c8   : > { %v2656_v27 = vadd.f32 %v2655_v10, %v2487_v56  ;;  %v2320_v12 = vadd.f32 %v2319_v58, %v2150_v25 }
 0x3ca   : > { %v2785_v11 = vadd.f32 %v2656_v27, %v1661_v31 }
 0x3cc   : > { %2849 = vst [vmem:[#allocation10 + $0xa0] sm:$0xff] %v2785_v11 }
 0x3cd   : > { %v2488_v51 = vpop.f32.mrf.mxu2 }
 0x3ce   : > { %v2489_v62 = vadd.f32 %v2488_v51, %v2320_v12  ;;  %v2657_v52 = vpop.f32.mrf.mxu3  ;;  %v2153_v53 = vpop.f32.mrf.mxu0  ;;  %v1664_v51 = vld [vmem:[#allocation10 + $0xb8] sm:$0xff] }
 0x3cf   : > { %v2322_v23 = vpop.f32.mrf.mxu1 }
 0x3d0   : > { %v2658_v18 = vadd.f32 %v2657_v52, %v2489_v62  ;;  %v2323_v39 = vadd.f32 %v2322_v23, %v2153_v53  ;;  %v5055_v23 = vld [vmem:[#allocation62_spill] sm:$0xff] }
 0x3d1   : > { %2192 = vmatmul.bf16.gmra.mxu0 %v5050_v34  ;;  %v5057_v34 = vld [vmem:[#allocation64_spill] sm:$0xff] }
 0x3d2   : > { %v2786_v21 = vadd.f32 %v2658_v18, %v1662_v46  ;;  %2361 = vmatmul.bf16.gmra.mxu1 %v5051_v28  ;;  %2530 = vmatmul.bf16.gmra.mxu2 %v5052_v47  ;;  %v5054_v46 = vld [vmem:[#allocation61_spill] sm:$0xff]  ;;  %v5056_v18 = vld [vmem:[#allocation63_spill] sm:$0xff] }
 0x3d3   : > { %2699 = vmatmul.bf16.gmra.mxu3 %v5053_v14 }
 0x3d4   : > { %2850 = vst [vmem:[#allocation10 + $0xa8] sm:$0xff] %v2786_v21 }
 0x3d5   : > { %v2491_v48 = vpop.f32.mrf.mxu2 }
 0x3d6   : > { %v2492_v35 = vadd.f32 %v2491_v48, %v2323_v39  ;;  %v2660_v22 = vpop.f32.mrf.mxu3  ;;  %v2155_v17 = vpop.f32.mrf.mxu0  ;;  %v1665_v48 = vld [vmem:[#allocation10 + $0xc0] sm:$0xff] }
 0x3d7   : > { %v2324_v56 = vpop.f32.mrf.mxu1 }
 0x3d8   : > { %v2661_v10 = vadd.f32 %v2660_v22, %v2492_v35  ;;  %v2325_v31 = vadd.f32 %v2324_v56, %v2155_v17 }
 0x3da   : > { %v2787_v25 = vadd.f32 %v2661_v10, %v1663_v36 }
 0x3dc   : > { %2851 = vst [vmem:[#allocation10 + $0xb0] sm:$0xff] %v2787_v25 }
 0x3dd   : > { %v2493_v58 = vpop.f32.mrf.mxu2 }
 0x3de   : > { %v2494_v27 = vadd.f32 %v2493_v58, %v2325_v31  ;;  %v2662_v11 = vpop.f32.mrf.mxu3  ;;  %v2158_v12 = vpop.f32.mrf.mxu0  ;;  %v1666_v58 = vld [vmem:[#allocation10 + $0xc8] sm:$0xff] }
 0x3df   : > { %v2327_v62 = vpop.f32.mrf.mxu1 }
 0x3e0   : > { %v2663_v52 = vadd.f32 %v2662_v11, %v2494_v27  ;;  %v2328_v21 = vadd.f32 %v2327_v62, %v2158_v12  ;;  %v5059_v62 = vld [vmem:[#allocation66_spill] sm:$0xff] }
 0x3e1   : > { %2197 = vmatmul.bf16.gmra.mxu0 %v5054_v46  ;;  %v5061_v46 = vld [vmem:[#allocation68_spill] sm:$0xff] }
 0x3e2   : > { %v2788_v53 = vadd.f32 %v2663_v52, %v1664_v51  ;;  %2366 = vmatmul.bf16.gmra.mxu1 %v5055_v23  ;;  %2535 = vmatmul.bf16.gmra.mxu2 %v5056_v18  ;;  %v5058_v51 = vld [vmem:[#allocation65_spill] sm:$0xff]  ;;  %v5060_v52 = vld [vmem:[#allocation67_spill] sm:$0xff] }
 0x3e3   : > { %2704 = vmatmul.bf16.gmra.mxu3 %v5057_v34 }
 0x3e4   : > { %2852 = vst [vmem:[#allocation10 + $0xb8] sm:$0xff] %v2788_v53 }
 0x3e5   : > { %v2496_v28 = vpop.f32.mrf.mxu2 }
 0x3e6   : > { %v2497_v47 = vadd.f32 %v2496_v28, %v2328_v21  ;;  %v2665_v14 = vpop.f32.mrf.mxu3  ;;  %v2160_v39 = vpop.f32.mrf.mxu0  ;;  %v1667_v28 = vld [vmem:[#allocation10 + $0xd0] sm:$0xff] }
 0x3e7   : > { %v2329_v35 = vpop.f32.mrf.mxu1 }
 0x3e8   : > { %v2666_v22 = vadd.f32 %v2665_v14, %v2497_v47  ;;  %v2330_v36 = vadd.f32 %v2329_v35, %v2160_v39 }
 0x3ea   : > { %v2789_v17 = vadd.f32 %v2666_v22, %v1665_v48 }
 0x3ec   : > { %2853 = vst [vmem:[#allocation10 + $0xc0] sm:$0xff] %v2789_v17 }
 0x3ed   : > { %v2498_v56 = vpop.f32.mrf.mxu2 }
 0x3ee   : > { %v2499_v10 = vadd.f32 %v2498_v56, %v2330_v36  ;;  %v2667_v25 = vpop.f32.mrf.mxu3  ;;  %v2163_v31 = vpop.f32.mrf.mxu0  ;;  %v1668_v56 = vld [vmem:[#allocation10 + $0xd8] sm:$0xff] }
 0x3ef   : > { %v2332_v27 = vpop.f32.mrf.mxu1 }
 0x3f0   : > { %v2668_v11 = vadd.f32 %v2667_v25, %v2499_v10  ;;  %v2333_v53 = vadd.f32 %v2332_v27, %v2163_v31  ;;  %v5063_v27 = vld [vmem:[#allocation70_spill] sm:$0xff] }
 0x3f1   : > { %2202 = vmatmul.bf16.gmra.mxu0 %v5058_v51 }
 0x3f2   : > { %v2790_v12 = vadd.f32 %v2668_v11, %v1666_v58  ;;  %2371 = vmatmul.bf16.gmra.mxu1 %v5059_v62  ;;  %2540 = vmatmul.bf16.gmra.mxu2 %v5060_v52  ;;  %v5062_v58 = vld [vmem:[#allocation69_spill] sm:$0xff] }
 0x3f3   : > { %2709 = vmatmul.bf16.gmra.mxu3 %v5061_v46  ;;  %v1669_v46 = vld [vmem:[#allocation10 + $0xe0] sm:$0xff] }
 0x3f4   : > { %2854 = vst [vmem:[#allocation10 + $0xc8] sm:$0xff] %v2790_v12 }
 0x3f5   : > { %v2501_v23 = vpop.f32.mrf.mxu2 }
 0x3f6   : > { %v2502_v18 = vadd.f32 %v2501_v23, %v2333_v53  ;;  %v2670_v34 = vpop.f32.mrf.mxu3  ;;  %v2165_v21 = vpop.f32.mrf.mxu0 }
 0x3f7   : > { %v2334_v47 = vpop.f32.mrf.mxu1 }
 0x3f8   : > { %v2671_v14 = vadd.f32 %v2670_v34, %v2502_v18  ;;  %v2335_v48 = vadd.f32 %v2334_v47, %v2165_v21  ;;  %v1670_v47 = vld [vmem:[#allocation10 + $0xe8] sm:$0xff] }
 0x3fa   : > { %v2791_v39 = vadd.f32 %v2671_v14, %v1667_v28 }
 0x3fc   : > { %2855 = vst [vmem:[#allocation10 + $0xd0] sm:$0xff] %v2791_v39 }
 0x3fd   : > { %v2503_v35 = vpop.f32.mrf.mxu2 }
 0x3fe   : > { %v2504_v22 = vadd.f32 %v2503_v35, %v2335_v48  ;;  %v2672_v17 = vpop.f32.mrf.mxu3  ;;  %v2168_v36 = vpop.f32.mrf.mxu0 }
 0x3ff   : > { %v2337_v10 = vpop.f32.mrf.mxu1 }
 0x400   : > { %v2673_v25 = vadd.f32 %v2672_v17, %v2504_v22  ;;  %v2338_v11 = vadd.f32 %v2337_v10, %v2168_v36  ;;  %v1671_v10 = vld [vmem:[#allocation10 + $0xf0] sm:$0xff] }
 0x401   : > { %2207 = vmatmul.bf16.gmra.mxu0 %v4565_v5 }
 0x402   : > { %v2792_v31 = vadd.f32 %v2673_v25, %v1668_v56  ;;  %2376 = vmatmul.bf16.gmra.mxu1 %v4568_v63  ;;  %2545 = vmatmul.bf16.gmra.mxu2 %v5062_v58 }
 0x403   : > { %2714 = vmatmul.bf16.gmra.mxu3 %v5063_v27 }
 0x404   : > { %2856 = vst [vmem:[#allocation10 + $0xd8] sm:$0xff] %v2792_v31 }
 0x405   : > { %v2506_v51 = vpop.f32.mrf.mxu2 }
 0x406   : > { %v2507_v12 = vadd.f32 %v2506_v51, %v2338_v11  ;;  %v2675_v62 = vpop.f32.mrf.mxu3  ;;  %v2170_v52 = vpop.f32.mrf.mxu0 }
 0x407   : > { %v2339_v53 = vpop.f32.mrf.mxu1 }
 0x408   : > { %v2676_v23 = vadd.f32 %v2675_v62, %v2507_v12  ;;  %v2340_v34 = vadd.f32 %v2339_v53, %v2170_v52  ;;  %v1672_v12 = vld [vmem:[#allocation10 + $0xf8] sm:$0xff] }
 0x40a   : > { %v2793_v18 = vadd.f32 %v2676_v23, %v1669_v46 }
 0x40c   : > { %2857 = vst [vmem:[#allocation10 + $0xe0] sm:$0xff] %v2793_v18 }
 0x40d   : > { %v2508_v5 = vpop.f32.mrf.mxu2 }
 0x40e   : > { %v2509_v21 = vadd.f32 %v2508_v5, %v2340_v34  ;;  %v2677_v28 = vpop.f32.mrf.mxu3  ;;  %v2173_v63 = vpop.f32.mrf.mxu0  ;;  %v1673_v34 = vld [vmem:[#allocation10 + $0x100] sm:$0xff] }
 0x40f   : > { %v2342_v14 = vpop.f32.mrf.mxu1 }
 0x410   : > { %v2678_v39 = vadd.f32 %v2677_v28, %v2509_v21  ;;  %v2343_v35 = vadd.f32 %v2342_v14, %v2173_v63 }
 0x411   : > { %2212 = vmatmul.bf16.gmra.mxu0 %v4581_v38 }
 0x412   : > { %v2794_v48 = vadd.f32 %v2678_v39, %v1670_v47  ;;  %2381 = vmatmul.bf16.gmra.mxu1 %v4584_v3  ;;  %2550 = vmatmul.bf16.gmra.mxu2 %v4592_v19  ;;  %v1674_v39 = vld [vmem:[#allocation10 + $0x108] sm:$0xff] }
 0x413   : > { %2719 = vmatmul.bf16.gmra.mxu3 %v4595_v0 }
 0x414   : > { %2858 = vst [vmem:[#allocation10 + $0xe8] sm:$0xff] %v2794_v48 }
 0x415   : > { %v2511_v22 = vpop.f32.mrf.mxu2 }
 0x416   : > { %v2512_v17 = vadd.f32 %v2511_v22, %v2343_v35  ;;  %v2680_v36 = vpop.f32.mrf.mxu3  ;;  %v2175_v56 = vpop.f32.mrf.mxu0 }
 0x417   : > { %v2344_v25 = vpop.f32.mrf.mxu1 }
 0x418   : > { %v2681_v31 = vadd.f32 %v2680_v36, %v2512_v17  ;;  %v2345_v27 = vadd.f32 %v2344_v25, %v2175_v56 }
 0x41a   : > { %v2795_v58 = vadd.f32 %v2681_v31, %v1671_v10  ;;  %v1675_v10 = vld [vmem:[#allocation10 + $0x110] sm:$0xff] }
 0x41c   : > { %2859 = vst [vmem:[#allocation10 + $0xf0] sm:$0xff] %v2795_v58 }
 0x41d   : > { %v2513_v38 = vpop.f32.mrf.mxu2 }
 0x41e   : > { %v2514_v11 = vadd.f32 %v2513_v38, %v2345_v27  ;;  %v2682_v51 = vpop.f32.mrf.mxu3  ;;  %v2178_v3 = vpop.f32.mrf.mxu0 }
 0x41f   : > { %v2347_v19 = vpop.f32.mrf.mxu1 }
 0x420   : > { %v2683_v62 = vadd.f32 %v2682_v51, %v2514_v11  ;;  %v2348_v52 = vadd.f32 %v2347_v19, %v2178_v3  ;;  %v1676_v51 = vld [vmem:[#allocation10 + $0x118] sm:$0xff] }
 0x421   : > { %2217 = vmatmul.bf16.gmra.mxu0 %v4601_v40 }
 0x422   : > { %v2796_v0 = vadd.f32 %v2683_v62, %v1672_v12  ;;  %2386 = vmatmul.bf16.gmra.mxu1 %v4604_v1  ;;  %2555 = vmatmul.bf16.gmra.mxu2 %v4612_v42 }
 0x423   : > { %2724 = vmatmul.bf16.gmra.mxu3 %v4615_v15 }
 0x424   : > { %2860 = vst [vmem:[#allocation10 + $0xf8] sm:$0xff] %v2796_v0 }
 0x425   : > { %v2516_v46 = vpop.f32.mrf.mxu2 }
 0x426   : > { %v2517_v53 = vadd.f32 %v2516_v46, %v2348_v52  ;;  %v2685_v23 = vpop.f32.mrf.mxu3  ;;  %v2180_v18 = vpop.f32.mrf.mxu0  ;;  %v1677_v46 = vld [vmem:[#allocation10 + $0x120] sm:$0xff] }
 0x427   : > { %v2349_v5 = vpop.f32.mrf.mxu1 }
 0x428   : > { %v2686_v21 = vadd.f32 %v2685_v23, %v2517_v53  ;;  %v2350_v63 = vadd.f32 %v2349_v5, %v2180_v18 }
 0x42a   : > { %v2797_v28 = vadd.f32 %v2686_v21, %v1673_v34 }
 0x42c   : > { %2861 = vst [vmem:[#allocation10 + $0x100] sm:$0xff] %v2797_v28  ;;  %v1678_v28 = vld [vmem:[#allocation10 + $0x128] sm:$0xff] }
 0x42d   : > { %v2518_v40 = vpop.f32.mrf.mxu2 }
 0x42e   : > { %v2519_v47 = vadd.f32 %v2518_v40, %v2350_v63  ;;  %v2687_v14 = vpop.f32.mrf.mxu3  ;;  %v2183_v1 = vpop.f32.mrf.mxu0 }
 0x42f   : > { %v2352_v42 = vpop.f32.mrf.mxu1 }
 0x430   : > { %v2688_v48 = vadd.f32 %v2687_v14, %v2519_v47  ;;  %v2353_v35 = vadd.f32 %v2352_v42, %v2183_v1  ;;  %v1679_v42 = vld [vmem:[#allocation10 + $0x130] sm:$0xff] }
 0x431   : > { %2222 = vmatmul.bf16.gmra.mxu0 %v4621_v43 }
 0x432   : > { %v2798_v15 = vadd.f32 %v2688_v48, %v1674_v39  ;;  %2391 = vmatmul.bf16.gmra.mxu1 %v4624_v4  ;;  %2560 = vmatmul.bf16.gmra.mxu2 %v4632_v44 }
 0x433   : > { %2729 = vmatmul.bf16.gmra.mxu3 %v4635_v9 }
 0x434   : > { %2862 = vst [vmem:[#allocation10 + $0x108] sm:$0xff] %v2798_v15 }
 0x435   : > { %v2521_v22 = vpop.f32.mrf.mxu2 }
 0x436   : > { %v2522_v17 = vadd.f32 %v2521_v22, %v2353_v35  ;;  %v2690_v36 = vpop.f32.mrf.mxu3  ;;  %v2185_v56 = vpop.f32.mrf.mxu0 }
 0x437   : > { %v2354_v25 = vpop.f32.mrf.mxu1 }
 0x438   : > { %v2691_v31 = vadd.f32 %v2690_v36, %v2522_v17  ;;  %v2355_v27 = vadd.f32 %v2354_v25, %v2185_v56  ;;  %v1680_v56 = vld [vmem:[#allocation10 + $0x138] sm:$0xff] }
 0x43a   : > { %v2799_v58 = vadd.f32 %v2691_v31, %v1675_v10 }
 0x43c   : > { %2863 = vst [vmem:[#allocation10 + $0x110] sm:$0xff] %v2799_v58 }
 0x43d   : > { %v2523_v43 = vpop.f32.mrf.mxu2 }
 0x43e   : > { %v2524_v38 = vadd.f32 %v2523_v43, %v2355_v27  ;;  %v2692_v11 = vpop.f32.mrf.mxu3  ;;  %v2188_v4 = vpop.f32.mrf.mxu0 }
 0x43f   : > { %v2357_v44 = vpop.f32.mrf.mxu1 }
 0x440   : > { %v2693_v3 = vadd.f32 %v2692_v11, %v2524_v38  ;;  %v2358_v12 = vadd.f32 %v2357_v44, %v2188_v4  ;;  %v1681_v38 = vld [vmem:[#allocation10 + $0x140] sm:$0xff] }
 0x441   : > { %2227 = vmatmul.bf16.gmra.mxu0 %v4641_v45 }
 0x442   : > { %v2800_v9 = vadd.f32 %v2693_v3, %v1676_v51  ;;  %2396 = vmatmul.bf16.gmra.mxu1 %v4644_v49  ;;  %2565 = vmatmul.bf16.gmra.mxu2 %v4652_v13 }
 0x443   : > { %2734 = vmatmul.bf16.gmra.mxu3 %v4655_v33 }
 0x444   : > { %2864 = vst [vmem:[#allocation10 + $0x118] sm:$0xff] %v2800_v9 }
 0x445   : > { %v2526_v19 = vpop.f32.mrf.mxu2 }
 0x446   : > { %v2527_v62 = vadd.f32 %v2526_v19, %v2358_v12  ;;  %v2695_v0 = vpop.f32.mrf.mxu3  ;;  %v2190_v52 = vpop.f32.mrf.mxu0  ;;  %v1682_v12 = vld [vmem:[#allocation10 + $0x148] sm:$0xff] }
 0x447   : > { %v2359_v53 = vpop.f32.mrf.mxu1 }
 0x448   : > { %v2696_v23 = vadd.f32 %v2695_v0, %v2527_v62  ;;  %v2360_v34 = vadd.f32 %v2359_v53, %v2190_v52 }
 0x44a   : > { %v2801_v18 = vadd.f32 %v2696_v23, %v1677_v46  ;;  %v1683_v23 = vld [vmem:[#allocation10 + $0x150] sm:$0xff] }
 0x44c   : > { %2865 = vst [vmem:[#allocation10 + $0x120] sm:$0xff] %v2801_v18 }
 0x44d   : > { %v2528_v45 = vpop.f32.mrf.mxu2 }
 0x44e   : > { %v2529_v5 = vadd.f32 %v2528_v45, %v2360_v34  ;;  %v2697_v21 = vpop.f32.mrf.mxu3  ;;  %v2193_v49 = vpop.f32.mrf.mxu0 }
 0x44f   : > { %v2362_v13 = vpop.f32.mrf.mxu1 }
 0x450   : > { %v2698_v63 = vadd.f32 %v2697_v21, %v2529_v5  ;;  %v2363_v40 = vadd.f32 %v2362_v13, %v2193_v49 }
 0x451   : > { %2232 = vmatmul.bf16.gmra.mxu0 %v4661_v16 }
 0x452   : > { %v2802_v33 = vadd.f32 %v2698_v63, %v1678_v28  ;;  %2401 = vmatmul.bf16.gmra.mxu1 %v4664_v24  ;;  %2570 = vmatmul.bf16.gmra.mxu2 %v4672_v54  ;;  %v1684_v28 = vld [vmem:[#allocation10 + $0x158] sm:$0xff] }
 0x453   : > { %2739 = vmatmul.bf16.gmra.mxu3 %v4675_v2 }
 0x454   : > { %2866 = vst [vmem:[#allocation10 + $0x128] sm:$0xff] %v2802_v33 }
 0x455   : > { %v2531_v47 = vpop.f32.mrf.mxu2 }
 0x456   : > { %v2532_v14 = vadd.f32 %v2531_v47, %v2363_v40  ;;  %v2700_v1 = vpop.f32.mrf.mxu3  ;;  %v2195_v39 = vpop.f32.mrf.mxu0 }
 0x457   : > { %v2364_v48 = vpop.f32.mrf.mxu1 }
 0x458   : > { %v2701_v15 = vadd.f32 %v2700_v1, %v2532_v14  ;;  %v2365_v22 = vadd.f32 %v2364_v48, %v2195_v39  ;;  %v1685_v1 = vld [vmem:[#allocation10 + $0x160] sm:$0xff] }
 0x45a   : > { %v2803_v35 = vadd.f32 %v2701_v15, %v1679_v42 }
 0x45c   : > { %2867 = vst [vmem:[#allocation10 + $0x130] sm:$0xff] %v2803_v35 }
 0x45d   : > { %v2533_v16 = vpop.f32.mrf.mxu2 }
 0x45e   : > { %v2534_v17 = vadd.f32 %v2533_v16, %v2365_v22  ;;  %v2702_v36 = vpop.f32.mrf.mxu3  ;;  %v2198_v24 = vpop.f32.mrf.mxu0  ;;  %v1686_v16 = vld [vmem:[#allocation10 + $0x168] sm:$0xff] }
 0x45f   : > { %v2367_v54 = vpop.f32.mrf.mxu1 }
 0x460   : > { %v2703_v10 = vadd.f32 %v2702_v36, %v2534_v17  ;;  %v2368_v25 = vadd.f32 %v2367_v54, %v2198_v24 }
 0x461   : > { %2237 = vmatmul.bf16.gmra.mxu0 %v4681_v55 }
 0x462   : > { %v2804_v2 = vadd.f32 %v2703_v10, %v1680_v56  ;;  %2406 = vmatmul.bf16.gmra.mxu1 %v4684_v29  ;;  %2575 = vmatmul.bf16.gmra.mxu2 %v4692_v30 }
 0x463   : > { %2744 = vmatmul.bf16.gmra.mxu3 %v4695_v41 }
 0x464   : > { %2868 = vst [vmem:[#allocation10 + $0x138] sm:$0xff] %v2804_v2  ;;  %v1687_v2 = vld [vmem:[#allocation10 + $0x170] sm:$0xff] }
 0x465   : > { %v2536_v31 = vpop.f32.mrf.mxu2 }
 0x466   : > { %v2537_v58 = vadd.f32 %v2536_v31, %v2368_v25  ;;  %v2705_v27 = vpop.f32.mrf.mxu3  ;;  %v2200_v43 = vpop.f32.mrf.mxu0 }
 0x467   : > { %v2369_v11 = vpop.f32.mrf.mxu1 }
 0x468   : > { %v2706_v4 = vadd.f32 %v2705_v27, %v2537_v58  ;;  %v2370_v44 = vadd.f32 %v2369_v11, %v2200_v43  ;;  %v1688_v11 = vld [vmem:[#allocation10 + $0x178] sm:$0xff] }
 0x46a   : > { %v2805_v51 = vadd.f32 %v2706_v4, %v1681_v38 }
 0x46c   : > { %2869 = vst [vmem:[#allocation10 + $0x140] sm:$0xff] %v2805_v51 }
 0x46d   : > { %v2538_v55 = vpop.f32.mrf.mxu2 }
 0x46e   : > { %v2539_v3 = vadd.f32 %v2538_v55, %v2370_v44  ;;  %v2707_v9 = vpop.f32.mrf.mxu3  ;;  %v2203_v29 = vpop.f32.mrf.mxu0 }
 0x46f   : > { %v2372_v30 = vpop.f32.mrf.mxu1 }
 0x470   : > { %v2708_v19 = vadd.f32 %v2707_v9, %v2539_v3  ;;  %v2373_v62 = vadd.f32 %v2372_v30, %v2203_v29  ;;  %v1689_v29 = vld [vmem:[#allocation10 + $0x180] sm:$0xff] }
 0x471   : > { %2242 = vmatmul.bf16.gmra.mxu0 %v4701_v32 }
 0x472   : > { %v2806_v41 = vadd.f32 %v2708_v19, %v1682_v12  ;;  %2411 = vmatmul.bf16.gmra.mxu1 %v4704_v60  ;;  %2580 = vmatmul.bf16.gmra.mxu2 %v4712_v6 }
 0x473   : > { %2749 = vmatmul.bf16.gmra.mxu3 %v4715_v26 }
 0x474   : > { %2870 = vst [vmem:[#allocation10 + $0x148] sm:$0xff] %v2806_v41 }
 0x475   : > { %v2541_v0 = vpop.f32.mrf.mxu2 }
 0x476   : > { %v2542_v52 = vadd.f32 %v2541_v0, %v2373_v62  ;;  %v2710_v46 = vpop.f32.mrf.mxu3  ;;  %v2205_v53 = vpop.f32.mrf.mxu0 }
 0x477   : > { %v2374_v18 = vpop.f32.mrf.mxu1 }
 0x478   : > { %v2711_v34 = vadd.f32 %v2710_v46, %v2542_v52  ;;  %v2375_v5 = vadd.f32 %v2374_v18, %v2205_v53  ;;  %v1690_v53 = vld [vmem:[#allocation10 + $0x188] sm:$0xff] }
 0x47a   : > { %v2807_v45 = vadd.f32 %v2711_v34, %v1683_v23 }
 0x47c   : > { %2871 = vst [vmem:[#allocation10 + $0x150] sm:$0xff] %v2807_v45 }
 0x47d   : > { %v2543_v32 = vpop.f32.mrf.mxu2 }
 0x47e   : > { %v2544_v21 = vadd.f32 %v2543_v32, %v2375_v5  ;;  %v2712_v49 = vpop.f32.mrf.mxu3  ;;  %v2208_v60 = vpop.f32.mrf.mxu0 }
 0x47f   : > { %v2377_v6 = vpop.f32.mrf.mxu1 }
 0x480   : > { %v2713_v13 = vadd.f32 %v2712_v49, %v2544_v21  ;;  %v2378_v63 = vadd.f32 %v2377_v6, %v2208_v60  ;;  %v1691_v60 = vld [vmem:[#allocation10 + $0x190] sm:$0xff] }
 0x481   : > { %2247 = vmatmul.bf16.gmra.mxu0 %v4721_v7 }
 0x482   : > { %v2808_v26 = vadd.f32 %v2713_v13, %v1684_v28  ;;  %2416 = vmatmul.bf16.gmra.mxu1 %v4724_v37  ;;  %2585 = vmatmul.bf16.gmra.mxu2 %v4732_v57 }
 0x483   : > { %2754 = vmatmul.bf16.gmra.mxu3 %v4735_v59 }
 0x484   : > { %2872 = vst [vmem:[#allocation10 + $0x158] sm:$0xff] %v2808_v26 }
 0x485   : > { %v2546_v33 = vpop.f32.mrf.mxu2 }
 0x486   : > { %v2547_v40 = vadd.f32 %v2546_v33, %v2378_v63  ;;  %v2715_v47 = vpop.f32.mrf.mxu3  ;;  %v2210_v14 = vpop.f32.mrf.mxu0 }
 0x487   : > { %v2379_v39 = vpop.f32.mrf.mxu1 }
 0x488   : > { %v2716_v42 = vadd.f32 %v2715_v47, %v2547_v40  ;;  %v2380_v15 = vadd.f32 %v2379_v39, %v2210_v14  ;;  %v1692_v14 = vld [vmem:[#allocation10 + $0x198] sm:$0xff] }
 0x48a   : > { %v2809_v48 = vadd.f32 %v2716_v42, %v1685_v1 }
 0x48c   : > { %2873 = vst [vmem:[#allocation10 + $0x160] sm:$0xff] %v2809_v48 }
 0x48d   : > { %v2548_v7 = vpop.f32.mrf.mxu2 }
 0x48e   : > { %v2549_v35 = vadd.f32 %v2548_v7, %v2380_v15  ;;  %v2717_v22 = vpop.f32.mrf.mxu3  ;;  %v2213_v37 = vpop.f32.mrf.mxu0 }
 0x48f   : > { %v2382_v57 = vpop.f32.mrf.mxu1 }
 0x490   : > { %v2718_v17 = vadd.f32 %v2717_v22, %v2549_v35  ;;  %v2383_v36 = vadd.f32 %v2382_v57, %v2213_v37  ;;  %v1693_v37 = vld [vmem:[#allocation10 + $0x1a0] sm:$0xff] }
 0x491   : > { %2252 = vmatmul.bf16.gmra.mxu0 %v4741_v61 }
 0x492   : > { %v2810_v59 = vadd.f32 %v2718_v17, %v1686_v16  ;;  %2421 = vmatmul.bf16.gmra.mxu1 %v4744_v8  ;;  %2590 = vmatmul.bf16.gmra.mxu2 %v4752_v50 }
 0x493   : > { %2759 = vmatmul.bf16.gmra.mxu3 %v4755_v20 }
 0x494   : > { %2874 = vst [vmem:[#allocation10 + $0x168] sm:$0xff] %v2810_v59 }
 0x495   : > { %v2551_v24 = vpop.f32.mrf.mxu2 }
 0x496   : > { %v2552_v56 = vadd.f32 %v2551_v24, %v2383_v36  ;;  %v2720_v54 = vpop.f32.mrf.mxu3  ;;  %v2215_v10 = vpop.f32.mrf.mxu0 }
 0x497   : > { %v2384_v25 = vpop.f32.mrf.mxu1 }
 0x498   : > { %v2721_v31 = vadd.f32 %v2720_v54, %v2552_v56  ;;  %v2385_v27 = vadd.f32 %v2384_v25, %v2215_v10  ;;  %v1694_v10 = vld [vmem:[#allocation10 + $0x1a8] sm:$0xff] }
 0x49a   : > { %v2811_v58 = vadd.f32 %v2721_v31, %v1687_v2 }
 0x49c   : > { %2875 = vst [vmem:[#allocation10 + $0x170] sm:$0xff] %v2811_v58 }
 0x49d   : > { %v2553_v61 = vpop.f32.mrf.mxu2 }
 0x49e   : > { %v2554_v43 = vadd.f32 %v2553_v61, %v2385_v27  ;;  %v2722_v38 = vpop.f32.mrf.mxu3  ;;  %v2218_v8 = vpop.f32.mrf.mxu0 }
 0x49f   : > { %v2387_v50 = vpop.f32.mrf.mxu1 }
 0x4a0   : > { %v2723_v4 = vadd.f32 %v2722_v38, %v2554_v43  ;;  %v2388_v51 = vadd.f32 %v2387_v50, %v2218_v8  ;;  %v1695_v8 = vld [vmem:[#allocation10 + $0x1b0] sm:$0xff] }
 0x4a2   : > { %v2812_v20 = vadd.f32 %v2723_v4, %v1688_v11 }
 0x4a4   : > { %2876 = vst [vmem:[#allocation10 + $0x178] sm:$0xff] %v2812_v20 }
 0x4a5   : > { %v2556_v44 = vpop.f32.mrf.mxu2 }
 0x4a6   : > { %v2557_v55 = vadd.f32 %v2556_v44, %v2388_v51  ;;  %v2725_v3 = vpop.f32.mrf.mxu3  ;;  %v2220_v9 = vpop.f32.mrf.mxu0 }
 0x4a7   : > { %v2389_v12 = vpop.f32.mrf.mxu1 }
 0x4a8   : > { %v2726_v30 = vadd.f32 %v2725_v3, %v2557_v55  ;;  %v2390_v41 = vadd.f32 %v2389_v12, %v2220_v9  ;;  %v1696_v9 = vld [vmem:[#allocation10 + $0x1b8] sm:$0xff] }
 0x4aa   : > { %v2813_v19 = vadd.f32 %v2726_v30, %v1689_v29 }
 0x4ac   : > { %2877 = vst [vmem:[#allocation10 + $0x180] sm:$0xff] %v2813_v19 }
 0x4ad   : > { %v2558_v62 = vpop.f32.mrf.mxu2 }
 0x4ae   : > { %v2559_v0 = vadd.f32 %v2558_v62, %v2390_v41  ;;  %v2727_v52 = vpop.f32.mrf.mxu3  ;;  %v2223_v46 = vpop.f32.mrf.mxu0 }
 0x4af   : > { %v2392_v23 = vpop.f32.mrf.mxu1 }
 0x4b0   : > { %v2728_v18 = vadd.f32 %v2727_v52, %v2559_v0  ;;  %v2393_v45 = vadd.f32 %v2392_v23, %v2223_v46  ;;  %v1697_v46 = vld [vmem:[#allocation10 + $0x1c0] sm:$0xff] }
 0x4b2   : > { %v2814_v34 = vadd.f32 %v2728_v18, %v1690_v53 }
 0x4b4   : > { %2878 = vst [vmem:[#allocation10 + $0x188] sm:$0xff] %v2814_v34 }
 0x4b5   : > { %v2561_v5 = vpop.f32.mrf.mxu2 }
 0x4b6   : > { %v2562_v32 = vadd.f32 %v2561_v5, %v2393_v45  ;;  %v2730_v21 = vpop.f32.mrf.mxu3  ;;  %v2225_v49 = vpop.f32.mrf.mxu0 }
 0x4b7   : > { %v2394_v28 = vpop.f32.mrf.mxu1 }
 0x4b8   : > { %v2731_v6 = vadd.f32 %v2730_v21, %v2562_v32  ;;  %v2395_v26 = vadd.f32 %v2394_v28, %v2225_v49  ;;  %v1698_v49 = vld [vmem:[#allocation10 + $0x1c8] sm:$0xff] }
 0x4ba   : > { %v2815_v13 = vadd.f32 %v2731_v6, %v1691_v60 }
 0x4bc   : > { %2879 = vst [vmem:[#allocation10 + $0x190] sm:$0xff] %v2815_v13 }
 0x4bd   : > { %v2563_v63 = vpop.f32.mrf.mxu2 }
 0x4be   : > { %v2564_v33 = vadd.f32 %v2563_v63, %v2395_v26  ;;  %v2732_v40 = vpop.f32.mrf.mxu3  ;;  %v2228_v47 = vpop.f32.mrf.mxu0 }
 0x4bf   : > { %v2397_v1 = vpop.f32.mrf.mxu1 }
 0x4c0   : > { %v2733_v39 = vadd.f32 %v2732_v40, %v2564_v33  ;;  %v2398_v48 = vadd.f32 %v2397_v1, %v2228_v47  ;;  %v1699_v47 = vld [vmem:[#allocation10 + $0x1d0] sm:$0xff] }
 0x4c2   : > { %v2816_v42 = vadd.f32 %v2733_v39, %v1692_v14 }
 0x4c4   : > { %2880 = vst [vmem:[#allocation10 + $0x198] sm:$0xff] %v2816_v42 }
 0x4c5   : > { %v2566_v15 = vpop.f32.mrf.mxu2 }
 0x4c6   : > { %v2567_v7 = vadd.f32 %v2566_v15, %v2398_v48  ;;  %v2735_v35 = vpop.f32.mrf.mxu3  ;;  %v2230_v22 = vpop.f32.mrf.mxu0 }
 0x4c7   : > { %v2399_v16 = vpop.f32.mrf.mxu1 }
 0x4c8   : > { %v2736_v57 = vadd.f32 %v2735_v35, %v2567_v7  ;;  %v2400_v59 = vadd.f32 %v2399_v16, %v2230_v22  ;;  %v1700_v22 = vld [vmem:[#allocation10 + $0x1d8] sm:$0xff] }
 0x4ca   : > { %v2817_v17 = vadd.f32 %v2736_v57, %v1693_v37 }
 0x4cc   : > { %2881 = vst [vmem:[#allocation10 + $0x1a0] sm:$0xff] %v2817_v17 }
 0x4cd   : > { %v2568_v36 = vpop.f32.mrf.mxu2 }
 0x4ce   : > { %v2569_v24 = vadd.f32 %v2568_v36, %v2400_v59  ;;  %v2737_v56 = vpop.f32.mrf.mxu3  ;;  %v2233_v54 = vpop.f32.mrf.mxu0 }
 0x4cf   : > { %v2402_v2 = vpop.f32.mrf.mxu1 }
 0x4d0   : > { %v2738_v25 = vadd.f32 %v2737_v56, %v2569_v24  ;;  %v2403_v58 = vadd.f32 %v2402_v2, %v2233_v54  ;;  %v1701_v54 = vld [vmem:[#allocation10 + $0x1e0] sm:$0xff] }
 0x4d2   : > { %v2818_v31 = vadd.f32 %v2738_v25, %v1694_v10 }
 0x4d4   : > { %2882 = vst [vmem:[#allocation10 + $0x1a8] sm:$0xff] %v2818_v31 }
 0x4d5   : > { %v2571_v27 = vpop.f32.mrf.mxu2 }
 0x4d6   : > { %v2572_v61 = vadd.f32 %v2571_v27, %v2403_v58  ;;  %v2740_v43 = vpop.f32.mrf.mxu3  ;;  %v2235_v38 = vpop.f32.mrf.mxu0 }
 0x4d7   : > { %v2404_v11 = vpop.f32.mrf.mxu1 }
 0x4d8   : > { %v2741_v50 = vadd.f32 %v2740_v43, %v2572_v61  ;;  %v2405_v20 = vadd.f32 %v2404_v11, %v2235_v38  ;;  %v1702_v43 = vld [vmem:[#allocation10 + $0x1e8] sm:$0xff] }
 0x4da   : > { %v2819_v4 = vadd.f32 %v2741_v50, %v1695_v8 }
 0x4dc   : > { %2883 = vst [vmem:[#allocation10 + $0x1b0] sm:$0xff] %v2819_v4 }
 0x4dd   : > { %v2573_v51 = vpop.f32.mrf.mxu2 }
 0x4de   : > { %v2574_v44 = vadd.f32 %v2573_v51, %v2405_v20  ;;  %v2742_v55 = vpop.f32.mrf.mxu3  ;;  %v2238_v3 = vpop.f32.mrf.mxu0 }
 0x4df   : > { %v2407_v29 = vpop.f32.mrf.mxu1 }
 0x4e0   : > { %v2743_v12 = vadd.f32 %v2742_v55, %v2574_v44  ;;  %v2408_v19 = vadd.f32 %v2407_v29, %v2238_v3  ;;  %v1703_v55 = vld [vmem:[#allocation10 + $0x1f0] sm:$0xff] }
 0x4e2   : > { %v2820_v30 = vadd.f32 %v2743_v12, %v1696_v9 }
 0x4e4   : > { %2884 = vst [vmem:[#allocation10 + $0x1b8] sm:$0xff] %v2820_v30 }
 0x4e5   : > { %v2576_v41 = vpop.f32.mrf.mxu2 }
 0x4e6   : > { %v2577_v62 = vadd.f32 %v2576_v41, %v2408_v19  ;;  %v2745_v0 = vpop.f32.mrf.mxu3  ;;  %v2240_v52 = vpop.f32.mrf.mxu0 }
 0x4e7   : > { %v2409_v53 = vpop.f32.mrf.mxu1 }
 0x4e8   : > { %v2746_v23 = vadd.f32 %v2745_v0, %v2577_v62  ;;  %v2410_v34 = vadd.f32 %v2409_v53, %v2240_v52  ;;  %v1704_v62 = vld [vmem:[#allocation10 + $0x1f8] sm:$0xff] }
 0x4ea   : > { %v2821_v18 = vadd.f32 %v2746_v23, %v1697_v46 }
 0x4ec   : > { %2885 = vst [vmem:[#allocation10 + $0x1c0] sm:$0xff] %v2821_v18 }
 0x4ed   : > { %v2578_v45 = vpop.f32.mrf.mxu2 }
 0x4ee   : > { %v2579_v5 = vadd.f32 %v2578_v45, %v2410_v34  ;;  %v2747_v32 = vpop.f32.mrf.mxu3  ;;  %v2243_v21 = vpop.f32.mrf.mxu0 }
 0x4ef   : > { %v2412_v60 = vpop.f32.mrf.mxu1 }
 0x4f0   : > { %v2748_v28 = vadd.f32 %v2747_v32, %v2579_v5  ;;  %v2413_v13 = vadd.f32 %v2412_v60, %v2243_v21 }
 0x4f2   : > { %v2822_v6 = vadd.f32 %v2748_v28, %v1698_v49 }
 0x4f4   : > { %2886 = vst [vmem:[#allocation10 + $0x1c8] sm:$0xff] %v2822_v6 }
 0x4f5   : > { %v2581_v26 = vpop.f32.mrf.mxu2 }
 0x4f6   : > { %v2582_v63 = vadd.f32 %v2581_v26, %v2413_v13  ;;  %v2750_v33 = vpop.f32.mrf.mxu3  ;;  %v2245_v40 = vpop.f32.mrf.mxu0 }
 0x4f7   : > { %v2414_v14 = vpop.f32.mrf.mxu1 }
 0x4f8   : > { %v2751_v1 = vadd.f32 %v2750_v33, %v2582_v63  ;;  %v2415_v42 = vadd.f32 %v2414_v14, %v2245_v40 }
 0x4fa   : > { %v2823_v39 = vadd.f32 %v2751_v1, %v1699_v47 }
 0x4fc   : > { %2887 = vst [vmem:[#allocation10 + $0x1d0] sm:$0xff] %v2823_v39 }
 0x4fd   : > { %v2583_v48 = vpop.f32.mrf.mxu2 }
 0x4fe   : > { %v2584_v15 = vadd.f32 %v2583_v48, %v2415_v42  ;;  %v2752_v7 = vpop.f32.mrf.mxu3  ;;  %v2248_v35 = vpop.f32.mrf.mxu0 }
 0x4ff   : > { %v2417_v37 = vpop.f32.mrf.mxu1 }
 0x500   : > { %v2753_v16 = vadd.f32 %v2752_v7, %v2584_v15  ;;  %v2418_v17 = vadd.f32 %v2417_v37, %v2248_v35 }
 0x502   : > { %v2824_v57 = vadd.f32 %v2753_v16, %v1700_v22 }
 0x504   : > { %2888 = vst [vmem:[#allocation10 + $0x1d8] sm:$0xff] %v2824_v57 }
 0x505   : > { %v2586_v59 = vpop.f32.mrf.mxu2 }
 0x506   : > { %v2587_v36 = vadd.f32 %v2586_v59, %v2418_v17  ;;  %v2755_v24 = vpop.f32.mrf.mxu3  ;;  %v2250_v56 = vpop.f32.mrf.mxu0 }
 0x507   : > { %v2419_v10 = vpop.f32.mrf.mxu1 }
 0x508   : > { %v2756_v2 = vadd.f32 %v2755_v24, %v2587_v36  ;;  %v2420_v31 = vadd.f32 %v2419_v10, %v2250_v56 }
 0x50a   : > { %v2825_v25 = vadd.f32 %v2756_v2, %v1701_v54 }
 0x50c   : > { %2889 = vst [vmem:[#allocation10 + $0x1e0] sm:$0xff] %v2825_v25 }
 0x50d   : > { %v2588_v58 = vpop.f32.mrf.mxu2 }
 0x50e   : > { %v2589_v27 = vadd.f32 %v2588_v58, %v2420_v31  ;;  %v2757_v61 = vpop.f32.mrf.mxu3  ;;  %v2253_v38 = vpop.f32.mrf.mxu0 }
 0x50f   : > { %v2422_v8 = vpop.f32.mrf.mxu1 }
 0x510   : > { %v2758_v11 = vadd.f32 %v2757_v61, %v2589_v27  ;;  %v2423_v4 = vadd.f32 %v2422_v8, %v2253_v38 }
 0x512   : > { %v2826_v50 = vadd.f32 %v2758_v11, %v1702_v43 }
 0x514   : > { %2890 = vst [vmem:[#allocation10 + $0x1e8] sm:$0xff] %v2826_v50 }
 0x515   : > { %v2591_v20 = vpop.f32.mrf.mxu2 }
 0x516   : > { %v2592_v51 = vadd.f32 %v2591_v20, %v2423_v4  ;;  %v2760_v44 = vpop.f32.mrf.mxu3  ;;  %v2255_v9 = vpop.f32.mrf.mxu0 }
 0x517   : > { %v2424_v29 = vpop.f32.mrf.mxu1 }
 0x518   : > { %v2761_v3 = vadd.f32 %v2760_v44, %v2592_v51  ;;  %v2425_v30 = vadd.f32 %v2424_v29, %v2255_v9 }
 0x51a   : > { %v2827_v12 = vadd.f32 %v2761_v3, %v1703_v55 }
 0x51c   : > { %2891 = vst [vmem:[#allocation10 + $0x1f0] sm:$0xff] %v2827_v12 }
 0x51d   : > { %v2593_v19 = vpop.f32.mrf.mxu2 }
 0x51e   : > { %v2594_v41 = vadd.f32 %v2593_v19, %v2425_v30  ;;  %v2762_v0 = vpop.f32.mrf.mxu3 }
 0x520   : > { %v2763_v52 = vadd.f32 %v2762_v0, %v2594_v41  ;;  %2896 = sbr.rel (%p3492_p2) target bundleno = 1384 (0x568), region = 64 }
 0x522   : > { %v2828_v46 = vadd.f32 %v2763_v52, %v1704_v62 }
 0x524   : > { %2892 = vst [vmem:[#allocation10 + $0x1f8] sm:$0xff] %v2828_v46 }
 0x525   : > { %v2897_v53 = vld [vmem:[#allocation10] sm:$0xff]  ;;  %v4853_v23 = vld [vmem:[%s4945_s4] ss:$0 sm:$0xff]  ;;  %v2898_v18 = vld [vmem:[#allocation10 + $0x8] sm:$0xff] }
 0x526   : > { %v2899_v34 = vld [vmem:[#allocation10 + $0x10] sm:$0xff]  ;;  %v2900_v45 = vld [vmem:[#allocation10 + $0x18] sm:$0xff]  ;;  %v2965_v5 = vadd.f32 %v4853_v23, %v2897_v53  ;;  %v2966_v32 = vadd.f32 %v4853_v23, %v2898_v18  ;;  %v2901_v49 = vld [vmem:[#allocation10 + $0x20] sm:$0xff] }
 0x527   : > { %v2967_v21 = vadd.f32 %v4853_v23, %v2899_v34  ;;  %v2902_v60 = vld [vmem:[#allocation10 + $0x28] sm:$0xff]  ;;  %v2968_v28 = vadd.f32 %v4853_v23, %v2900_v45  ;;  %v2903_v6 = vld [vmem:[#allocation10 + $0x30] sm:$0xff]  ;;  %v2969_v13 = vadd.f32 %v4853_v23, %v2901_v49  ;;  %v2904_v26 = vld [vmem:[#allocation10 + $0x38] sm:$0xff] }
 0x528   : > { %3029 = vst [vmem:[#allocation10] sm:$0xff] %v2965_v5  ;;  %v2970_v63 = vadd.f32 %v4853_v23, %v2902_v60  ;;  %v2905_v33 = vld [vmem:[#allocation10 + $0x40] sm:$0xff]  ;;  %v2971_v40 = vadd.f32 %v4853_v23, %v2903_v6  ;;  %v2906_v47 = vld [vmem:[#allocation10 + $0x48] sm:$0xff]  ;;  %v2972_v14 = vadd.f32 %v4853_v23, %v2904_v26  ;;  %v2907_v1 = vld [vmem:[#allocation10 + $0x50] sm:$0xff] }
 0x529   : > { %3030 = vst [vmem:[#allocation10 + $0x8] sm:$0xff] %v2966_v32  ;;  %v2973_v39 = vadd.f32 %v4853_v23, %v2905_v33  ;;  %v2908_v42 = vld [vmem:[#allocation10 + $0x58] sm:$0xff]  ;;  %v2974_v48 = vadd.f32 %v4853_v23, %v2906_v47  ;;  %v2909_v15 = vld [vmem:[#allocation10 + $0x60] sm:$0xff]  ;;  %v2975_v7 = vadd.f32 %v4853_v23, %v2907_v1  ;;  %v2910_v35 = vld [vmem:[#allocation10 + $0x68] sm:$0xff] }
 0x52a   : > { %3031 = vst [vmem:[#allocation10 + $0x10] sm:$0xff] %v2967_v21  ;;  %v2976_v22 = vadd.f32 %v4853_v23, %v2908_v42  ;;  %v2911_v37 = vld [vmem:[#allocation10 + $0x70] sm:$0xff]  ;;  %v2977_v16 = vadd.f32 %v4853_v23, %v2909_v15  ;;  %v2912_v57 = vld [vmem:[#allocation10 + $0x78] sm:$0xff]  ;;  %v2978_v17 = vadd.f32 %v4853_v23, %v2910_v35  ;;  %v2913_v59 = vld [vmem:[#allocation10 + $0x80] sm:$0xff] }
 0x52b   : > { %3032 = vst [vmem:[#allocation10 + $0x18] sm:$0xff] %v2968_v28  ;;  %v2979_v36 = vadd.f32 %v4853_v23, %v2911_v37  ;;  %v2914_v24 = vld [vmem:[#allocation10 + $0x88] sm:$0xff]  ;;  %v2980_v56 = vadd.f32 %v4853_v23, %v2912_v57  ;;  %v2915_v54 = vld [vmem:[#allocation10 + $0x90] sm:$0xff]  ;;  %v2981_v10 = vadd.f32 %v4853_v23, %v2913_v59  ;;  %v2916_v2 = vld [vmem:[#allocation10 + $0x98] sm:$0xff] }
 0x52c   : > { %3033 = vst [vmem:[#allocation10 + $0x20] sm:$0xff] %v2969_v13  ;;  %v2982_v25 = vadd.f32 %v4853_v23, %v2914_v24  ;;  %v2917_v31 = vld [vmem:[#allocation10 + $0xa0] sm:$0xff]  ;;  %v2983_v58 = vadd.f32 %v4853_v23, %v2915_v54  ;;  %v2918_v27 = vld [vmem:[#allocation10 + $0xa8] sm:$0xff]  ;;  %v2984_v61 = vadd.f32 %v4853_v23, %v2916_v2  ;;  %v2919_v43 = vld [vmem:[#allocation10 + $0xb0] sm:$0xff] }
 0x52d   : > { %3034 = vst [vmem:[#allocation10 + $0x28] sm:$0xff] %v2970_v63  ;;  %v2985_v38 = vadd.f32 %v4853_v23, %v2917_v31  ;;  %v2920_v8 = vld [vmem:[#allocation10 + $0xb8] sm:$0xff]  ;;  %v2986_v11 = vadd.f32 %v4853_v23, %v2918_v27  ;;  %v2921_v50 = vld [vmem:[#allocation10 + $0xc0] sm:$0xff]  ;;  %v2987_v4 = vadd.f32 %v4853_v23, %v2919_v43  ;;  %v2922_v20 = vld [vmem:[#allocation10 + $0xc8] sm:$0xff] }
 0x52e   : > { %3035 = vst [vmem:[#allocation10 + $0x30] sm:$0xff] %v2971_v40  ;;  %v2988_v51 = vadd.f32 %v4853_v23, %v2920_v8  ;;  %v2923_v44 = vld [vmem:[#allocation10 + $0xd0] sm:$0xff]  ;;  %v2989_v55 = vadd.f32 %v4853_v23, %v2921_v50  ;;  %v2924_v3 = vld [vmem:[#allocation10 + $0xd8] sm:$0xff]  ;;  %v2990_v9 = vadd.f32 %v4853_v23, %v2922_v20  ;;  %v2925_v29 = vld [vmem:[#allocation10 + $0xe0] sm:$0xff] }
 0x52f   : > { %3036 = vst [vmem:[#allocation10 + $0x38] sm:$0xff] %v2972_v14  ;;  %v2991_v12 = vadd.f32 %v4853_v23, %v2923_v44  ;;  %v2926_v30 = vld [vmem:[#allocation10 + $0xe8] sm:$0xff]  ;;  %v2992_v19 = vadd.f32 %v4853_v23, %v2924_v3  ;;  %v2927_v41 = vld [vmem:[#allocation10 + $0xf0] sm:$0xff]  ;;  %v2993_v62 = vadd.f32 %v4853_v23, %v2925_v29  ;;  %v2928_v0 = vld [vmem:[#allocation10 + $0xf8] sm:$0xff] }
 0x530   : > { %3037 = vst [vmem:[#allocation10 + $0x40] sm:$0xff] %v2973_v39  ;;  %v2994_v52 = vadd.f32 %v4853_v23, %v2926_v30  ;;  %v2929_v46 = vld [vmem:[#allocation10 + $0x100] sm:$0xff]  ;;  %v2995_v53 = vadd.f32 %v4853_v23, %v2927_v41  ;;  %v2930_v18 = vld [vmem:[#allocation10 + $0x108] sm:$0xff]  ;;  %v2996_v34 = vadd.f32 %v4853_v23, %v2928_v0  ;;  %v2931_v45 = vld [vmem:[#allocation10 + $0x110] sm:$0xff] }
 0x531   : > { %3038 = vst [vmem:[#allocation10 + $0x48] sm:$0xff] %v2974_v48  ;;  %v2997_v5 = vadd.f32 %v4853_v23, %v2929_v46  ;;  %v2932_v32 = vld [vmem:[#allocation10 + $0x118] sm:$0xff]  ;;  %v2998_v21 = vadd.f32 %v4853_v23, %v2930_v18  ;;  %v2933_v49 = vld [vmem:[#allocation10 + $0x120] sm:$0xff]  ;;  %v2999_v60 = vadd.f32 %v4853_v23, %v2931_v45  ;;  %v2934_v28 = vld [vmem:[#allocation10 + $0x128] sm:$0xff] }
 0x532   : > { %3039 = vst [vmem:[#allocation10 + $0x50] sm:$0xff] %v2975_v7  ;;  %v3000_v6 = vadd.f32 %v4853_v23, %v2932_v32  ;;  %v2935_v13 = vld [vmem:[#allocation10 + $0x130] sm:$0xff]  ;;  %v3001_v26 = vadd.f32 %v4853_v23, %v2933_v49  ;;  %v2936_v63 = vld [vmem:[#allocation10 + $0x138] sm:$0xff]  ;;  %v3002_v33 = vadd.f32 %v4853_v23, %v2934_v28  ;;  %v2937_v40 = vld [vmem:[#allocation10 + $0x140] sm:$0xff] }
 0x533   : > { %3040 = vst [vmem:[#allocation10 + $0x58] sm:$0xff] %v2976_v22  ;;  %v3003_v47 = vadd.f32 %v4853_v23, %v2935_v13  ;;  %v2938_v14 = vld [vmem:[#allocation10 + $0x148] sm:$0xff]  ;;  %v3004_v1 = vadd.f32 %v4853_v23, %v2936_v63  ;;  %v2939_v39 = vld [vmem:[#allocation10 + $0x150] sm:$0xff]  ;;  %v3005_v42 = vadd.f32 %v4853_v23, %v2937_v40  ;;  %v2940_v48 = vld [vmem:[#allocation10 + $0x158] sm:$0xff] }
 0x534   : > { %3041 = vst [vmem:[#allocation10 + $0x60] sm:$0xff] %v2977_v16  ;;  %v3006_v15 = vadd.f32 %v4853_v23, %v2938_v14  ;;  %v2941_v7 = vld [vmem:[#allocation10 + $0x160] sm:$0xff]  ;;  %v3007_v35 = vadd.f32 %v4853_v23, %v2939_v39  ;;  %v2942_v22 = vld [vmem:[#allocation10 + $0x168] sm:$0xff]  ;;  %v3008_v37 = vadd.f32 %v4853_v23, %v2940_v48  ;;  %v2943_v16 = vld [vmem:[#allocation10 + $0x170] sm:$0xff] }
 0x535   : > { %3042 = vst [vmem:[#allocation10 + $0x68] sm:$0xff] %v2978_v17  ;;  %v3009_v57 = vadd.f32 %v4853_v23, %v2941_v7  ;;  %v2944_v17 = vld [vmem:[#allocation10 + $0x178] sm:$0xff]  ;;  %v3010_v59 = vadd.f32 %v4853_v23, %v2942_v22  ;;  %v3011_v24 = vadd.f32 %v4853_v23, %v2943_v16 }
 0x536   : > { %3043 = vst [vmem:[#allocation10 + $0x70] sm:$0xff] %v2979_v36  ;;  %v2945_v36 = vld [vmem:[#allocation10 + $0x180] sm:$0xff]  ;;  %v3012_v54 = vadd.f32 %v4853_v23, %v2944_v17 }
 0x537   : > { %3044 = vst [vmem:[#allocation10 + $0x78] sm:$0xff] %v2980_v56  ;;  %v2946_v56 = vld [vmem:[#allocation10 + $0x188] sm:$0xff]  ;;  %v3013_v2 = vadd.f32 %v4853_v23, %v2945_v36 }
 0x538   : > { %3045 = vst [vmem:[#allocation10 + $0x80] sm:$0xff] %v2981_v10  ;;  %v2947_v10 = vld [vmem:[#allocation10 + $0x190] sm:$0xff]  ;;  %v3014_v31 = vadd.f32 %v4853_v23, %v2946_v56 }
 0x539   : > { %3046 = vst [vmem:[#allocation10 + $0x88] sm:$0xff] %v2982_v25  ;;  %v2948_v25 = vld [vmem:[#allocation10 + $0x198] sm:$0xff]  ;;  %v3015_v27 = vadd.f32 %v4853_v23, %v2947_v10 }
 0x53a   : > { %3047 = vst [vmem:[#allocation10 + $0x90] sm:$0xff] %v2983_v58  ;;  %v2949_v58 = vld [vmem:[#allocation10 + $0x1a0] sm:$0xff]  ;;  %v3016_v43 = vadd.f32 %v4853_v23, %v2948_v25 }
 0x53b   : > { %3048 = vst [vmem:[#allocation10 + $0x98] sm:$0xff] %v2984_v61  ;;  %v2950_v61 = vld [vmem:[#allocation10 + $0x1a8] sm:$0xff]  ;;  %v3017_v8 = vadd.f32 %v4853_v23, %v2949_v58 }
 0x53c   : > { %3049 = vst [vmem:[#allocation10 + $0xa0] sm:$0xff] %v2985_v38  ;;  %v2951_v38 = vld [vmem:[#allocation10 + $0x1b0] sm:$0xff]  ;;  %v3018_v50 = vadd.f32 %v4853_v23, %v2950_v61 }
 0x53d   : > { %3050 = vst [vmem:[#allocation10 + $0xa8] sm:$0xff] %v2986_v11  ;;  %v2952_v11 = vld [vmem:[#allocation10 + $0x1b8] sm:$0xff]  ;;  %v3019_v20 = vadd.f32 %v4853_v23, %v2951_v38 }
 0x53e   : > { %3051 = vst [vmem:[#allocation10 + $0xb0] sm:$0xff] %v2987_v4  ;;  %v2953_v4 = vld [vmem:[#allocation10 + $0x1c0] sm:$0xff]  ;;  %v3020_v44 = vadd.f32 %v4853_v23, %v2952_v11 }
 0x53f   : > { %3052 = vst [vmem:[#allocation10 + $0xb8] sm:$0xff] %v2988_v51  ;;  %v2954_v51 = vld [vmem:[#allocation10 + $0x1c8] sm:$0xff]  ;;  %v3021_v3 = vadd.f32 %v4853_v23, %v2953_v4 }
 0x540   : > { %3053 = vst [vmem:[#allocation10 + $0xc0] sm:$0xff] %v2989_v55  ;;  %v2955_v55 = vld [vmem:[#allocation10 + $0x1d0] sm:$0xff]  ;;  %v3022_v29 = vadd.f32 %v4853_v23, %v2954_v51 }
 0x541   : > { %3054 = vst [vmem:[#allocation10 + $0xc8] sm:$0xff] %v2990_v9  ;;  %v2956_v9 = vld [vmem:[#allocation10 + $0x1d8] sm:$0xff]  ;;  %v3023_v30 = vadd.f32 %v4853_v23, %v2955_v55 }
 0x542   : > { %3055 = vst [vmem:[#allocation10 + $0xd0] sm:$0xff] %v2991_v12  ;;  %v2957_v12 = vld [vmem:[#allocation10 + $0x1e0] sm:$0xff]  ;;  %v3024_v41 = vadd.f32 %v4853_v23, %v2956_v9 }
 0x543   : > { %3056 = vst [vmem:[#allocation10 + $0xd8] sm:$0xff] %v2992_v19  ;;  %v2958_v19 = vld [vmem:[#allocation10 + $0x1e8] sm:$0xff]  ;;  %v3025_v0 = vadd.f32 %v4853_v23, %v2957_v12 }
 0x544   : > { %3057 = vst [vmem:[#allocation10 + $0xe0] sm:$0xff] %v2993_v62  ;;  %v2959_v62 = vld [vmem:[#allocation10 + $0x1f0] sm:$0xff]  ;;  %v3026_v46 = vadd.f32 %v4853_v23, %v2958_v19 }
 0x545   : > { %3058 = vst [vmem:[#allocation10 + $0xe8] sm:$0xff] %v2994_v52  ;;  %v2960_v52 = vld [vmem:[#allocation10 + $0x1f8] sm:$0xff] }
 0x546   : > { %3059 = vst [vmem:[#allocation10 + $0xf0] sm:$0xff] %v2995_v53  ;;  %v3027_v53 = vadd.f32 %v4853_v23, %v2959_v62  ;;  %v3028_v18 = vadd.f32 %v4853_v23, %v2960_v52 }
 0x547   : > { %3060 = vst [vmem:[#allocation10 + $0xf8] sm:$0xff] %v2996_v34 }
 0x548   : > { %3061 = vst [vmem:[#allocation10 + $0x100] sm:$0xff] %v2997_v5 }
 0x549   : > { %3062 = vst [vmem:[#allocation10 + $0x108] sm:$0xff] %v2998_v21 }
 0x54a   : > { %3063 = vst [vmem:[#allocation10 + $0x110] sm:$0xff] %v2999_v60 }
 0x54b   : > { %3064 = vst [vmem:[#allocation10 + $0x118] sm:$0xff] %v3000_v6 }
 0x54c   : > { %3065 = vst [vmem:[#allocation10 + $0x120] sm:$0xff] %v3001_v26 }
 0x54d   : > { %3066 = vst [vmem:[#allocation10 + $0x128] sm:$0xff] %v3002_v33 }
 0x54e   : > { %3067 = vst [vmem:[#allocation10 + $0x130] sm:$0xff] %v3003_v47 }
 0x54f   : > { %3068 = vst [vmem:[#allocation10 + $0x138] sm:$0xff] %v3004_v1 }
 0x550   : > { %3069 = vst [vmem:[#allocation10 + $0x140] sm:$0xff] %v3005_v42 }
 0x551   : > { %3070 = vst [vmem:[#allocation10 + $0x148] sm:$0xff] %v3006_v15 }
 0x552   : > { %3071 = vst [vmem:[#allocation10 + $0x150] sm:$0xff] %v3007_v35 }
 0x553   : > { %3072 = vst [vmem:[#allocation10 + $0x158] sm:$0xff] %v3008_v37 }
 0x554   : > { %3073 = vst [vmem:[#allocation10 + $0x160] sm:$0xff] %v3009_v57 }
 0x555   : > { %3074 = vst [vmem:[#allocation10 + $0x168] sm:$0xff] %v3010_v59 }
 0x556   : > { %3075 = vst [vmem:[#allocation10 + $0x170] sm:$0xff] %v3011_v24 }
 0x557   : > { %3076 = vst [vmem:[#allocation10 + $0x178] sm:$0xff] %v3012_v54 }
 0x558   : > { %3077 = vst [vmem:[#allocation10 + $0x180] sm:$0xff] %v3013_v2 }
 0x559   : > { %3078 = vst [vmem:[#allocation10 + $0x188] sm:$0xff] %v3014_v31 }
 0x55a   : > { %3079 = vst [vmem:[#allocation10 + $0x190] sm:$0xff] %v3015_v27 }
 0x55b   : > { %3080 = vst [vmem:[#allocation10 + $0x198] sm:$0xff] %v3016_v43 }
 0x55c   : > { %3081 = vst [vmem:[#allocation10 + $0x1a0] sm:$0xff] %v3017_v8 }
 0x55d   : > { %3082 = vst [vmem:[#allocation10 + $0x1a8] sm:$0xff] %v3018_v50 }
 0x55e   : > { %3083 = vst [vmem:[#allocation10 + $0x1b0] sm:$0xff] %v3019_v20 }
 0x55f   : > { %3084 = vst [vmem:[#allocation10 + $0x1b8] sm:$0xff] %v3020_v44 }
 0x560   : > { %3085 = vst [vmem:[#allocation10 + $0x1c0] sm:$0xff] %v3021_v3 }
 0x561   : > { %3086 = vst [vmem:[#allocation10 + $0x1c8] sm:$0xff] %v3022_v29 }
 0x562   : > { %3087 = vst [vmem:[#allocation10 + $0x1d0] sm:$0xff] %v3023_v30 }
 0x563   : > { %3088 = vst [vmem:[#allocation10 + $0x1d8] sm:$0xff] %v3024_v41 }
 0x564   : > { %3089 = vst [vmem:[#allocation10 + $0x1e0] sm:$0xff] %v3025_v0 }
 0x565   : > { %3090 = vst [vmem:[#allocation10 + $0x1e8] sm:$0xff] %v3026_v46 }
 0x566   : > { %3091 = vst [vmem:[#allocation10 + $0x1f0] sm:$0xff] %v3027_v53 }
 0x567   : > { %3092 = vst [vmem:[#allocation10 + $0x1f8] sm:$0xff] %v3028_v18 }
 0x568 PF: > { %p3599_p3 = scmp.eq.s32.totalorder %s3951_s24, 1  ;;  %s3103_s26 = sshll.u32 %s4946_s5, 4  ;;  %s3104_s26 = int_to_ptr.hbm [resolvable:$true] %s3103_s26 }
 0x569   : > { %s3889_s28 = smov [#allocation10]   ;;  %s3890_s8 = smov 128  }
 0x56a   : > { %s3101_s9 = sshll.u32 %s3889_s28, 4  ;;  %s3891_s10 = smov 8   ;;  %s3102_s9 = int_to_ptr.vmem [resolvable:$true] %s3101_s9 }
 0x56b   : > { %3577 = dma.vmem_to_hbm [thread:$0]  (%p3599_p3), %s3102_s9, 8192, %s3104_s26, [#allocation4], %s3890_s8, %s3890_s8, %s3891_s10  }
 0x56c   : > { %3852 = dma.done.wait (%p3599_p3), [#allocation4], 8192  }
 0x56d   : > { %3854 = vsyncadd (%p3599_p3), [#allocation4], 4294959104 }
 0x56e PF: > { %s23_s23 = sadd.s32 1, %s3877_s23   ;;  %s5064_s11 = sld [smem:[#allocation16_spill]] }
 0x56f   : > { %p20_p4 = scmp.ge.s32.totalorder %s23_s23, 4   ;;  %s5065_s20 = sld [smem:[#allocation18_spill]] }
 0x570   : > { %s5066_s24 = sld [smem:[#allocation17_spill]]  ;;  %s5067_s18 = smov %s3861_s19 }
 0x571   : > { %s5069_s21 = smov %s3873_s22 }
 0x572   :  { %22 = sbr.rel (!%p20_p4) target bundleno = 11 (0xb), region = 110 }
 0x574   : > { %s5068_s19 = smov %s5064_s11 }
 0x576   : > { %s5070_s22 = smov %s5066_s24 }
 0x577   :  { %3120 = vsyncpa [#allocation3], 1 }
 0x578   :  { %3122 = vsyncpa [#allocation3 + $0x1], 1 }
 0x579   :  { %3123 = vsyncpa [#allocation6], 1 }
 0x57a   :  { %3125 = vsyncpa [#allocation6 + $0x1], 1 }
 0x57b   :  { %3126 = vsyncpa [#allocation9], 1 }
 0x57c   :  { %3128 = vsyncpa [#allocation9 + $0x1], 1 }
 0x57d   :  { %3129 = vsyncpa [#allocation4], 1 }
 0x57e   :  { %3131 = vsyncpa [#allocation4 + $0x1], 1 }

</bundles_post_ra>
